<compile_context>
chip_gen: v5e
topology: v5e:2x2
jax: 0.10.0
libtpu: 0.0.40
codegen_flags: <defaults>
</compile_context>

<pallas_src>
import jax
import jax.numpy as jnp
from jax.experimental import pallas as pl
from jax.experimental.pallas import tpu as pltpu


# ------------------------------ fused kernel --------------------------------

def _down_fused_kernel(x2_ref, gray_ref, w1_ref, g1_ref, be1_ref,
                       w2_ref, g2_ref, be2_ref, o_ref, pad1_ref, pad2_ref):
    """Fused Down forward.

    x2_ref   : (B, H, Wo, 2*Cin)  NHWC input with W-adjacent pixel pairs packed
                                  on the lane axis (free reshape in the wrapper)
    gray_ref : (B, Ho, Wo, 1)     gray map (ones if gray is None)
    w1_ref   : (9*Cin,  Cmid)     conv1 weights, im2col layout (tap-major, ch-minor)
    g1_ref, be1_ref : (1, Cmid)   BN1 gamma / beta
    w2_ref   : (Cout, 9*Cmid)     conv2 weights, transposed im2col layout
    g2_ref, be2_ref : (Cout, 1)   BN2 gamma / beta
    o_ref    : (Cout, B*Ho*Wo)    lane-dense output (pixels on lanes)
    pad1_ref, pad2_ref : VMEM scratch slabs with a 1-pixel zero halo
    """
    B, H, Wo, twoC = x2_ref.shape
    Cin = twoC // 2
    Ho = H // 2
    Cmid = w1_ref.shape[1]
    Cout, P = o_ref.shape
    eps = 1e-5
    inv_n = 1.0 / float(P)          # BN normalizer: N*H*W = B*Ho*Wo (biased var)

    # ---------------- maxpool 2x2 (+ optional gray multiply), in-kernel -----
    x2 = x2_ref[...]
    pw = jnp.maximum(x2[..., :Cin], x2[..., Cin:])        # pool along W -> (B,H,Wo,Cin)
    pw = pw.reshape(B, Ho, 2, Wo, Cin)                    # split H (outer dim only)
    pooled = jnp.maximum(pw[:, :, 0], pw[:, :, 1])        # pool along H -> (B,Ho,Wo,Cin)
    pooled = pooled * gray_ref[...]                       # x = maxpool(x) * gray

    # ---------------- conv1: zero-halo scratch + single im2col matmul -------
    pad1_ref[...] = jnp.zeros_like(pad1_ref)
    pad1_ref[:, 1:Ho + 1, 1:Wo + 1, :] = pooled
    taps1 = [pad1_ref[:, dy:dy + Ho, dx:dx + Wo, :]
             for dy in range(3) for dx in range(3)]
    patches1 = jnp.concatenate(taps1, axis=-1).reshape(P, 9 * Cin)
    h1 = jax.lax.dot_general(patches1, w1_ref[...],
                             dimension_numbers=(((1,), (0,)), ((), ())),
                             preferred_element_type=jnp.float32)   # (P, Cmid)
    # conv bias omitted: a per-channel constant is exactly cancelled by the
    # training-mode BatchNorm mean subtraction below.

    # BN1 (training-mode batch stats, single pass) + LeakyReLU(0.2)
    s1 = jnp.sum(h1, axis=0, keepdims=True)
    ss1 = jnp.sum(h1 * h1, axis=0, keepdims=True)
    m1 = s1 * inv_n
    v1 = jnp.maximum(ss1 * inv_n - m1 * m1, 0.0)
    a1 = (h1 - m1) * jax.lax.rsqrt(v1 + eps) * g1_ref[...] + be1_ref[...]
    a1 = jnp.where(a1 > 0, a1, 0.2 * a1)                  # (P, Cmid)

    # ---------------- conv2: zero-halo scratch + single im2col matmul -------
    pad2_ref[...] = jnp.zeros_like(pad2_ref)
    pad2_ref[:, 1:Ho + 1, 1:Wo + 1, :] = a1.reshape(B, Ho, Wo, Cmid)
    taps2 = [pad2_ref[:, dy:dy + Ho, dx:dx + Wo, :]
             for dy in range(3) for dx in range(3)]
    patches2 = jnp.concatenate(taps2, axis=-1).reshape(P, 9 * Cmid)
    # (Cout, 9*Cmid) . (P, 9*Cmid)^T -> (Cout, P): channels on sublanes,
    # pixels on lanes -> BN2 / LReLU / store are lane-dense (last dim = P).
    h2 = jax.lax.dot_general(w2_ref[...], patches2,
                             dimension_numbers=(((1,), (1,)), ((), ())),
                             preferred_element_type=jnp.float32)   # (Cout, P)

    # BN2 (single pass) + LeakyReLU(0.2), lane-dense
    s2 = jnp.sum(h2, axis=1, keepdims=True)
    ss2 = jnp.sum(h2 * h2, axis=1, keepdims=True)
    m2 = s2 * inv_n
    v2 = jnp.maximum(ss2 * inv_n - m2 * m2, 0.0)
    y = (h2 - m2) * jax.lax.rsqrt(v2 + eps) * g2_ref[...] + be2_ref[...]
    o_ref[...] = jnp.where(y > 0, y, 0.2 * y)             # lane-dense store


# -------------------------------- wrapper ------------------------------------

def down_forward(x_nchw, params, gray_nchw=None):
    """Pallas implementation of Down.forward. Input/output are NCHW (PyTorch)."""
    B, Cin, H, W = x_nchw.shape
    Ho, Wo = H // 2, W // 2
    P = B * Ho * Wo
    Cmid = params["w1"].shape[0]
    Cout = params["w2"].shape[0]

    # NCHW -> NHWC (channels on lanes for the matmuls), then a *free* reshape
    # packing the two W-adjacent pixels of each pooling window on the lane axis.
    x_nhwc = jnp.transpose(x_nchw, (0, 2, 3, 1))
    x2 = x_nhwc.reshape(B, H, Wo, 2 * Cin)

    if gray_nchw is None:
        gray = jnp.ones((B, Ho, Wo, 1), x_nchw.dtype)
    else:
        gray = jnp.transpose(gray_nchw, (0, 2, 3, 1))     # (B, Ho, Wo, 1)

    # weight re-layout (tiny, one-time): OIHW -> im2col matrices
    w1f = jnp.transpose(params["w1"], (2, 3, 1, 0)).reshape(9 * Cin, Cmid)
    w2f = jnp.transpose(params["w2"], (0, 2, 3, 1)).reshape(Cout, 9 * Cmid)
    g1 = params["g1"].reshape(1, Cmid)
    be1 = params["be1"].reshape(1, Cmid)
    g2 = params["g2"].reshape(Cout, 1)
    be2 = params["be2"].reshape(Cout, 1)

    args = (x2, gray, w1f, g1, be1, w2f, g2, be2)
    in_specs = [pl.BlockSpec(a.shape, lambda i, _nd=len(a.shape): (0,) * _nd)
                for a in args]

    out = pl.pallas_call(
        _down_fused_kernel,
        grid=(1,),
        in_specs=in_specs,
        out_specs=pl.BlockSpec((Cout, P), lambda i: (0, 0)),
        out_shape=jax.ShapeDtypeStruct((Cout, P), jnp.float32),
        scratch_shapes=[pltpu.VMEM((B, Ho + 2, Wo + 2, Cin), jnp.float32),
                        pltpu.VMEM((B, Ho + 2, Wo + 2, Cmid), jnp.float32)],
        compiler_params=pltpu.CompilerParams(
            dimension_semantics=("arbitrary",)),
    )(*args)

    # (Cout, B*Ho*Wo) -> NCHW
    return jnp.transpose(out.reshape(Cout, B, Ho, Wo), (1, 0, 2, 3))


# ------------------------- params & pure-JAX reference ----------------------

def init_params(key, in_c, out_c):
    mid_c = out_c  # double_conv always sets mid_c = out_c
    ks = jax.random.split(key, 8)

    def conv_w(k, o, i):
        return jax.random.normal(k, (o, i, 3, 3), jnp.float32) / jnp.sqrt(i * 9.0)

    return dict(
        w1=conv_w(ks[0], mid_c, in_c),
        b1=0.1 * jax.random.normal(ks[1], (mid_c,), jnp.float32),
        g1=1.0 + 0.1 * jax.random.normal(ks[2], (mid_c,), jnp.float32),
        be1=0.1 * jax.random.normal(ks[3], (mid_c,), jnp.float32),
        w2=conv_w(ks[4], out_c, mid_c),
        b2=0.1 * jax.random.normal(ks[5], (out_c,), jnp.float32),
        g2=1.0 + 0.1 * jax.random.normal(ks[6], (out_c,), jnp.float32),
        be2=0.1 * jax.random.normal(ks[7], (out_c,), jnp.float32),
    )


def _ref_conv_bn_lrelu(x, w, b, g, be):
    y = jax.lax.conv_general_dilated(
        x, w, (1, 1), ((1, 1), (1, 1)),
        dimension_numbers=("NCHW", "OIHW", "NCHW"))
    y = y + b[None, :, None, None]     # bias included: cancelled by BN mean anyway
    mean = jnp.mean(y, axis=(0, 2, 3), keepdims=True)
    var = jnp.mean((y - mean) ** 2, axis=(0, 2, 3), keepdims=True)
    y = (y - mean) * jax.lax.rsqrt(var + 1e-5)
    y = y * g[None, :, None, None] + be[None, :, None, None]
    return jnp.where(y > 0, y, 0.2 * y)


def ref_down(x_nchw, params, gray_nchw=None):
    x = jax.lax.reduce_window(x_nchw, -jnp.inf, jax.lax.max,
                              (1, 1, 2, 2), (1, 1, 2, 2), "VALID")
    if gray_nchw is not None:
        x = x * gray_nchw
    x = _ref_conv_bn_lrelu(x, params["w1"], params["b1"], params["g1"], params["be1"])
    x = _ref_conv_bn_lrelu(x, params["w2"], params["b2"], params["g2"], params["be2"])
    return x


# ------------------------------------ main -----------------------------------

if __name__ == "__main__":
    key = jax.random.PRNGKey(0)
    kx, kg, kp = jax.random.split(key, 3)
    in_c, out_c = 4, 8
    x = jax.random.normal(kx, (2, in_c, 16, 16), jnp.float32)
    gray = jax.random.uniform(kg, (2, 1, 8, 8), jnp.float32)
    params = init_params(kp, in_c, out_c)

    # gray=None path
    out = jax.block_until_ready(down_forward(x, params))
    assert out.shape == (2, out_c, 8, 8)
    ref = ref_down(x, params)
    assert jnp.allclose(out, ref, atol=5e-2, rtol=5e-2), float(jnp.max(jnp.abs(out - ref)))

    # gray multiply path
    out_g = jax.block_until_ready(down_forward(x, params, gray))
    ref_g = ref_down(x, params, gray)
    assert jnp.allclose(out_g, ref_g, atol=5e-2, rtol=5e-2), float(jnp.max(jnp.abs(out_g - ref_g)))

    print("KERNEL_OK")
</pallas_src>

<mosaic_0001>
module attributes {stable_mosaic.version = 11 : i64} {
  func.func @_down_fused_kernel(%arg0: i32, %arg1: memref<2x16x8x8xf32, #tpu.memory_space<vmem>>, %arg2: memref<2x8x8x1xf32, #tpu.memory_space<vmem>>, %arg3: memref<36x8xf32, #tpu.memory_space<vmem>>, %arg4: memref<1x8xf32, #tpu.memory_space<vmem>>, %arg5: memref<1x8xf32, #tpu.memory_space<vmem>>, %arg6: memref<8x72xf32, #tpu.memory_space<vmem>>, %arg7: memref<8x1xf32, #tpu.memory_space<vmem>>, %arg8: memref<8x1xf32, #tpu.memory_space<vmem>>, %arg9: memref<8x128xf32, #tpu.memory_space<vmem>>, %arg10: memref<2x10x10x4xf32, #tpu.memory_space<vmem>>, %arg11: memref<2x10x10x8xf32, #tpu.memory_space<vmem>>) attributes {dimension_semantics = [#tpu.dimension_semantics<arbitrary>], iteration_bounds = array<i64: 1>, scalar_prefetch = 0 : i64, scratch_operands = 2 : i64, tpu.core_type = #tpu.core_type<tc>, window_params = [{pipeline_mode = #tpu.pipeline_mode<synchronous>, transform_indices = @transform_0, window_bounds = array<i64: 2, 16, 8, 8>}, {pipeline_mode = #tpu.pipeline_mode<synchronous>, transform_indices = @transform_1, window_bounds = array<i64: 2, 8, 8, 1>}, {pipeline_mode = #tpu.pipeline_mode<synchronous>, transform_indices = @transform_2, window_bounds = array<i64: 36, 8>}, {pipeline_mode = #tpu.pipeline_mode<synchronous>, transform_indices = @transform_3, window_bounds = array<i64: 1, 8>}, {pipeline_mode = #tpu.pipeline_mode<synchronous>, transform_indices = @transform_4, window_bounds = array<i64: 1, 8>}, {pipeline_mode = #tpu.pipeline_mode<synchronous>, transform_indices = @transform_5, window_bounds = array<i64: 8, 72>}, {pipeline_mode = #tpu.pipeline_mode<synchronous>, transform_indices = @transform_6, window_bounds = array<i64: 8, 1>}, {pipeline_mode = #tpu.pipeline_mode<synchronous>, transform_indices = @transform_7, window_bounds = array<i64: 8, 1>}, {pipeline_mode = #tpu.pipeline_mode<synchronous>, transform_indices = @transform_8, window_bounds = array<i64: 8, 128>}]} {
    %c0 = arith.constant 0 : index
    %c0_0 = arith.constant 0 : index
    %c0_1 = arith.constant 0 : index
    %c0_2 = arith.constant 0 : index
    %0 = vector.load %arg1[%c0, %c0_0, %c0_1, %c0_2] : memref<2x16x8x8xf32, #tpu.memory_space<vmem>>, vector<2x16x8x8xf32>
    %1 = vector.extract_strided_slice %0 {offsets = [0, 0, 0, 0], sizes = [2, 16, 8, 4], strides = [1, 1, 1, 1]} : vector<2x16x8x8xf32> to vector<2x16x8x4xf32>
    %2 = vector.extract_strided_slice %0 {offsets = [0, 0, 0, 4], sizes = [2, 16, 8, 4], strides = [1, 1, 1, 1]} : vector<2x16x8x8xf32> to vector<2x16x8x4xf32>
    %3 = arith.maximumf %1, %2 : vector<2x16x8x4xf32>
    %4 = vector.shape_cast %3 : vector<2x16x8x4xf32> to vector<2x8x2x8x4xf32>
    %5 = vector.extract_strided_slice %4 {offsets = [0, 0, 0, 0, 0], sizes = [2, 8, 1, 8, 4], strides = [1, 1, 1, 1, 1]} : vector<2x8x2x8x4xf32> to vector<2x8x1x8x4xf32>
    %6 = vector.shape_cast %5 : vector<2x8x1x8x4xf32> to vector<2x8x8x4xf32>
    %7 = vector.extract_strided_slice %4 {offsets = [0, 0, 1, 0, 0], sizes = [2, 8, 1, 8, 4], strides = [1, 1, 1, 1, 1]} : vector<2x8x2x8x4xf32> to vector<2x8x1x8x4xf32>
    %8 = vector.shape_cast %7 : vector<2x8x1x8x4xf32> to vector<2x8x8x4xf32>
    %9 = arith.maximumf %6, %8 : vector<2x8x8x4xf32>
    %c0_3 = arith.constant 0 : index
    %c0_4 = arith.constant 0 : index
    %c0_5 = arith.constant 0 : index
    %c0_6 = arith.constant 0 : index
    %10 = vector.load %arg2[%c0_3, %c0_4, %c0_5, %c0_6] : memref<2x8x8x1xf32, #tpu.memory_space<vmem>>, vector<2x8x8x1xf32>
    %11 = vector.broadcast %10 : vector<2x8x8x1xf32> to vector<2x8x8x4xf32>
    %12 = arith.mulf %9, %11 : vector<2x8x8x4xf32>
    %cst = arith.constant 0.000000e+00 : f32
    %13 = vector.broadcast %cst : f32 to vector<2x10x10x4xf32>
    %c0_7 = arith.constant 0 : index
    %c0_8 = arith.constant 0 : index
    %c0_9 = arith.constant 0 : index
    %c0_10 = arith.constant 0 : index
    %14 = vector.load %arg10[%c0_7, %c0_8, %c0_9, %c0_10] : memref<2x10x10x4xf32, #tpu.memory_space<vmem>>, vector<2x10x10x4xf32>
    tpu.vector_store %arg10[%c0_7, %c0_8, %c0_9, %c0_10], %13 {strides = array<i32>} : memref<2x10x10x4xf32, #tpu.memory_space<vmem>>, vector<2x10x10x4xf32>,
    %c0_11 = arith.constant 0 : index
    %c1 = arith.constant 1 : index
    %c1_12 = arith.constant 1 : index
    %c0_13 = arith.constant 0 : index
    %15 = vector.load %arg10[%c0_11, %c1, %c1_12, %c0_13] : memref<2x10x10x4xf32, #tpu.memory_space<vmem>>, vector<2x8x8x4xf32>
    tpu.vector_store %arg10[%c0_11, %c1, %c1_12, %c0_13], %12 {strides = array<i32>} : memref<2x10x10x4xf32, #tpu.memory_space<vmem>>, vector<2x8x8x4xf32>,
    %c0_14 = arith.constant 0 : index
    %c0_15 = arith.constant 0 : index
    %c0_16 = arith.constant 0 : index
    %c0_17 = arith.constant 0 : index
    %16 = vector.load %arg10[%c0_14, %c0_15, %c0_16, %c0_17] : memref<2x10x10x4xf32, #tpu.memory_space<vmem>>, vector<2x8x8x4xf32>
    %c0_18 = arith.constant 0 : index
    %c0_19 = arith.constant 0 : index
    %c1_20 = arith.constant 1 : index
    %c0_21 = arith.constant 0 : index
    %17 = vector.load %arg10[%c0_18, %c0_19, %c1_20, %c0_21] : memref<2x10x10x4xf32, #tpu.memory_space<vmem>>, vector<2x8x8x4xf32>
    %c0_22 = arith.constant 0 : index
    %c0_23 = arith.constant 0 : index
    %c2 = arith.constant 2 : index
    %c0_24 = arith.constant 0 : index
    %18 = vector.load %arg10[%c0_22, %c0_23, %c2, %c0_24] : memref<2x10x10x4xf32, #tpu.memory_space<vmem>>, vector<2x8x8x4xf32>
    %c0_25 = arith.constant 0 : index
    %c1_26 = arith.constant 1 : index
    %c0_27 = arith.constant 0 : index
    %c0_28 = arith.constant 0 : index
    %19 = vector.load %arg10[%c0_25, %c1_26, %c0_27, %c0_28] : memref<2x10x10x4xf32, #tpu.memory_space<vmem>>, vector<2x8x8x4xf32>
    %c0_29 = arith.constant 0 : index
    %c1_30 = arith.constant 1 : index
    %c1_31 = arith.constant 1 : index
    %c0_32 = arith.constant 0 : index
    %20 = vector.load %arg10[%c0_29, %c1_30, %c1_31, %c0_32] : memref<2x10x10x4xf32, #tpu.memory_space<vmem>>, vector<2x8x8x4xf32>
    %c0_33 = arith.constant 0 : index
    %c1_34 = arith.constant 1 : index
    %c2_35 = arith.constant 2 : index
    %c0_36 = arith.constant 0 : index
    %21 = vector.load %arg10[%c0_33, %c1_34, %c2_35, %c0_36] : memref<2x10x10x4xf32, #tpu.memory_space<vmem>>, vector<2x8x8x4xf32>
    %c0_37 = arith.constant 0 : index
    %c2_38 = arith.constant 2 : index
    %c0_39 = arith.constant 0 : index
    %c0_40 = arith.constant 0 : index
    %22 = vector.load %arg10[%c0_37, %c2_38, %c0_39, %c0_40] : memref<2x10x10x4xf32, #tpu.memory_space<vmem>>, vector<2x8x8x4xf32>
    %c0_41 = arith.constant 0 : index
    %c2_42 = arith.constant 2 : index
    %c1_43 = arith.constant 1 : index
    %c0_44 = arith.constant 0 : index
    %23 = vector.load %arg10[%c0_41, %c2_42, %c1_43, %c0_44] : memref<2x10x10x4xf32, #tpu.memory_space<vmem>>, vector<2x8x8x4xf32>
    %c0_45 = arith.constant 0 : index
    %c2_46 = arith.constant 2 : index
    %c2_47 = arith.constant 2 : index
    %c0_48 = arith.constant 0 : index
    %24 = vector.load %arg10[%c0_45, %c2_46, %c2_47, %c0_48] : memref<2x10x10x4xf32, #tpu.memory_space<vmem>>, vector<2x8x8x4xf32>
    %25 = tpu.concatenate %16, %17, %18, %19, %20, %21, %22, %23, %24 in 3 : vector<2x8x8x4xf32>, vector<2x8x8x4xf32>, vector<2x8x8x4xf32>, vector<2x8x8x4xf32>, vector<2x8x8x4xf32>, vector<2x8x8x4xf32>, vector<2x8x8x4xf32>, vector<2x8x8x4xf32>, vector<2x8x8x4xf32> -> vector<2x8x8x36xf32>
    %26 = vector.shape_cast %25 : vector<2x8x8x36xf32> to vector<128x36xf32>
    %c0_49 = arith.constant 0 : index
    %c0_50 = arith.constant 0 : index
    %27 = vector.load %arg3[%c0_49, %c0_50] : memref<36x8xf32, #tpu.memory_space<vmem>>, vector<36x8xf32>
    %cst_51 = arith.constant dense<0.000000e+00> : vector<128x8xf32>
    %28 = tpu.matmul %26, %27, %cst_51 {dimension_numbers = #tpu.dot_dimension_numbers<[1], [0], [0], [1], [0, 0, 1, 1], [], []>} : vector<128x36xf32>, vector<36x8xf32>, vector<128x8xf32> -> vector<128x8xf32>
    %cst_52 = arith.constant dense<0.000000e+00> : vector<8xf32>
    %29 = vector.multi_reduction <add>, %28, %cst_52 [0] : vector<128x8xf32> to vector<8xf32>
    %30 = vector.shape_cast %29 : vector<8xf32> to vector<1x8xf32>
    %31 = arith.mulf %28, %28 : vector<128x8xf32>
    %cst_53 = arith.constant dense<0.000000e+00> : vector<8xf32>
    %32 = vector.multi_reduction <add>, %31, %cst_53 [0] : vector<128x8xf32> to vector<8xf32>
    %33 = vector.shape_cast %32 : vector<8xf32> to vector<1x8xf32>
    %cst_54 = arith.constant 7.812500e-03 : f32
    %34 = vector.broadcast %cst_54 : f32 to vector<1x8xf32>
    %35 = arith.mulf %30, %34 : vector<1x8xf32>
    %cst_55 = arith.constant 7.812500e-03 : f32
    %36 = vector.broadcast %cst_55 : f32 to vector<1x8xf32>
    %37 = arith.mulf %33, %36 : vector<1x8xf32>
    %38 = arith.mulf %35, %35 : vector<1x8xf32>
    %39 = arith.subf %37, %38 : vector<1x8xf32>
    %cst_56 = arith.constant 0.000000e+00 : f32
    %40 = vector.broadcast %cst_56 : f32 to vector<1x8xf32>
    %41 = arith.maximumf %39, %40 : vector<1x8xf32>
    %42 = vector.broadcast %35 : vector<1x8xf32> to vector<128x8xf32>
    %43 = arith.subf %28, %42 : vector<128x8xf32>
    %cst_57 = arith.constant 9.99999974E-6 : f32
    %44 = vector.broadcast %cst_57 : f32 to vector<1x8xf32>
    %45 = arith.addf %41, %44 : vector<1x8xf32>
    %46 = math.rsqrt %45 : vector<1x8xf32>
    %47 = vector.broadcast %46 : vector<1x8xf32> to vector<128x8xf32>
    %48 = arith.mulf %43, %47 : vector<128x8xf32>
    %c0_58 = arith.constant 0 : index
    %c0_59 = arith.constant 0 : index
    %49 = vector.load %arg4[%c0_58, %c0_59] : memref<1x8xf32, #tpu.memory_space<vmem>>, vector<1x8xf32>
    %50 = vector.broadcast %49 : vector<1x8xf32> to vector<128x8xf32>
    %51 = arith.mulf %48, %50 : vector<128x8xf32>
    %c0_60 = arith.constant 0 : index
    %c0_61 = arith.constant 0 : index
    %52 = vector.load %arg5[%c0_60, %c0_61] : memref<1x8xf32, #tpu.memory_space<vmem>>, vector<1x8xf32>
    %53 = vector.broadcast %52 : vector<1x8xf32> to vector<128x8xf32>
    %54 = arith.addf %51, %53 : vector<128x8xf32>
    %cst_62 = arith.constant 0.000000e+00 : f32
    %55 = vector.broadcast %cst_62 : f32 to vector<128x8xf32>
    %56 = arith.cmpf ogt, %54, %55 : vector<128x8xf32>
    %cst_63 = arith.constant 2.000000e-01 : f32
    %57 = vector.broadcast %cst_63 : f32 to vector<128x8xf32>
    %58 = arith.mulf %57, %54 : vector<128x8xf32>
    %59 = arith.select %56, %54, %58 : vector<128x8xi1>, vector<128x8xf32>
    %cst_64 = arith.constant 0.000000e+00 : f32
    %60 = vector.broadcast %cst_64 : f32 to vector<2x10x10x8xf32>
    %c0_65 = arith.constant 0 : index
    %c0_66 = arith.constant 0 : index
    %c0_67 = arith.constant 0 : index
    %c0_68 = arith.constant 0 : index
    %61 = vector.load %arg11[%c0_65, %c0_66, %c0_67, %c0_68] : memref<2x10x10x8xf32, #tpu.memory_space<vmem>>, vector<2x10x10x8xf32>
    tpu.vector_store %arg11[%c0_65, %c0_66, %c0_67, %c0_68], %60 {strides = array<i32>} : memref<2x10x10x8xf32, #tpu.memory_space<vmem>>, vector<2x10x10x8xf32>,
    %62 = vector.shape_cast %59 : vector<128x8xf32> to vector<2x8x8x8xf32>
    %c0_69 = arith.constant 0 : index
    %c1_70 = arith.constant 1 : index
    %c1_71 = arith.constant 1 : index
    %c0_72 = arith.constant 0 : index
    %63 = vector.load %arg11[%c0_69, %c1_70, %c1_71, %c0_72] : memref<2x10x10x8xf32, #tpu.memory_space<vmem>>, vector<2x8x8x8xf32>
    tpu.vector_store %arg11[%c0_69, %c1_70, %c1_71, %c0_72], %62 {strides = array<i32>} : memref<2x10x10x8xf32, #tpu.memory_space<vmem>>, vector<2x8x8x8xf32>,
    %c0_73 = arith.constant 0 : index
    %c0_74 = arith.constant 0 : index
    %c0_75 = arith.constant 0 : index
    %c0_76 = arith.constant 0 : index
    %64 = vector.load %arg11[%c0_73, %c0_74, %c0_75, %c0_76] : memref<2x10x10x8xf32, #tpu.memory_space<vmem>>, vector<2x8x8x8xf32>
    %c0_77 = arith.constant 0 : index
    %c0_78 = arith.constant 0 : index
    %c1_79 = arith.constant 1 : index
    %c0_80 = arith.constant 0 : index
    %65 = vector.load %arg11[%c0_77, %c0_78, %c1_79, %c0_80] : memref<2x10x10x8xf32, #tpu.memory_space<vmem>>, vector<2x8x8x8xf32>
    %c0_81 = arith.constant 0 : index
    %c0_82 = arith.constant 0 : index
    %c2_83 = arith.constant 2 : index
    %c0_84 = arith.constant 0 : index
    %66 = vector.load %arg11[%c0_81, %c0_82, %c2_83, %c0_84] : memref<2x10x10x8xf32, #tpu.memory_space<vmem>>, vector<2x8x8x8xf32>
    %c0_85 = arith.constant 0 : index
    %c1_86 = arith.constant 1 : index
    %c0_87 = arith.constant 0 : index
    %c0_88 = arith.constant 0 : index
    %67 = vector.load %arg11[%c0_85, %c1_86, %c0_87, %c0_88] : memref<2x10x10x8xf32, #tpu.memory_space<vmem>>, vector<2x8x8x8xf32>
    %c0_89 = arith.constant 0 : index
    %c1_90 = arith.constant 1 : index
    %c1_91 = arith.constant 1 : index
    %c0_92 = arith.constant 0 : index
    %68 = vector.load %arg11[%c0_89, %c1_90, %c1_91, %c0_92] : memref<2x10x10x8xf32, #tpu.memory_space<vmem>>, vector<2x8x8x8xf32>
    %c0_93 = arith.constant 0 : index
    %c1_94 = arith.constant 1 : index
    %c2_95 = arith.constant 2 : index
    %c0_96 = arith.constant 0 : index
    %69 = vector.load %arg11[%c0_93, %c1_94, %c2_95, %c0_96] : memref<2x10x10x8xf32, #tpu.memory_space<vmem>>, vector<2x8x8x8xf32>
    %c0_97 = arith.constant 0 : index
    %c2_98 = arith.constant 2 : index
    %c0_99 = arith.constant 0 : index
    %c0_100 = arith.constant 0 : index
    %70 = vector.load %arg11[%c0_97, %c2_98, %c0_99, %c0_100] : memref<2x10x10x8xf32, #tpu.memory_space<vmem>>, vector<2x8x8x8xf32>
    %c0_101 = arith.constant 0 : index
    %c2_102 = arith.constant 2 : index
    %c1_103 = arith.constant 1 : index
    %c0_104 = arith.constant 0 : index
    %71 = vector.load %arg11[%c0_101, %c2_102, %c1_103, %c0_104] : memref<2x10x10x8xf32, #tpu.memory_space<vmem>>, vector<2x8x8x8xf32>
    %c0_105 = arith.constant 0 : index
    %c2_106 = arith.constant 2 : index
    %c2_107 = arith.constant 2 : index
    %c0_108 = arith.constant 0 : index
    %72 = vector.load %arg11[%c0_105, %c2_106, %c2_107, %c0_108] : memref<2x10x10x8xf32, #tpu.memory_space<vmem>>, vector<2x8x8x8xf32>
    %73 = tpu.concatenate %64, %65, %66, %67, %68, %69, %70, %71, %72 in 3 : vector<2x8x8x8xf32>, vector<2x8x8x8xf32>, vector<2x8x8x8xf32>, vector<2x8x8x8xf32>, vector<2x8x8x8xf32>, vector<2x8x8x8xf32>, vector<2x8x8x8xf32>, vector<2x8x8x8xf32>, vector<2x8x8x8xf32> -> vector<2x8x8x72xf32>
    %74 = vector.shape_cast %73 : vector<2x8x8x72xf32> to vector<128x72xf32>
    %c0_109 = arith.constant 0 : index
    %c0_110 = arith.constant 0 : index
    %75 = vector.load %arg6[%c0_109, %c0_110] : memref<8x72xf32, #tpu.memory_space<vmem>>, vector<8x72xf32>
    %cst_111 = arith.constant dense<0.000000e+00> : vector<8x128xf32>
    %76 = tpu.matmul %75, %74, %cst_111 {dimension_numbers = #tpu.dot_dimension_numbers<[1], [1], [0], [0], [0, 0, 1, 0], [], []>} : vector<8x72xf32>, vector<128x72xf32>, vector<8x128xf32> -> vector<8x128xf32>
    %cst_112 = arith.constant dense<0.000000e+00> : vector<8xf32>
    %77 = vector.multi_reduction <add>, %76, %cst_112 [1] : vector<8x128xf32> to vector<8xf32>
    %78 = vector.shape_cast %77 : vector<8xf32> to vector<8x1xf32>
    %79 = arith.mulf %76, %76 : vector<8x128xf32>
    %cst_113 = arith.constant dense<0.000000e+00> : vector<8xf32>
    %80 = vector.multi_reduction <add>, %79, %cst_113 [1] : vector<8x128xf32> to vector<8xf32>
    %81 = vector.shape_cast %80 : vector<8xf32> to vector<8x1xf32>
    %cst_114 = arith.constant 7.812500e-03 : f32
    %82 = vector.broadcast %cst_114 : f32 to vector<8x1xf32>
    %83 = arith.mulf %78, %82 : vector<8x1xf32>
    %cst_115 = arith.constant 7.812500e-03 : f32
    %84 = vector.broadcast %cst_115 : f32 to vector<8x1xf32>
    %85 = arith.mulf %81, %84 : vector<8x1xf32>
    %86 = arith.mulf %83, %83 : vector<8x1xf32>
    %87 = arith.subf %85, %86 : vector<8x1xf32>
    %cst_116 = arith.constant 0.000000e+00 : f32
    %88 = vector.broadcast %cst_116 : f32 to vector<8x1xf32>
    %89 = arith.maximumf %87, %88 : vector<8x1xf32>
    %90 = vector.broadcast %83 : vector<8x1xf32> to vector<8x128xf32>
    %91 = arith.subf %76, %90 : vector<8x128xf32>
    %cst_117 = arith.constant 9.99999974E-6 : f32
    %92 = vector.broadcast %cst_117 : f32 to vector<8x1xf32>
    %93 = arith.addf %89, %92 : vector<8x1xf32>
    %94 = math.rsqrt %93 : vector<8x1xf32>
    %95 = vector.broadcast %94 : vector<8x1xf32> to vector<8x128xf32>
    %96 = arith.mulf %91, %95 : vector<8x128xf32>
    %c0_118 = arith.constant 0 : index
    %c0_119 = arith.constant 0 : index
    %97 = vector.load %arg7[%c0_118, %c0_119] : memref<8x1xf32, #tpu.memory_space<vmem>>, vector<8x1xf32>
    %98 = vector.broadcast %97 : vector<8x1xf32> to vector<8x128xf32>
    %99 = arith.mulf %96, %98 : vector<8x128xf32>
    %c0_120 = arith.constant 0 : index
    %c0_121 = arith.constant 0 : index
    %100 = vector.load %arg8[%c0_120, %c0_121] : memref<8x1xf32, #tpu.memory_space<vmem>>, vector<8x1xf32>
    %101 = vector.broadcast %100 : vector<8x1xf32> to vector<8x128xf32>
    %102 = arith.addf %99, %101 : vector<8x128xf32>
    %cst_122 = arith.constant 0.000000e+00 : f32
    %103 = vector.broadcast %cst_122 : f32 to vector<8x128xf32>
    %104 = arith.cmpf ogt, %102, %103 : vector<8x128xf32>
    %cst_123 = arith.constant 2.000000e-01 : f32
    %105 = vector.broadcast %cst_123 : f32 to vector<8x128xf32>
    %106 = arith.mulf %105, %102 : vector<8x128xf32>
    %107 = arith.select %104, %102, %106 : vector<8x128xi1>, vector<8x128xf32>
    %c0_124 = arith.constant 0 : index
    %c0_125 = arith.constant 0 : index
    %108 = vector.load %arg9[%c0_124, %c0_125] : memref<8x128xf32, #tpu.memory_space<vmem>>, vector<8x128xf32>
    tpu.vector_store %arg9[%c0_124, %c0_125], %107 {strides = array<i32>} : memref<8x128xf32, #tpu.memory_space<vmem>>, vector<8x128xf32>,
    return
  }
  func.func @transform_0(%arg0: i32) -> (i32, i32, i32, i32) {
    %c0_i32 = arith.constant 0 : i32
    %c0_i32_0 = arith.constant 0 : i32
    %c0_i32_1 = arith.constant 0 : i32
    %c0_i32_2 = arith.constant 0 : i32
    %c0_i32_3 = arith.constant 0 : i32
    return %c0_i32, %c0_i32_0, %c0_i32_1, %c0_i32_2 : i32, i32, i32, i32
  }
  func.func @transform_1(%arg0: i32) -> (i32, i32, i32, i32) {
    %c0_i32 = arith.constant 0 : i32
    %c0_i32_0 = arith.constant 0 : i32
    %c0_i32_1 = arith.constant 0 : i32
    %c0_i32_2 = arith.constant 0 : i32
    %c0_i32_3 = arith.constant 0 : i32
    return %c0_i32, %c0_i32_0, %c0_i32_1, %c0_i32_2 : i32, i32, i32, i32
  }
  func.func @transform_2(%arg0: i32) -> (i32, i32) {
    %c0_i32 = arith.constant 0 : i32
    %c0_i32_0 = arith.constant 0 : i32
    %c0_i32_1 = arith.constant 0 : i32
    return %c0_i32, %c0_i32_0 : i32, i32
  }
  func.func @transform_3(%arg0: i32) -> (i32, i32) {
    %c0_i32 = arith.constant 0 : i32
    %c0_i32_0 = arith.constant 0 : i32
    %c0_i32_1 = arith.constant 0 : i32
    return %c0_i32, %c0_i32_0 : i32, i32
  }
  func.func @transform_4(%arg0: i32) -> (i32, i32) {
    %c0_i32 = arith.constant 0 : i32
    %c0_i32_0 = arith.constant 0 : i32
    %c0_i32_1 = arith.constant 0 : i32
    return %c0_i32, %c0_i32_0 : i32, i32
  }
  func.func @transform_5(%arg0: i32) -> (i32, i32) {
    %c0_i32 = arith.constant 0 : i32
    %c0_i32_0 = arith.constant 0 : i32
    %c0_i32_1 = arith.constant 0 : i32
    return %c0_i32, %c0_i32_0 : i32, i32
  }
  func.func @transform_6(%arg0: i32) -> (i32, i32) {
    %c0_i32 = arith.constant 0 : i32
    %c0_i32_0 = arith.constant 0 : i32
    %c0_i32_1 = arith.constant 0 : i32
    return %c0_i32, %c0_i32_0 : i32, i32
  }
  func.func @transform_7(%arg0: i32) -> (i32, i32) {
    %c0_i32 = arith.constant 0 : i32
    %c0_i32_0 = arith.constant 0 : i32
    %c0_i32_1 = arith.constant 0 : i32
    return %c0_i32, %c0_i32_0 : i32, i32
  }
  func.func @transform_8(%arg0: i32) -> (i32, i32) {
    %c0_i32 = arith.constant 0 : i32
    %c0_i32_0 = arith.constant 0 : i32
    %c0_i32_1 = arith.constant 0 : i32
    return %c0_i32, %c0_i32_0 : i32, i32
  }
}

</mosaic_0001>

<bundles_post_ra>
// kernel: tpu_custom_call.1
= control target key start
LH: loop header
LB: loop body
LE: loop exit
PB: predicated region body
PF: predicated region fallthrough
CT: control target
= control target key end

     0   :  { %s2622_s11 = smov 124   ;;  %s4712_s0 = inlined_call_operand.vmem [shape: f32[2,16,8,8], index: 0, kind: input, shape index: {}]   ;;  %s4713_s1 = inlined_call_operand.vmem [shape: f32[2,8,8,1], index: 1, kind: input, shape index: {}]   ;;  %s4714_s2 = inlined_call_operand.vmem [shape: f32[36,8], index: 2, kind: input, shape index: {}]   ;;  %s4715_s3 = inlined_call_operand.vmem [shape: f32[1,8], index: 3, kind: input, shape index: {}]   ;;  %s4716_s4 = inlined_call_operand.vmem [shape: f32[1,8], index: 4, kind: input, shape index: {}]   ;;  %s4717_s5 = inlined_call_operand.vmem [shape: f32[8,72], index: 5, kind: input, shape index: {}]   ;;  %s4718_s6 = inlined_call_operand.vmem [shape: f32[8,1], index: 6, kind: input, shape index: {}]   ;;  %s4719_s7 = inlined_call_operand.vmem [shape: f32[8,1], index: 7, kind: input, shape index: {}]   ;;  %s4720_s8 = inlined_call_operand.hbm [shape: f32[8,128], index: 8, kind: output, shape index: {}]  }
   0x1   :  { %v2686_v0 = vld [vmem:[%s4712_s0 + $0x20] sm:$0xff]  ;;  %v2691_v1 = vld [vmem:[%s4712_s0 + $0x10] sm:$0xff]  ;;  %v2707_v3 = vld [vmem:[%s4712_s0 + $0x28] sm:$0xff] }
   0x2   :  { %v2696_v2 = vld [vmem:[%s4712_s0] sm:$0xff]  ;;  %102 = vrot.lane.b32.xlu2 %v2686_v0, %s2622_s11  ;;  %98 = vrot.lane.b32.xlu1 %v2691_v1, %s2622_s11  ;;  %v2712_v4 = vld [vmem:[%s4712_s0 + $0x18] sm:$0xff] }
   0x3   :  { %94 = vrot.lane.b32.xlu0 %v2696_v2, %s2622_s11 }
   0x4   :  { %13 = vsyncpa [#allocation5], 0  ;;  %v2717_v5 = vld [vmem:[%s4712_s0 + $0x8] sm:$0xff]  ;;  %v2728_v6 = vld [vmem:[%s4712_s0 + $0x40] sm:$0xff]  ;;  %v2623_v18 = vmov 0   ;;  %vm350_vm0 = vcmask 31744  }
   0x5   :  { %v2733_v7 = vld [vmem:[%s4712_s0 + $0x38] sm:$0xff]  ;;  %v2738_v8 = vld [vmem:[%s4712_s0 + $0x30] sm:$0xff]  ;;  %v2759_v11 = vld [vmem:[%s4712_s0 + $0x48] sm:$0xff]  ;;  %2587 = vset.pattern.permute.xlu2 %v2623_v18  ;;  %2589 = vset.pattern.permute.xlu1 %v2623_v18  ;;  %vm352_vm1 = vcmask 25600   ;;  %v4721_v61 = vmov 0.0   ;;  %s2626_s15 = smov 8  }
   0x6   :  { %v2749_v9 = vld [vmem:[%s4712_s0 + $0x58] sm:$0xff]  ;;  %v2754_v10 = vld [vmem:[%s4712_s0 + $0x50] sm:$0xff]  ;;  %v2775_v13 = vld [vmem:[%s4712_s0 + $0x68] sm:$0xff]  ;;  %2588 = vset.pattern.permute.xlu0 %v2623_v18  ;;  %354 = vst.msk [vmem:[#allocation2 + $0x10] sm:$0xff] %vm350_vm0, %v4721_v61  ;;  %vm1082_vm2 = vcmask 64512   ;;  %s2628_s16 = smov 16  }
   0x7   :  { %v2770_v12 = vld [vmem:[%s4712_s0 + $0x70] sm:$0xff]  ;;  %v2780_v14 = vld [vmem:[%s4712_s0 + $0x60] sm:$0xff]  ;;  %v2791_v15 = vld [vmem:[%s4712_s0 + $0x88] sm:$0xff]  ;;  %355 = vst.msk [vmem:[#allocation2 + $0x18] sm:$0x3] %vm352_vm1, %v4721_v61  ;;  %s2629_s17 = smov 20  }
   0x8   :  { %v2796_v16 = vld [vmem:[%s4712_s0 + $0x80] sm:$0xff]  ;;  %v2801_v17 = vld [vmem:[%s4712_s0 + $0x78] sm:$0xff]  ;;  %v2822_v21 = vld [vmem:[%s4712_s0 + $0x90] sm:$0xff]  ;;  %351 = vst.msk [vmem:[#allocation2] sm:$0xff] %vm350_vm0, %v4721_v61  ;;  %s2630_s18 = smov 28   ;;  %s2631_s19 = smov 32  }
   0x9   :  { %v2812_v19 = vld [vmem:[%s4712_s0 + $0xa0] sm:$0xff]  ;;  %v2817_v20 = vld [vmem:[%s4712_s0 + $0x98] sm:$0xff]  ;;  %v2838_v23 = vld [vmem:[%s4712_s0 + $0xb0] sm:$0xff]  ;;  %353 = vst.msk [vmem:[#allocation2 + $0x8] sm:$0x3] %vm352_vm1, %v4721_v61  ;;  %s2632_s20 = smov 24  }
   0xa   :  { %104 = vrot.lane.b32.xlu2 %v2707_v3, %s2622_s11  ;;  %100 = vrot.lane.b32.xlu1 %v2712_v4, %s2622_s11  ;;  %v2833_v22 = vld [vmem:[%s4712_s0 + $0xb8] sm:$0xff]  ;;  %v2843_v24 = vld [vmem:[%s4712_s0 + $0xa8] sm:$0xff]  ;;  %356 = vst.msk [vmem:[#allocation2 + $0x20] sm:$0xff] %vm350_vm0, %v4721_v61  ;;  %vm1099_vm3 = vcmask 97280   ;;  %vm1255_vm4 = vcmask 1043456   ;;  %vm1133_vm5 = vcmask 162816  }
   0xb   :  { %96 = vrot.lane.b32.xlu0 %v2717_v5, %s2622_s11  ;;  %v2854_v25 = vld [vmem:[%s4712_s0 + $0xd0] sm:$0xff]  ;;  %v2859_v26 = vld [vmem:[%s4712_s0 + $0xc8] sm:$0xff]  ;;  %v2864_v27 = vld [vmem:[%s4712_s0 + $0xc0] sm:$0xff]  ;;  %357 = vst.msk [vmem:[#allocation2 + $0x28] sm:$0x3] %vm352_vm1, %v4721_v61  ;;  %vm1116_vm6 = vcmask 130048  }
   0xc   :  { %v2875_v28 = vld [vmem:[%s4712_s0 + $0xe8] sm:$0xff]  ;;  %v2880_v29 = vld [vmem:[%s4712_s0 + $0xe0] sm:$0xff]  ;;  %v2885_v30 = vld [vmem:[%s4712_s0 + $0xd8] sm:$0xff]  ;;  %358 = vst.msk [vmem:[#allocation2 + $0x30] sm:$0xff] %vm350_vm0, %v4721_v61  ;;  %vm1150_vm7 = vcmask 195584   ;;  %vm1167_vm8 = vcmask 228352  }
   0xd   :  { %v238_v31 = vld [vmem:[%s4713_s1] sm:$0xff]  ;;  %v2899_v32 = vld [vmem:[%s4712_s0 + $0xf8] sm:$0xff]  ;;  %v2904_v33 = vld [vmem:[%s4712_s0 + $0xf0] sm:$0xff]  ;;  %359 = vst.msk [vmem:[#allocation2 + $0x38] sm:$0x3] %vm352_vm1, %v4721_v61  ;;  %vm1184_vm9 = vcmask 261120  }
   0xe   :  { %v241_v34 = vld [vmem:[%s4713_s1 + $0x18] sm:$0xff]  ;;  %v240_v35 = vld [vmem:[%s4713_s1 + $0x10] sm:$0xff]  ;;  %v239_v36 = vld [vmem:[%s4713_s1 + $0x8] sm:$0xff]  ;;  %360 = vst.msk [vmem:[#allocation2 + $0x40] sm:$0xff] %vm350_vm0, %v4721_v61  ;;  %vm1206_vm10 = vcmask 293888   ;;  %vm1551_vm11 = vcmask 58368  }
   0xf   :  { %v243_v38 = vld [vmem:[%s4713_s1 + $0x28] sm:$0xff]  ;;  %v242_v39 = vld [vmem:[%s4713_s1 + $0x20] sm:$0xff]  ;;  %v244_v40 = vld [vmem:[%s4713_s1 + $0x30] sm:$0xff]  ;;  %361 = vst.msk [vmem:[#allocation2 + $0x48] sm:$0x3] %vm352_vm1, %v4721_v61  ;;  %s2634_s12 = smov 56  }
  0x10   :  { %v246_v42 = vld [vmem:[%s4713_s1 + $0x40] sm:$0xff]  ;;  %v245_v43 = vld [vmem:[%s4713_s1 + $0x38] sm:$0xff]  ;;  %v247_v44 = vld [vmem:[%s4713_s1 + $0x48] sm:$0xff]  ;;  %362 = vst.msk [vmem:[#allocation2 + $0x50] sm:$0xff] %vm350_vm0, %v4721_v61  ;;  %s2635_s13 = smov 64   ;;  %s2636_s14 = smov 48  }
  0x11   :  { %v249_v46 = vld [vmem:[%s4713_s1 + $0x58] sm:$0xff]  ;;  %v248_v47 = vld [vmem:[%s4713_s1 + $0x50] sm:$0xff]  ;;  %v250_v48 = vld [vmem:[%s4713_s1 + $0x60] sm:$0xff]  ;;  %363 = vst.msk [vmem:[#allocation2 + $0x58] sm:$0x3] %vm352_vm1, %v4721_v61 }
  0x12   :  { %110 = vrot.lane.b32.xlu2 %v2728_v6, %s2622_s11  ;;  %108 = vrot.lane.b32.xlu1 %v2733_v7, %s2622_s11  ;;  %v252_v52 = vld [vmem:[%s4713_s1 + $0x70] sm:$0xff]  ;;  %v251_v53 = vld [vmem:[%s4713_s1 + $0x68] sm:$0xff]  ;;  %364 = vst.msk [vmem:[#allocation2 + $0x60] sm:$0xff] %vm350_vm0, %v4721_v61 }
  0x13   :  { %106 = vrot.lane.b32.xlu0 %v2738_v8, %s2622_s11  ;;  %v253_v54 = vld [vmem:[%s4713_s1 + $0x78] sm:$0xff]  ;;  %365 = vst.msk [vmem:[#allocation2 + $0x68] sm:$0x3] %vm352_vm1, %v4721_v61  ;;  %s2625_s1 = smov 4  }
  0x14   :  { %366 = vst.msk [vmem:[#allocation2 + $0x70] sm:$0xff] %vm350_vm0, %v4721_v61 }
  0x15   :  { %367 = vst.msk [vmem:[#allocation2 + $0x78] sm:$0x3] %vm352_vm1, %v4721_v61 }
  0x16   :  { %368 = vst.msk [vmem:[#allocation2 + $0x80] sm:$0xff] %vm350_vm0, %v4721_v61 }
  0x17   :  { %369 = vst.msk [vmem:[#allocation2 + $0x88] sm:$0x3] %vm352_vm1, %v4721_v61 }
  0x18   :  { %370 = vst.msk [vmem:[#allocation2 + $0x90] sm:$0xff] %vm350_vm0, %v4721_v61 }
  0x19   :  { %371 = vst.msk [vmem:[#allocation2 + $0x98] sm:$0x3] %vm352_vm1, %v4721_v61 }
  0x1a   :  { %116 = vrot.lane.b32.xlu2 %v2749_v9, %s2622_s11  ;;  %114 = vrot.lane.b32.xlu1 %v2754_v10, %s2622_s11  ;;  %372 = vst.msk [vmem:[#allocation2 + $0xa0] sm:$0xff] %vm350_vm0, %v4721_v61 }
  0x1b   :  { %112 = vrot.lane.b32.xlu0 %v2759_v11, %s2622_s11  ;;  %373 = vst.msk [vmem:[#allocation2 + $0xa8] sm:$0x3] %vm352_vm1, %v4721_v61 }
  0x1c   :  { %374 = vst.msk [vmem:[#allocation2 + $0xb0] sm:$0xff] %vm350_vm0, %v4721_v61 }
  0x1d   :  { %375 = vst.msk [vmem:[#allocation2 + $0xb8] sm:$0x3] %vm352_vm1, %v4721_v61 }
  0x1e   :  { %376 = vst.msk [vmem:[#allocation2 + $0xc0] sm:$0xff] %vm350_vm0, %v4721_v61 }
  0x1f   :  { %377 = vst.msk [vmem:[#allocation2 + $0xc8] sm:$0x3] %vm352_vm1, %v4721_v61 }
  0x20   :  { %378 = vst.msk [vmem:[#allocation2 + $0xd0] sm:$0xff] %vm350_vm0, %v4721_v61 }
  0x21   :  { %379 = vst.msk [vmem:[#allocation2 + $0xd8] sm:$0x3] %vm352_vm1, %v4721_v61 }
  0x22   :  { %122 = vrot.lane.b32.xlu2 %v2770_v12, %s2622_s11  ;;  %120 = vrot.lane.b32.xlu1 %v2775_v13, %s2622_s11  ;;  %380 = vst.msk [vmem:[#allocation2 + $0xe0] sm:$0xff] %vm350_vm0, %v4721_v61 }
  0x23   :  { %118 = vrot.lane.b32.xlu0 %v2780_v14, %s2622_s11  ;;  %381 = vst.msk [vmem:[#allocation2 + $0xe8] sm:$0x3] %vm352_vm1, %v4721_v61 }
  0x24   :  { %382 = vst.msk [vmem:[#allocation2 + $0xf0] sm:$0xff] %vm350_vm0, %v4721_v61 }
  0x25   :  { %383 = vst.msk [vmem:[#allocation2 + $0xf8] sm:$0x3] %vm352_vm1, %v4721_v61 }
  0x26   :  { %384 = vst.msk [vmem:[#allocation2 + $0x100] sm:$0xff] %vm350_vm0, %v4721_v61 }
  0x27   :  { %385 = vst.msk [vmem:[#allocation2 + $0x108] sm:$0x3] %vm352_vm1, %v4721_v61 }
  0x28   :  { %386 = vst.msk [vmem:[#allocation2 + $0x110] sm:$0xff] %vm350_vm0, %v4721_v61 }
  0x29   :  { %387 = vst.msk [vmem:[#allocation2 + $0x118] sm:$0x3] %vm352_vm1, %v4721_v61 }
  0x2a   :  { %128 = vrot.lane.b32.xlu2 %v2791_v15, %s2622_s11  ;;  %126 = vrot.lane.b32.xlu1 %v2796_v16, %s2622_s11  ;;  %388 = vst.msk [vmem:[#allocation2 + $0x120] sm:$0xff] %vm350_vm0, %v4721_v61 }
  0x2b   :  { %124 = vrot.lane.b32.xlu0 %v2801_v17, %s2622_s11  ;;  %389 = vst.msk [vmem:[#allocation2 + $0x128] sm:$0x3] %vm352_vm1, %v4721_v61 }
  0x2c   :  { %390 = vst.msk [vmem:[#allocation2 + $0x130] sm:$0xff] %vm350_vm0, %v4721_v61 }
  0x2d   :  { %391 = vst.msk [vmem:[#allocation2 + $0x138] sm:$0x3] %vm352_vm1, %v4721_v61 }
  0x32   :  { %134 = vrot.lane.b32.xlu2 %v2812_v19, %s2622_s11  ;;  %132 = vrot.lane.b32.xlu1 %v2817_v20, %s2622_s11 }
  0x33   :  { %130 = vrot.lane.b32.xlu0 %v2822_v21, %s2622_s11 }
  0x3a   :  { %140 = vrot.lane.b32.xlu2 %v2833_v22, %s2622_s11  ;;  %138 = vrot.lane.b32.xlu1 %v2838_v23, %s2622_s11 }
  0x3b   :  { %136 = vrot.lane.b32.xlu0 %v2843_v24, %s2622_s11 }
  0x42   :  { %146 = vrot.lane.b32.xlu2 %v2854_v25, %s2622_s11  ;;  %144 = vrot.lane.b32.xlu1 %v2859_v26, %s2622_s11 }
  0x43   :  { %142 = vrot.lane.b32.xlu0 %v2864_v27, %s2622_s11 }
  0x4a   :  { %152 = vrot.lane.b32.xlu2 %v2875_v28, %s2622_s11  ;;  %150 = vrot.lane.b32.xlu1 %v2880_v29, %s2622_s11 }
  0x4b   :  { %148 = vrot.lane.b32.xlu0 %v2885_v30, %s2622_s11 }
  0x52   :  { %256 = vperm.xlu2 %2587, %v238_v31   ;;  %156 = vrot.lane.b32.xlu1 %v2899_v32, %s2622_s11 }
  0x53   :  { %154 = vrot.lane.b32.xlu0 %v2904_v33, %s2622_s11  ;;  %s2627_s11 = smov 12  }
  0x5a   :  { %271 = vperm.xlu2 %2587, %v241_v34   ;;  %266 = vperm.xlu1 %2589, %v240_v35  }
  0x5b   :  { %261 = vperm.xlu0 %2588, %v239_v36  }
  0x5c   :  { %v2919_v37 = vpop.permute.xlu2 %102 }
  0x62   :  { %281 = vperm.xlu2 %2587, %v243_v38   ;;  %276 = vperm.xlu1 %2589, %v242_v39  }
  0x63   :  { %286 = vperm.xlu0 %2588, %v244_v40  }
  0x64   :  { %v2930_v41 = vpop.permute.xlu2 %104 }
  0x6a   :  { %296 = vperm.xlu2 %2587, %v246_v42   ;;  %291 = vperm.xlu1 %2589, %v245_v43  }
  0x6b   :  { %301 = vperm.xlu0 %2588, %v247_v44  }
  0x6c   :  { %v2941_v45 = vpop.permute.xlu2 %110 }
  0x72   :  { %311 = vperm.xlu2 %2587, %v249_v46   ;;  %306 = vperm.xlu1 %2589, %v248_v47  }
  0x73   :  { %316 = vperm.xlu0 %2588, %v250_v48  }
  0x74   :  { %v2952_v49 = vpop.permute.xlu2 %116  ;;  %v2954_v50 = vpop.permute.xlu1 %98 }
  0x75   :  { %v2956_v51 = vpop.permute.xlu0 %94 }
  0x76   :  { %v190_v46 = vmax.f32 %v2696_v2, %v2956_v51 }
  0x7a   :  { %326 = vperm.xlu2 %2587, %v252_v52   ;;  %321 = vperm.xlu1 %2589, %v251_v53  }
  0x7b   :  { %331 = vperm.xlu0 %2588, %v253_v54   ;;  %v425_v54 = vld [vmem:[#allocation2 + $0x1] sm:$0xff] }
  0x7c   :  { %v2967_v55 = vpop.permute.xlu2 %122  ;;  %v2969_v56 = vpop.permute.xlu1 %100 }
  0x7d   :  { %v97_v57 = vpop.permute.xlu0 %96 }
  0x7e   :  { %v191_v44 = vmax.f32 %v2717_v5, %v97_v57 }
  0x80   :  { %v222_v47 = vmax.f32 %v190_v46, %v191_v44 }
  0x82   :  { %570 = vrot.lane.b32.xlu1 %v425_v54, %s2625_s1 }
  0x84   :  { %v2971_v58 = vpop.permute.xlu2 %128  ;;  %v2973_v59 = vpop.permute.xlu1 %108 }
  0x85   :  { %v2975_v60 = vpop.permute.xlu0 %106  ;;  %v197_v51 = vmax.f32 %v2733_v7, %v2973_v59  ;;  %v201_v7 = vmax.f32 %v2749_v9, %v2952_v49 }
  0x86   :  { %v196_v53 = vmax.f32 %v2738_v8, %v2975_v60 }
  0x88   :  { %v225_v57 = vmax.f32 %v196_v53, %v197_v51 }
  0x8c   :  { %v2987_v62 = vpop.permute.xlu2 %134  ;;  %v2989_v63 = vpop.permute.xlu1 %114 }
  0x8d   :  { %v2993_v18 = vpop.permute.xlu0 %112  ;;  %v200_v8 = vmax.f32 %v2754_v10, %v2989_v63 }
  0x8f   :  { %v227_v59 = vmax.f32 %v200_v8, %v201_v7  ;;  %v194_v7 = vmax.f32 %v2686_v0, %v2919_v37  ;;  %v192_v8 = vmax.f32 %v2691_v1, %v2954_v50 }
  0x94   :  { %v3009_v31 = vpop.permute.xlu2 %140  ;;  %v3011_v34 = vpop.permute.xlu1 %120 }
  0x95   :  { %v3015_v35 = vpop.permute.xlu0 %118  ;;  %v203_v1 = vmax.f32 %v2775_v13, %v3011_v34 }
  0x96   :  { %v202_v50 = vmax.f32 %v2780_v14, %v3015_v35 }
  0x9c   :  { %v3031_v36 = vpop.permute.xlu2 %146  ;;  %v127_v38 = vpop.permute.xlu1 %126 }
  0x9d   :  { %v3035_v39 = vpop.permute.xlu0 %124  ;;  %v206_v9 = vmax.f32 %v2796_v16, %v127_v38  ;;  %v213_v16 = vmax.f32 %v2833_v22, %v3009_v31  ;;  %v193_v38 = vmax.f32 %v2712_v4, %v2969_v56  ;;  %v199_v22 = vmax.f32 %v2759_v11, %v2993_v18 }
  0x9e   :  { %v198_v56 = vmax.f32 %v2728_v6, %v2941_v45  ;;  %v205_v13 = vmax.f32 %v2801_v17, %v3035_v39  ;;  %v204_v17 = vmax.f32 %v2770_v12, %v2967_v55 }
  0x9f   :  { %v223_v37 = vmax.f32 %v192_v8, %v193_v38 }
  0xa0   :  { %v226_v18 = vmax.f32 %v198_v56, %v199_v22  ;;  %v229_v35 = vmax.f32 %v204_v17, %v205_v13 }
  0xa4   :  { %v3051_v40 = vpop.permute.xlu2 %152  ;;  %v3053_v42 = vpop.permute.xlu1 %132 }
  0xa5   :  { %v3057_v43 = vpop.permute.xlu0 %130  ;;  %v209_v6 = vmax.f32 %v2817_v20, %v3053_v42 }
  0xa6   :  { %v208_v45 = vmax.f32 %v2822_v21, %v3057_v43 }
  0xa8   :  { %v231_v39 = vmax.f32 %v208_v45, %v209_v6 }
  0xac   :  { %v257_v5 = vpop.permute.xlu2 %256  ;;  %v139_v48 = vpop.permute.xlu1 %138 }
  0xad   :  { %v334_v52 = vmul.f32 %v257_v5, %v222_v47  ;;  %v3080_v2 = vpop.permute.xlu0 %136 }
  0xaf   :  { %393 = vst.msk [vmem:[#allocation2 + $0x11] sm:$0xff] %vm350_vm0, %v334_v52 }
  0xb4   :  { %v272_v44 = vpop.permute.xlu2 %271  ;;  %v3090_v46 = vpop.permute.xlu1 %144 }
  0xb5   :  { %v337_v47 = vmul.f32 %v272_v44, %v225_v57  ;;  %v3092_v5 = vpop.permute.xlu0 %142  ;;  %v207_v57 = vmax.f32 %v2791_v15, %v2971_v58  ;;  %v195_v15 = vmax.f32 %v2707_v3, %v2930_v41  ;;  %v212_v58 = vmax.f32 %v2838_v23, %v139_v48 }
  0xb6   :  { %v3094_v61 = vld [vmem:[#allocation2 + $0x11] sm:$0xff]  ;;  %v219_v23 = vmax.f32 %v2875_v28, %v3051_v40  ;;  %v215_v12 = vmax.f32 %v2859_v26, %v3090_v46  ;;  %v214_v55 = vmax.f32 %v2864_v27, %v3092_v5 }
  0xb7   :  { %396 = vst.msk [vmem:[#allocation2 + $0x41] sm:$0xff] %vm350_vm0, %v337_v47  ;;  %572 = vrot.lane.b32.xlu2 %v3094_v61, %s2625_s1  ;;  %v230_v10 = vmax.f32 %v206_v9, %v207_v57 }
  0xb8   :  { %v234_v46 = vmax.f32 %v214_v55, %v215_v12 }
  0xbc   :  { %v282_v60 = vpop.permute.xlu2 %281  ;;  %v151_v52 = vpop.permute.xlu1 %150 }
  0xbd   :  { %v339_v51 = vmul.f32 %v282_v60, %v227_v59  ;;  %v3103_v53 = vpop.permute.xlu0 %148  ;;  %v233_v59 = vmax.f32 %v212_v58, %v213_v16  ;;  %v224_v60 = vmax.f32 %v194_v7, %v195_v15  ;;  %v218_v4 = vmax.f32 %v2880_v29, %v151_v52  ;;  %v433_v58 = vld [vmem:[#allocation2 + $0xa1] sm:$0xff] }
  0xbe   :  { %v3105_v54 = vld [vmem:[#allocation2 + $0x41] sm:$0xff]  ;;  %v228_v29 = vmax.f32 %v202_v50, %v203_v1  ;;  %v217_v38 = vmax.f32 %v2885_v30, %v3103_v53  ;;  %v216_v30 = vmax.f32 %v2854_v25, %v3031_v36 }
  0xbf   :  { %398 = vst.msk [vmem:[#allocation2 + $0x61] sm:$0xff] %vm350_vm0, %v339_v51  ;;  %578 = vrot.lane.b32.xlu2 %v3105_v54, %s2625_s1  ;;  %v236_v11 = vmax.f32 %v218_v4, %v219_v23  ;;  %v441_v36 = vld [vmem:[#allocation2 + $0x2] sm:$0xff] }
  0xc0   :  { %v235_v53 = vmax.f32 %v216_v30, %v217_v38  ;;  %v3242_v23 = vld [vmem:[#allocation2 + $0x42] sm:$0xff] }
  0xc1   :  { %v449_v1 = vld [vmem:[#allocation2 + $0xa2] sm:$0xff] }
  0xc2   :  { %v3299_v45 = vld [vmem:[#allocation2 + $0x40] sm:$0xff] }
  0xc4   :  { %v297_v49 = vpop.permute.xlu2 %296  ;;  %v3113_v63 = vpop.permute.xlu1 %156 }
  0xc5   :  { %v342_v44 = vmul.f32 %v297_v49, %v230_v10  ;;  %v3115_v47 = vpop.permute.xlu0 %154  ;;  %v211_v49 = vmax.f32 %v2843_v24, %v3080_v2  ;;  %v210_v24 = vmax.f32 %v2812_v19, %v2987_v62  ;;  %v221_v62 = vmax.f32 %v2899_v32, %v3113_v63 }
  0xc6   :  { %v3244_v4 = vld [vmem:[#allocation2 + $0x62] sm:$0xff] }
  0xc7   :  { %401 = vst.msk [vmem:[#allocation2 + $0xb1] sm:$0xff] %vm350_vm0, %v342_v44  ;;  %v3165_v44 = vld [vmem:[#allocation2 + $0x61] sm:$0xff]  ;;  %v232_v26 = vmax.f32 %v210_v24, %v211_v49 }
  0xc8   :  { %v3303_v17 = vld [vmem:[#allocation2 + $0x60] sm:$0xff] }
  0xcc   :  { %v312_v51 = vpop.permute.xlu2 %311  ;;  %v267_v0 = vpop.permute.xlu1 %266 }
  0xcd   :  { %v345_v57 = vmul.f32 %v312_v51, %v233_v59  ;;  %v336_v3 = vmul.f32 %v267_v0, %v224_v60  ;;  %v262_v41 = vpop.permute.xlu0 %261  ;;  %v220_v59 = vmax.f32 %v2904_v33, %v3115_v47 }
  0xce   :  { %v335_v9 = vmul.f32 %v262_v41, %v223_v37  ;;  %v3187_v8 = vld [vmem:[#allocation2 + $0xb1] sm:$0xff] }
  0xcf   :  { %404 = vst.msk [vmem:[#allocation2 + $0xe1] sm:$0xff] %vm350_vm0, %v345_v57  ;;  %v237_v51 = vmax.f32 %v220_v59, %v221_v62  ;;  %v3230_v41 = vld [vmem:[#allocation2 + $0x12] sm:$0xff] }
  0xd0   :  { %395 = vst.msk [vmem:[#allocation2 + $0x31] sm:$0xff] %vm350_vm0, %v336_v3  ;;  %v3253_v56 = vld [vmem:[#allocation2 + $0xb2] sm:$0xff] }
  0xd1   :  { %394 = vst.msk [vmem:[#allocation2 + $0x21] sm:$0xff] %vm350_vm0, %v335_v9 }
  0xd4   :  { %v327_v28 = vpop.permute.xlu2 %326  ;;  %v277_v31 = vpop.permute.xlu1 %276 }
  0xd5   :  { %v348_v40 = vmul.f32 %v327_v28, %v236_v11  ;;  %v338_v48 = vmul.f32 %v277_v31, %v226_v18  ;;  %v287_v52 = vpop.permute.xlu0 %286 }
  0xd6   :  { %v340_v10 = vmul.f32 %v287_v52, %v228_v29  ;;  %v3206_v47 = vld [vmem:[#allocation2 + $0xe1] sm:$0xff]  ;;  %v3285_v52 = vld [vmem:[#allocation2 + $0x10] sm:$0xff] }
  0xd7   :  { %407 = vst.msk [vmem:[#allocation2 + $0x111] sm:$0xff] %vm350_vm0, %v348_v40  ;;  %v3146_v14 = vld [vmem:[#allocation2 + $0x31] sm:$0xff]  ;;  %v3265_v28 = vld [vmem:[#allocation2 + $0xe2] sm:$0xff] }
  0xd8   :  { %397 = vst.msk [vmem:[#allocation2 + $0x51] sm:$0xff] %vm350_vm0, %v338_v48  ;;  %576 = vrot.lane.b32.xlu1 %v3146_v14, %s2625_s1  ;;  %v3155_v34 = vld [vmem:[#allocation2 + $0x21] sm:$0xff]  ;;  %v3232_v9 = vld [vmem:[#allocation2 + $0x32] sm:$0xff] }
  0xd9   :  { %399 = vst.msk [vmem:[#allocation2 + $0x71] sm:$0xff] %vm350_vm0, %v340_v10  ;;  %574 = vrot.lane.b32.xlu0 %v3155_v34, %s2625_s1  ;;  %v3226_v3 = vld [vmem:[#allocation2 + $0x22] sm:$0xff]  ;;  %v3289_v10 = vld [vmem:[#allocation2 + $0x30] sm:$0xff] }
  0xda   :  { %v3283_v48 = vld [vmem:[#allocation2 + $0x20] sm:$0xff] }
  0xdb   :  { %v3355_v55 = vld [vmem:[#allocation2 + $0xe0] sm:$0xff] }
  0xdc   :  { %v292_v20 = vpop.permute.xlu1 %291 }
  0xdd   :  { %v341_v42 = vmul.f32 %v292_v20, %v229_v35  ;;  %v302_v21 = vpop.permute.xlu0 %301  ;;  %v4730_v20 = vmov 0.0  }
  0xde   :  { %v343_v43 = vmul.f32 %v302_v21, %v231_v39  ;;  %v3219_v57 = vld [vmem:[#allocation2 + $0x111] sm:$0xff]  ;;  %1550 = vst.msk [vmem:[#allocation3] sm:$0xff] %vm1082_vm2, %v4730_v20 }
  0xdf   :  { %400 = vst.msk [vmem:[#allocation2 + $0x81] sm:$0xff] %vm350_vm0, %v341_v42  ;;  %v3167_v7 = vld [vmem:[#allocation2 + $0x51] sm:$0xff] }
  0xe0   :  { %402 = vst.msk [vmem:[#allocation2 + $0xc1] sm:$0xff] %vm350_vm0, %v343_v43  ;;  %582 = vrot.lane.b32.xlu1 %v3165_v44, %s2625_s1  ;;  %v3176_v15 = vld [vmem:[#allocation2 + $0x71] sm:$0xff] }
  0xe1   :  { %580 = vrot.lane.b32.xlu0 %v3167_v7, %s2625_s1  ;;  %584 = vrot.lane.b32.xlu2 %v3176_v15, %s2625_s1  ;;  %v3238_v22 = vld [vmem:[#allocation2 + $0x52] sm:$0xff]  ;;  %1553 = vst.msk [vmem:[#allocation3 + $0x10] sm:$0xff] %vm1082_vm2, %v4730_v20 }
  0xe2   :  { %v3251_v50 = vld [vmem:[#allocation2 + $0x72] sm:$0xff]  ;;  %1555 = vst.msk [vmem:[#allocation3 + $0x20] sm:$0xff] %vm1082_vm2, %v4730_v20 }
  0xe3   :  { %v3277_v40 = vld [vmem:[#allocation2 + $0x112] sm:$0xff]  ;;  %1557 = vst.msk [vmem:[#allocation3 + $0x30] sm:$0xff] %vm1082_vm2, %v4730_v20 }
  0xe4   :  { %v307_v2 = vpop.permute.xlu1 %306  ;;  %v3297_v6 = vld [vmem:[#allocation2 + $0x50] sm:$0xff]  ;;  %1559 = vst.msk [vmem:[#allocation3 + $0x40] sm:$0xff] %vm1082_vm2, %v4730_v20 }
  0xe5   :  { %v344_v27 = vmul.f32 %v307_v2, %v232_v26  ;;  %v317_v5 = vpop.permute.xlu0 %316  ;;  %4728 = vst [vmem:[#allocation7_spill] sm:$0xff] %v3297_v6  ;;  %v3323_v42 = vld [vmem:[#allocation2 + $0x70] sm:$0xff] }
  0xe6   :  { %v346_v16 = vmul.f32 %v317_v5, %v234_v46  ;;  %v3317_v39 = vld [vmem:[#allocation2 + $0x80] sm:$0xff]  ;;  %v3325_v21 = vld [vmem:[#allocation2 + $0xb0] sm:$0xff]  ;;  %1561 = vst.msk [vmem:[#allocation3 + $0x50] sm:$0xff] %vm1082_vm2, %v4730_v20 }
  0xe7   :  { %403 = vst.msk [vmem:[#allocation2 + $0xd1] sm:$0xff] %vm350_vm0, %v344_v27  ;;  %v3189_v19 = vld [vmem:[#allocation2 + $0xc1] sm:$0xff]  ;;  %v3387_v27 = vld [vmem:[#allocation2 + $0x110] sm:$0xff] }
  0xe8   :  { %405 = vst.msk [vmem:[#allocation2 + $0xf1] sm:$0xff] %vm350_vm0, %v346_v16  ;;  %588 = vrot.lane.b32.xlu1 %v3187_v8, %s2625_s1  ;;  %v3263_v18 = vld [vmem:[#allocation2 + $0xc2] sm:$0xff] }
  0xe9   :  { %586 = vrot.lane.b32.xlu0 %v433_v58, %s2625_s1  ;;  %590 = vrot.lane.b32.xlu2 %v3189_v19, %s2625_s1  ;;  %1563 = vst.msk [vmem:[#allocation3 + $0x60] sm:$0xff] %vm1082_vm2, %v4730_v20  ;;  %v3353_v12 = vld [vmem:[#allocation2 + $0xc0] sm:$0xff] }
  0xea   :  { %1565 = vst.msk [vmem:[#allocation3 + $0x70] sm:$0xff] %vm1082_vm2, %v4730_v20 }
  0xeb   :  { %1567 = vst.msk [vmem:[#allocation3 + $0x80] sm:$0xff] %vm1082_vm2, %v4730_v20 }
  0xec   :  { %v322_v60 = vpop.permute.xlu1 %321  ;;  %1569 = vst.msk [vmem:[#allocation3 + $0x90] sm:$0xff] %vm1082_vm2, %v4730_v20 }
  0xed   :  { %v347_v32 = vmul.f32 %v322_v60, %v235_v53  ;;  %v332_v63 = vpop.permute.xlu0 %331  ;;  %1571 = vst.msk [vmem:[#allocation3 + $0xa0] sm:$0xff] %vm1082_vm2, %v4730_v20 }
  0xee   :  { %v349_v0 = vmul.f32 %v332_v63, %v237_v51  ;;  %v3203_v33 = vld [vmem:[#allocation2 + $0xd1] sm:$0xff]  ;;  %1573 = vst.msk [vmem:[#allocation3 + $0xb0] sm:$0xff] %vm1082_vm2, %v4730_v20  ;;  %v480_v51 = vld [vmem:[#allocation2 + $0x81] sm:$0xff] }
  0xef   :  { %406 = vst.msk [vmem:[#allocation2 + $0x101] sm:$0xff] %vm350_vm0, %v347_v32  ;;  %v3208_v37 = vld [vmem:[#allocation2 + $0xf1] sm:$0xff] }
  0xf0   :  { %408 = vst.msk [vmem:[#allocation2 + $0x121] sm:$0xff] %vm350_vm0, %v349_v0  ;;  %594 = vrot.lane.b32.xlu1 %v3206_v47, %s2625_s1  ;;  %v3259_v11 = vld [vmem:[#allocation2 + $0xd2] sm:$0xff] }
  0xf1   :  { %592 = vrot.lane.b32.xlu0 %v3203_v33, %s2625_s1  ;;  %596 = vrot.lane.b32.xlu2 %v3208_v37, %s2625_s1  ;;  %v3275_v29 = vld [vmem:[#allocation2 + $0xf2] sm:$0xff]  ;;  %1575 = vst.msk [vmem:[#allocation3 + $0xc0] sm:$0xff] %vm1082_vm2, %v4730_v20 }
  0xf2   :  { %v3347_v49 = vld [vmem:[#allocation2 + $0xd0] sm:$0xff]  ;;  %1577 = vst.msk [vmem:[#allocation3 + $0xd0] sm:$0xff] %vm1082_vm2, %v4730_v20 }
  0xf3   :  { %4731 = vst [vmem:[#allocation9_spill] sm:$0xff] %v3347_v49  ;;  %v3385_v46 = vld [vmem:[#allocation2 + $0xf0] sm:$0xff] }
  0xf4   :  { %v3357_v24 = vpop.permute.xlu1 %570  ;;  %1579 = vst.msk [vmem:[#allocation3 + $0xe0] sm:$0xff] %vm1082_vm2, %v4730_v20 }
  0xf5   :  { %1581 = vst.msk [vmem:[#allocation3 + $0xf0] sm:$0xff] %vm1082_vm2, %v4730_v20 }
  0xf6   :  { %v3217_v25 = vld [vmem:[#allocation2 + $0x101] sm:$0xff]  ;;  %1583 = vst.msk [vmem:[#allocation3 + $0x100] sm:$0xff] %vm1082_vm2, %v4730_v20 }
  0xf7   :  { %v3271_v31 = vld [vmem:[#allocation2 + $0x102] sm:$0xff]  ;;  %1585 = vst.msk [vmem:[#allocation3 + $0x110] sm:$0xff] %vm1082_vm2, %v4730_v20 }
  0xf8   :  { %600 = vrot.lane.b32.xlu1 %v3219_v57, %s2625_s1  ;;  %1587 = vst.msk [vmem:[#allocation3 + $0x120] sm:$0xff] %vm1082_vm2, %v4730_v20  ;;  %v3379_v2 = vld [vmem:[#allocation2 + $0x100] sm:$0xff] }
  0xf9   :  { %598 = vrot.lane.b32.xlu0 %v3217_v25, %s2625_s1  ;;  %634 = vrot.lane.b32.xlu2 %v441_v36, %s2626_s15  ;;  %4733 = vst [vmem:[#allocation11_spill] sm:$0xff] %v3379_v2  ;;  %v3401_v38 = vld [vmem:[#allocation2 + $0x120] sm:$0xff] }
  0xfa   :  { %1589 = vst.msk [vmem:[#allocation3 + $0x130] sm:$0xff] %vm1082_vm2, %v4730_v20 }
  0xfb   :  { %4734 = vst [vmem:[#allocation12_spill] sm:$0xff] %v3387_v27 }
 0x100   :  { %638 = vrot.lane.b32.xlu1 %v3226_v3, %s2626_s15 }
 0x101   :  { %636 = vrot.lane.b32.xlu0 %v3230_v41, %s2626_s15  ;;  %640 = vrot.lane.b32.xlu2 %v3232_v9, %s2626_s15 }
 0x108   :  { %644 = vrot.lane.b32.xlu1 %v3238_v22, %s2626_s15 }
 0x109   :  { %642 = vrot.lane.b32.xlu0 %v3242_v23, %s2626_s15  ;;  %646 = vrot.lane.b32.xlu2 %v3244_v4, %s2626_s15 }
 0x110   :  { %650 = vrot.lane.b32.xlu1 %v449_v1, %s2626_s15 }
 0x111   :  { %648 = vrot.lane.b32.xlu0 %v3251_v50, %s2626_s15  ;;  %652 = vrot.lane.b32.xlu2 %v3253_v56, %s2626_s15  ;;  %v3291_v13 = vpop.permute.xlu2 %572 }
 0x118   :  { %656 = vrot.lane.b32.xlu1 %v3259_v11, %s2626_s15 }
 0x119   :  { %654 = vrot.lane.b32.xlu0 %v3263_v18, %s2626_s15  ;;  %658 = vrot.lane.b32.xlu2 %v3265_v28, %s2626_s15  ;;  %v3309_v35 = vpop.permute.xlu2 %578 }
 0x11a   :  { %4729 = vst [vmem:[#allocation8_spill] sm:$0xff] %v3309_v35 }
 0x120   :  { %662 = vrot.lane.b32.xlu1 %v3271_v31, %s2626_s15 }
 0x121   :  { %660 = vrot.lane.b32.xlu0 %v3275_v29, %s2626_s15  ;;  %664 = vrot.lane.b32.xlu2 %v3277_v40, %s2626_s15 }
 0x128   :  { %700 = vrot.lane.b32.xlu1 %v3283_v48, %s2627_s11 }
 0x129   :  { %698 = vrot.lane.b32.xlu0 %v3285_v52, %s2627_s11  ;;  %702 = vrot.lane.b32.xlu2 %v3289_v10, %s2627_s11 }
 0x130   :  { %706 = vrot.lane.b32.xlu1 %v3297_v6, %s2627_s11 }
 0x131   :  { %704 = vrot.lane.b32.xlu0 %v3299_v45, %s2627_s11  ;;  %708 = vrot.lane.b32.xlu2 %v3303_v17, %s2627_s11 }
 0x138   :  { %712 = vrot.lane.b32.xlu1 %v3317_v39, %s2627_s11 }
 0x139   :  { %710 = vrot.lane.b32.xlu0 %v3323_v42, %s2627_s11  ;;  %714 = vrot.lane.b32.xlu2 %v3325_v21, %s2627_s11 }
 0x13b   :  { %v3337_v43 = vpop.permute.xlu2 %584 }
 0x140   :  { %718 = vrot.lane.b32.xlu1 %v3347_v49, %s2627_s11 }
 0x141   :  { %716 = vrot.lane.b32.xlu0 %v3353_v12, %s2627_s11  ;;  %720 = vrot.lane.b32.xlu2 %v3355_v55, %s2627_s11 }
 0x143   :  { %v3369_v26 = vpop.permute.xlu2 %590 }
 0x144   :  { %4732 = vst [vmem:[#allocation10_spill] sm:$0xff] %v3369_v26 }
 0x148   :  { %724 = vrot.lane.b32.xlu1 %v3379_v2, %s2627_s11 }
 0x149   :  { %722 = vrot.lane.b32.xlu0 %v3385_v46, %s2627_s11  ;;  %726 = vrot.lane.b32.xlu2 %v3387_v27, %s2627_s11 }
 0x14a   :  { %v3393_v5 = vpop.permute.xlu1 %576 }
 0x14b   :  { %v3395_v16 = vpop.permute.xlu2 %596  ;;  %v3397_v58 = vpop.permute.xlu0 %574 }
 0x14c   :  { %4735 = vst [vmem:[#allocation13_spill] sm:$0xff] %v3395_v16 }
 0x150   :  { %762 = vrot.lane.b32.xlu1 %v3094_v61, %s2628_s16 }
 0x151   :  { %764 = vrot.lane.b32.xlu2 %v3155_v34, %s2628_s16  ;;  %728 = vrot.lane.b32.xlu0 %v3401_v38, %s2627_s11 }
 0x152   :  { %v3407_v62 = vpop.permute.xlu1 %582 }
 0x153   :  { %v3409_v59 = vpop.permute.xlu2 %634  ;;  %v3411_v30 = vpop.permute.xlu0 %580 }
 0x154   :  { %4736 = vst [vmem:[#allocation14_spill] sm:$0xff] %v3411_v30 }
 0x158   :  { %768 = vrot.lane.b32.xlu1 %v3105_v54, %s2628_s16 }
 0x159   :  { %770 = vrot.lane.b32.xlu2 %v3167_v7, %s2628_s16  ;;  %766 = vrot.lane.b32.xlu0 %v3146_v14, %s2628_s16 }
 0x15a   :  { %v3419_v61 = vpop.permute.xlu1 %588 }
 0x15b   :  { %v3421_v53 = vpop.permute.xlu2 %640  ;;  %v3423_v60 = vpop.permute.xlu0 %586 }
 0x15c   :  { %4737 = vst [vmem:[#allocation15_spill] sm:$0xff] %v3421_v53  ;;  %v544_v53 = vld [vmem:[#allocation2 + $0x82] sm:$0xff] }
 0x160   :  { %774 = vrot.lane.b32.xlu1 %v3176_v15, %s2628_s16 }
 0x161   :  { %776 = vrot.lane.b32.xlu2 %v480_v51, %s2628_s16  ;;  %772 = vrot.lane.b32.xlu0 %v3165_v44, %s2628_s16 }
 0x162   :  { %v3430_v32 = vpop.permute.xlu1 %594 }
 0x163   :  { %4738 = vst [vmem:[#allocation16_spill] sm:$0xff] %v3430_v32  ;;  %v3432_v63 = vpop.permute.xlu2 %646  ;;  %v3434_v0 = vpop.permute.xlu0 %592 }
 0x164   :  { %4739 = vst [vmem:[#allocation17_spill] sm:$0xff] %v3434_v0 }
 0x168   :  { %780 = vrot.lane.b32.xlu1 %v3189_v19, %s2628_s16 }
 0x169   :  { %782 = vrot.lane.b32.xlu2 %v3203_v33, %s2628_s16  ;;  %778 = vrot.lane.b32.xlu0 %v3187_v8, %s2628_s16 }
 0x16a   :  { %v3442_v36 = vpop.permute.xlu1 %600 }
 0x16b   :  { %4740 = vst [vmem:[#allocation18_spill] sm:$0xff] %v3442_v36  ;;  %v3444_v1 = vpop.permute.xlu2 %652  ;;  %v3446_v20 = vpop.permute.xlu0 %598  ;;  %v3460_v36 = vld [vmem:[#allocation2 + $0x121] sm:$0xff] }
 0x16c   :  { %4741 = vst [vmem:[#allocation19_spill] sm:$0xff] %v3446_v20 }
 0x170   :  { %786 = vrot.lane.b32.xlu1 %v3208_v37, %s2628_s16 }
 0x171   :  { %788 = vrot.lane.b32.xlu2 %v3217_v25, %s2628_s16  ;;  %784 = vrot.lane.b32.xlu0 %v3206_v47, %s2628_s16 }
 0x172   :  { %v3454_v0 = vpop.permute.xlu1 %638 }
 0x173   :  { %v3456_v30 = vpop.permute.xlu2 %658  ;;  %v3458_v8 = vpop.permute.xlu0 %636 }
 0x174   :  { %4742 = vst [vmem:[#allocation20_spill] sm:$0xff] %v3456_v30 }
 0x178   :  { %792 = vrot.lane.b32.xlu1 %v3460_v36, %s2628_s16 }
 0x179   :  { %826 = vrot.lane.b32.xlu2 %v3230_v41, %s2629_s17  ;;  %790 = vrot.lane.b32.xlu0 %v3219_v57, %s2628_s16 }
 0x17a   :  { %v3468_v20 = vpop.permute.xlu1 %644 }
 0x17b   :  { %4743 = vst [vmem:[#allocation21_spill] sm:$0xff] %v3468_v20  ;;  %v3470_v16 = vpop.permute.xlu2 %664  ;;  %v3472_v26 = vpop.permute.xlu0 %642 }
 0x17c   :  { %4744 = vst [vmem:[#allocation22_spill] sm:$0xff] %v3470_v16 }
 0x17d   :  { %4745 = vst [vmem:[#allocation23_spill] sm:$0xff] %v3472_v26 }
 0x180   :  { %830 = vrot.lane.b32.xlu1 %v3232_v9, %s2629_s17 }
 0x181   :  { %832 = vrot.lane.b32.xlu2 %v3242_v23, %s2629_s17  ;;  %828 = vrot.lane.b32.xlu0 %v3226_v3, %s2629_s17 }
 0x182   :  { %v3480_v30 = vpop.permute.xlu1 %650 }
 0x183   :  { %v3482_v41 = vpop.permute.xlu2 %702  ;;  %v3484_v32 = vpop.permute.xlu0 %648 }
 0x188   :  { %954 = vrot.lane.b32.xlu1 %v3155_v34, %s2630_s18 }
 0x189   :  { %1018 = vrot.lane.b32.xlu2 %v3226_v3, %s2631_s19  ;;  %890 = vrot.lane.b32.xlu0 %v3283_v48, %s2632_s20 }
 0x18a   :  { %v3492_v16 = vpop.permute.xlu1 %656 }
 0x18b   :  { %4746 = vst [vmem:[#allocation24_spill] sm:$0xff] %v3492_v16  ;;  %v3494_v20 = vpop.permute.xlu2 %708  ;;  %v3496_v26 = vpop.permute.xlu0 %654 }
 0x18c   :  { %4747 = vst [vmem:[#allocation25_spill] sm:$0xff] %v3494_v20 }
 0x18d   :  { %4748 = vst [vmem:[#allocation26_spill] sm:$0xff] %v3496_v26  ;;  %v545_v26 = vld [vmem:[#allocation2 + $0x92] sm:$0xff] }
 0x190   :  { %902 = vrot.lane.b32.xlu1 %v3317_v39, %s2632_s20 }
 0x191   :  { %966 = vrot.lane.b32.xlu2 %v480_v51, %s2630_s18  ;;  %838 = vrot.lane.b32.xlu0 %v3251_v50, %s2629_s17 }
 0x192   :  { %v3503_v34 = vpop.permute.xlu1 %662 }
 0x193   :  { %4749 = vst [vmem:[#allocation27_spill] sm:$0xff] %v3503_v34  ;;  %v3505_v3 = vpop.permute.xlu2 %714  ;;  %v3507_v35 = vpop.permute.xlu0 %660  ;;  %v513_v34 = vld [vmem:[#allocation2 + $0x90] sm:$0xff] }
 0x194   :  { %4750 = vst [vmem:[#allocation28_spill] sm:$0xff] %v3505_v3  ;;  %v529_v3 = vld [vmem:[#allocation2 + $0x91] sm:$0xff] }
 0x195   :  { %4751 = vst [vmem:[#allocation29_spill] sm:$0xff] %v3507_v35 }
 0x198   :  { %1030 = vrot.lane.b32.xlu1 %v544_v53, %s2631_s19 }
 0x199   :  { %956 = vrot.lane.b32.xlu2 %v3146_v14, %s2630_s18  ;;  %892 = vrot.lane.b32.xlu0 %v3289_v10, %s2632_s20 }
 0x19a   :  { %v3514_v39 = vpop.permute.xlu1 %700 }
 0x19b   :  { %v3516_v51 = vpop.permute.xlu2 %720  ;;  %v3518_v16 = vpop.permute.xlu0 %698 }
 0x19c   :  { %4752 = vst [vmem:[#allocation30_spill] sm:$0xff] %v3516_v51 }
 0x1a0   :  { %840 = vrot.lane.b32.xlu1 %v544_v53, %s2629_s17 }
 0x1a1   :  { %904 = vrot.lane.b32.xlu2 %v513_v34, %s2632_s20  ;;  %1020 = vrot.lane.b32.xlu0 %v3232_v9, %s2631_s19 }
 0x1a2   :  { %v3524_v20 = vpop.permute.xlu1 %706 }
 0x1a3   :  { %4753 = vst [vmem:[#allocation31_spill] sm:$0xff] %v3524_v20  ;;  %v3526_v14 = vpop.permute.xlu2 %726  ;;  %v3528_v35 = vpop.permute.xlu0 %704 }
 0x1a4   :  { %4754 = vst [vmem:[#allocation32_spill] sm:$0xff] %v3526_v14 }
 0x1a8   :  { %894 = vrot.lane.b32.xlu1 %v3299_v45, %s2632_s20 }
 0x1a9   :  { %1032 = vrot.lane.b32.xlu2 %v545_v26, %s2631_s19  ;;  %968 = vrot.lane.b32.xlu0 %v529_v3, %s2630_s18  ;;  %v1075_v26 = vsel %vm350_vm0, %v3325_v21, %v3419_v61 }
 0x1aa   :  { %v3534_v53 = vpop.permute.xlu1 %712  ;;  %v1092_v51 = vsel %vm1082_vm2, %v1075_v26, %v3444_v1 }
 0x1ab   :  { %v3536_v34 = vpop.permute.xlu2 %764  ;;  %v3538_v9 = vpop.permute.xlu0 %710 }
 0x1b0   :  { %1022 = vrot.lane.b32.xlu1 %v3242_v23, %s2631_s19 }
 0x1b1   :  { %842 = vrot.lane.b32.xlu2 %v3253_v56, %s2629_s17  ;;  %958 = vrot.lane.b32.xlu0 %v3105_v54, %s2630_s18 }
 0x1b2   :  { %v3549_v3 = vpop.permute.xlu1 %718 }
 0x1b3   :  { %v3553_v14 = vpop.permute.xlu2 %770  ;;  %v717_v20 = vpop.permute.xlu0 %716 }
 0x1b4   :  { %v3556_v23 = vsel %vm1099_vm3, %v1092_v51, %v717_v20 }
 0x1b8   :  { %970 = vrot.lane.b32.xlu1 %v3189_v19, %s2630_s18 }
 0x1b9   :  { %896 = vrot.lane.b32.xlu2 %v3297_v6, %s2632_s20  ;;  %906 = vrot.lane.b32.xlu0 %v3353_v12, %s2632_s20 }
 0x1ba   :  { %v3564_v54 = vpop.permute.xlu1 %724 }
 0x1bb   :  { %4755 = vst [vmem:[#allocation33_spill] sm:$0xff] %v3564_v54  ;;  %v3566_v56 = vpop.permute.xlu2 %776  ;;  %v3568_v21 = vpop.permute.xlu0 %722 }
 0x1c0   :  { %960 = vrot.lane.b32.xlu1 %v3167_v7, %s2630_s18 }
 0x1c1   :  { %1024 = vrot.lane.b32.xlu2 %v3238_v22, %s2631_s19  ;;  %1034 = vrot.lane.b32.xlu0 %v3263_v18, %s2631_s19 }
 0x1c2   :  { %v3576_v19 = vpop.permute.xlu1 %762 }
 0x1c3   :  { %v3578_v20 = vpop.permute.xlu2 %782  ;;  %v3580_v61 = vpop.permute.xlu0 %728 }
 0x1c4   :  { %4756 = vst [vmem:[#allocation34_spill] sm:$0xff] %v3578_v20  ;;  %v409_v20 = vld [vmem:[#allocation2] sm:$0xff] }
 0x1c5   :  { %4757 = vst [vmem:[#allocation35_spill] sm:$0xff] %v3580_v61 }
 0x1c8   :  { %850 = vrot.lane.b32.xlu1 %v3275_v29, %s2629_s17 }
 0x1c9   :  { %908 = vrot.lane.b32.xlu2 %v3347_v49, %s2632_s20  ;;  %844 = vrot.lane.b32.xlu0 %v3263_v18, %s2629_s17  ;;  %v1205_v18 = vld [vmem:[%s4714_s2 + $0x20] sm:$0xf] }
 0x1ca   :  { %v3588_v7 = vpop.permute.xlu1 %768  ;;  %2527 = vmatpush.msk.msra.mxu0 %vm1255_vm4, %v1205_v18  ;;  %2561 = vmatpush.msk.msra.mxu2 %vm1255_vm4, %v1205_v18 }
 0x1cb   :  { %v3590_v1 = vpop.permute.xlu2 %788  ;;  %v3592_v51 = vpop.permute.xlu0 %766  ;;  %2562 = vmatpush.msk.msra.mxu3 %vm1255_vm4, %v1205_v18 }
 0x1cc   :  { %4758 = vst [vmem:[#allocation36_spill] sm:$0xff] %v3590_v1 }
 0x1d0   :  { %834 = vrot.lane.b32.xlu1 %v3238_v22, %s2629_s17  ;;  %v1204_v22 = vld [vmem:[%s4714_s2 + $0x18] sm:$0xff] }
 0x1d1   :  { %972 = vrot.lane.b32.xlu2 %v3203_v33, %s2630_s18  ;;  %914 = vrot.lane.b32.xlu0 %v3379_v2, %s2632_s20  ;;  %v1203_v33 = vld [vmem:[%s4714_s2 + $0x10] sm:$0xff] }
 0x1d2   :  { %v3600_v26 = vpop.permute.xlu1 %774  ;;  %1271 = vmatpush.msra.mxu0 %v1204_v22  ;;  %2563 = vmatpush.msra.mxu2 %v1204_v22 }
 0x1d3   :  { %v827_v61 = vpop.permute.xlu2 %826  ;;  %v3602_v49 = vpop.permute.xlu0 %772  ;;  %2564 = vmatpush.msra.mxu3 %v1204_v22  ;;  %v1202_v22 = vld [vmem:[%s4714_s2 + $0x8] sm:$0xff] }
 0x1d4   :  { %4759 = vst [vmem:[#allocation37_spill] sm:$0xff] %v3602_v49  ;;  %1272 = vmatpush.msra.mxu0 %v1203_v33  ;;  %2565 = vmatpush.msra.mxu2 %v1203_v33 }
 0x1d5   :  { %2566 = vmatpush.msra.mxu3 %v1203_v33 }
 0x1d6   :  { %1273 = vmatpush.msra.mxu0 %v1202_v22  ;;  %2567 = vmatpush.msra.mxu2 %v1202_v22 }
 0x1d7   :  { %2568 = vmatpush.msra.mxu3 %v1202_v22 }
 0x1d8   :  { %898 = vrot.lane.b32.xlu1 %v3303_v17, %s2632_s20 }
 0x1d9   :  { %1036 = vrot.lane.b32.xlu2 %v3259_v11, %s2631_s19  ;;  %978 = vrot.lane.b32.xlu0 %v3217_v25, %s2630_s18  ;;  %v1201_v25 = vld [vmem:[%s4714_s2] sm:$0xff] }
 0x1da   :  { %v3619_v2 = vpop.permute.xlu1 %780  ;;  %1274 = vmatpush.msra.mxu0 %v1201_v25  ;;  %2569 = vmatpush.msra.mxu2 %v1201_v25 }
 0x1db   :  { %v3621_v18 = vpop.permute.xlu2 %832  ;;  %v3623_v49 = vpop.permute.xlu0 %778  ;;  %2570 = vmatpush.msra.mxu3 %v1201_v25 }
 0x1e0   :  { %962 = vrot.lane.b32.xlu1 %v3165_v44, %s2630_s18 }
 0x1e1   :  { %1026 = vrot.lane.b32.xlu2 %v3244_v4, %s2631_s19  ;;  %1042 = vrot.lane.b32.xlu0 %v3271_v31, %s2631_s19 }
 0x1e2   :  { %v3637_v33 = vpop.permute.xlu1 %786 }
 0x1e3   :  { %v1019_v1 = vpop.permute.xlu2 %1018  ;;  %v3639_v54 = vpop.permute.xlu0 %784 }
 0x1e4   :  { %4760 = vst [vmem:[#allocation38_spill] sm:$0xff] %v3639_v54 }
 0x1e8   :  { %852 = vrot.lane.b32.xlu1 %v3271_v31, %s2629_s17 }
 0x1e9   :  { %910 = vrot.lane.b32.xlu2 %v3355_v55, %s2632_s20  ;;  %846 = vrot.lane.b32.xlu0 %v3259_v11, %s2629_s17  ;;  %v1066_v11 = vsel %vm350_vm0, %v409_v20, %v3357_v24 }
 0x1ea   :  { %v3647_v44 = vpop.permute.xlu1 %792 }
 0x1eb   :  { %4761 = vst [vmem:[#allocation39_spill] sm:$0xff] %v3647_v44  ;;  %v967_v22 = vpop.permute.xlu2 %966  ;;  %v3649_v25 = vpop.permute.xlu0 %790  ;;  %v1083_v44 = vsel %vm1082_vm2, %v1066_v11, %v3409_v59 }
 0x1f0   :  { %836 = vrot.lane.b32.xlu1 %v3244_v4, %s2629_s17 }
 0x1f1   :  { %974 = vrot.lane.b32.xlu2 %v3206_v47, %s2630_s18  ;;  %916 = vrot.lane.b32.xlu0 %v3387_v27, %s2632_s20  ;;  %v1100_v47 = vsel %vm1099_vm3, %v1083_v44, %v3518_v16 }
 0x1f2   :  { %v3657_v31 = vpop.permute.xlu1 %830  ;;  %v1117_v4 = vsel %vm1116_vm6, %v1100_v47, %v3576_v19 }
 0x1f3   :  { %v957_v54 = vpop.permute.xlu2 %956  ;;  %v829_v6 = vpop.permute.xlu0 %828  ;;  %v1134_v59 = vsel %vm1133_vm5, %v1117_v4, %v827_v61 }
 0x1f8   :  { %900 = vrot.lane.b32.xlu1 %v3323_v42, %s2632_s20 }
 0x1f9   :  { %1038 = vrot.lane.b32.xlu2 %v3265_v28, %s2631_s19  ;;  %980 = vrot.lane.b32.xlu0 %v3219_v57, %s2630_s18  ;;  %v1072_v57 = vsel %vm350_vm0, %v3303_v17, %v3407_v62 }
 0x1fa   :  { %v955_v24 = vpop.permute.xlu1 %954  ;;  %v1089_v19 = vsel %vm1082_vm2, %v1072_v57, %v3432_v63 }
 0x1fb   :  { %v905_v20 = vpop.permute.xlu2 %904  ;;  %v891_v11 = vpop.permute.xlu0 %890  ;;  %v1106_v61 = vsel %vm1099_vm3, %v1089_v19, %v3538_v9  ;;  %v1067_v9 = vsel %vm350_vm0, %v3285_v52, %v3291_v13  ;;  %v1068_v19 = vsel %vm350_vm0, %v3283_v48, %v3397_v58 }
 0x1fc   :  { %v1151_v16 = vsel %vm1150_vm7, %v1134_v59, %v891_v11 }
 0x1fd   :  { %v1168_v44 = vsel %vm1167_vm8, %v1151_v16, %v955_v24  ;;  %v504_v16 = vld [vmem:[#allocation2 + $0x122] sm:$0xff] }
 0x1fe   :  { %v1185_v27 = vsel %vm1184_vm9, %v1168_v44, %v1019_v1  ;;  %v1123_v1 = vsel %vm1116_vm6, %v1106_v61, %v3600_v26  ;;  %v521_v61 = vld [vmem:[#allocation2 + $0x130] sm:$0xff] }
 0x1ff   :  { %2528 = vmatmul.msk.f32.vlgmr.msra.gmra.mxu0 %vm1206_vm10, %v1185_v27 }
 0x200   :  { %964 = vrot.lane.b32.xlu1 %v3176_v15, %s2630_s18 }
 0x201   :  { %1028 = vrot.lane.b32.xlu2 %v3251_v50, %s2631_s19  ;;  %1044 = vrot.lane.b32.xlu0 %v3277_v40, %s2631_s19 }
 0x202   :  { %v903_v27 = vpop.permute.xlu1 %902 }
 0x203   :  { %v1033_v17 = vpop.permute.xlu2 %1032  ;;  %v839_v62 = vpop.permute.xlu0 %838 }
 0x204   :  { %v1140_v15 = vsel %vm1133_vm5, %v1123_v1, %v839_v62 }
 0x205   :  { %v1157_v47 = vsel %vm1150_vm7, %v1140_v15, %v903_v27  ;;  %v553_v27 = vld [vmem:[#allocation2 + $0x132] sm:$0xff] }
 0x206   :  { %v1174_v63 = vsel %vm1167_vm8, %v1157_v47, %v967_v22  ;;  %v417_v47 = vld [vmem:[#allocation2 + $0xa0] sm:$0xff] }
 0x208   :  { %854 = vrot.lane.b32.xlu1 %v3277_v40, %s2629_s17  ;;  %v1084_v40 = vsel %vm1082_vm2, %v1067_v9, %v3458_v8 }
 0x209   :  { %912 = vrot.lane.b32.xlu2 %v3385_v46, %s2632_s20  ;;  %848 = vrot.lane.b32.xlu0 %v3265_v28, %s2629_s17  ;;  %v1101_v28 = vsel %vm1099_vm3, %v1084_v40, %v3514_v39 }
 0x20a   :  { %v1031_v50 = vpop.permute.xlu1 %1030  ;;  %v1118_v22 = vsel %vm1116_vm6, %v1101_v28, %v3536_v34  ;;  %v4763_v28 = vld [vmem:[#allocation15_spill] sm:$0xff] }
 0x20b   :  { %v3705_v26 = vpop.permute.xlu2 %842  ;;  %v893_v4 = vpop.permute.xlu0 %892  ;;  %v1191_v24 = vsel %vm1184_vm9, %v1174_v63, %v1031_v50  ;;  %v1135_v59 = vsel %vm1133_vm5, %v1118_v22, %v829_v6  ;;  %v1073_v6 = vsel %vm350_vm0, %v3323_v42, %v3337_v43  ;;  %v1074_v50 = vsel %vm350_vm0, %v417_v47, %v3423_v60 }
 0x20c   :  { %2534 = vmatmul.msk.f32.vlgmr.msra.gmra.mxu2 %vm1206_vm10, %v1191_v24  ;;  %v1152_v52 = vsel %vm1150_vm7, %v1135_v59, %v893_v4  ;;  %v1069_v4 = vsel %vm350_vm0, %v3289_v10, %v3393_v5  ;;  %v4762_v24 = vld [vmem:[#allocation28_spill] sm:$0xff] }
 0x20d   :  { %v1169_v39 = vsel %vm1167_vm8, %v1152_v52, %v957_v54  ;;  %v1086_v22 = vsel %vm1082_vm2, %v1069_v4, %v4763_v28 }
 0x20e   :  { %v1103_v60 = vsel %vm1099_vm3, %v1086_v22, %v3528_v35 }
 0x20f   :  { %v1120_v52 = vsel %vm1116_vm6, %v1103_v60, %v3588_v7 }
 0x210   :  { %976 = vrot.lane.b32.xlu1 %v3208_v37, %s2630_s18  ;;  %v1090_v37 = vsel %vm1082_vm2, %v1073_v6, %v3484_v32  ;;  %v1137_v5 = vsel %vm1133_vm5, %v1120_v52, %v3621_v18  ;;  %v1126_v18 = vsel %vm1116_vm6, %v3556_v23, %v3619_v2  ;;  %v4765_v23 = vld [vmem:[#allocation16_spill] sm:$0xff] }
 0x211   :  { %982 = vrot.lane.b32.xlu2 %v3460_v36, %s2630_s18  ;;  %918 = vrot.lane.b32.xlu0 %v3401_v38, %s2632_s20  ;;  %v1107_v36 = vsel %vm1099_vm3, %v1090_v37, %v3534_v53 }
 0x212   :  { %v841_v13 = vpop.permute.xlu1 %840  ;;  %v1124_v38 = vsel %vm1116_vm6, %v1107_v36, %v3566_v56  ;;  %v537_v56 = vld [vmem:[#allocation2 + $0x131] sm:$0xff] }
 0x213   :  { %v897_v8 = vpop.permute.xlu2 %896  ;;  %v1021_v11 = vpop.permute.xlu0 %1020  ;;  %v1141_v54 = vsel %vm1133_vm5, %v1124_v38, %v841_v13 }
 0x214   :  { %v1186_v34 = vsel %vm1184_vm9, %v1169_v39, %v1021_v11  ;;  %v1158_v32 = vsel %vm1150_vm7, %v1141_v54, %v905_v20  ;;  %v1154_v13 = vsel %vm1150_vm7, %v1137_v5, %v897_v8 }
 0x215   :  { %2529 = vmatmul.msk.f32.gmra.mxu0 %vm1206_vm10, %v1186_v34 }
 0x218   :  { %1046 = vrot.lane.b32.xlu1 %v504_v16, %s2631_s19 }
 0x219   :  { %856 = vrot.lane.b32.xlu2 %v504_v16, %s2629_s17  ;;  %1040 = vrot.lane.b32.xlu0 %v3275_v29, %s2631_s19  ;;  %v1085_v29 = vsel %vm1082_vm2, %v1068_v19, %v3454_v0  ;;  %v4766_v19 = vld [vmem:[#allocation20_spill] sm:$0xff] }
 0x21a   :  { %v895_v42 = vpop.permute.xlu1 %894  ;;  %v1102_v20 = vsel %vm1099_vm3, %v1085_v29, %v3482_v41 }
 0x21b   :  { %v1025_v43 = vpop.permute.xlu2 %1024  ;;  %v969_v44 = vpop.permute.xlu0 %968  ;;  %v1119_v1 = vsel %vm1116_vm6, %v1102_v20, %v3592_v51  ;;  %v4768_v20 = vld [vmem:[#allocation31_spill] sm:$0xff] }
 0x21c   :  { %v1175_v53 = vsel %vm1167_vm8, %v1158_v32, %v969_v44  ;;  %v1136_v48 = vsel %vm1133_vm5, %v1119_v1, %v3657_v31  ;;  %v1091_v31 = vsel %vm1082_vm2, %v1074_v50, %v3480_v30 }
 0x21d   :  { %v1192_v57 = vsel %vm1184_vm9, %v1175_v53, %v1033_v17  ;;  %v1153_v17 = vsel %vm1150_vm7, %v1136_v48, %v895_v42  ;;  %v1108_v40 = vsel %vm1099_vm3, %v1091_v31, %v4762_v24  ;;  %v4770_v31 = vld [vmem:[#allocation26_spill] sm:$0xff] }
 0x21e   :  { %2535 = vmatmul.msk.f32.gmra.mxu2 %vm1206_vm10, %v1192_v57  ;;  %v1125_v59 = vsel %vm1116_vm6, %v1108_v40, %v3623_v49  ;;  %v4764_v57 = vld [vmem:[#allocation8_spill] sm:$0xff]  ;;  %v4771_v40 = vld [vmem:[#allocation34_spill] sm:$0xff] }
 0x21f   :  { %v1142_v30 = vsel %vm1133_vm5, %v1125_v59, %v3705_v26  ;;  %v1070_v2 = vsel %vm350_vm0, %v3299_v45, %v4764_v57 }
 0x220   :  { %984 = vrot.lane.b32.xlu1 %v537_v56, %s2630_s18  ;;  %v1078_v56 = vsel %vm350_vm0, %v3355_v55, %v4765_v23 }
 0x221   :  { %920 = vrot.lane.b32.xlu0 %v521_v61, %s2632_s20  ;;  %1048 = vrot.lane.b32.xlu2 %v553_v27, %s2631_s19  ;;  %v1095_v61 = vsel %vm1082_vm2, %v1078_v56, %v4766_v19  ;;  %v4767_v27 = vld [vmem:[#allocation23_spill] sm:$0xff] }
 0x222   :  { %v1023_v58 = vpop.permute.xlu1 %1022  ;;  %v1087_v29 = vsel %vm1082_vm2, %v1070_v2, %v4767_v27  ;;  %v1112_v48 = vsel %vm1099_vm3, %v1095_v61, %v3568_v21 }
 0x223   :  { %v909_v62 = vpop.permute.xlu2 %908  ;;  %v959_v0 = vpop.permute.xlu0 %958  ;;  %v1104_v1 = vsel %vm1099_vm3, %v1087_v29, %v4768_v20  ;;  %v1129_v45 = vsel %vm1116_vm6, %v1112_v48, %v3637_v33  ;;  %v4769_v33 = vld [vmem:[#allocation10_spill] sm:$0xff] }
 0x224   :  { %v1170_v15 = vsel %vm1167_vm8, %v1153_v17, %v959_v0 }
 0x225   :  { %v1187_v41 = vsel %vm1184_vm9, %v1170_v15, %v1023_v58  ;;  %v1121_v58 = vsel %vm1116_vm6, %v1104_v1, %v3553_v14 }
 0x226   :  { %2530 = vmatmul.msk.f32.gmra.mxu0 %vm1206_vm10, %v1187_v41 }
 0x22a   :  { %v971_v51 = vpop.permute.xlu1 %970 }
 0x22b   :  { %v907_v63 = vpop.permute.xlu0 %906  ;;  %v973_v9 = vpop.permute.xlu2 %972 }
 0x22c   :  { %v1159_v10 = vsel %vm1150_vm7, %v1142_v30, %v907_v63  ;;  %v1076_v63 = vsel %vm350_vm0, %v3353_v12, %v4769_v33 }
 0x22d   :  { %v1176_v6 = vsel %vm1167_vm8, %v1159_v10, %v971_v51 }
 0x232   :  { %v961_v11 = vpop.permute.xlu1 %960 }
 0x233   :  { %v1171_v39 = vsel %vm1167_vm8, %v1154_v13, %v961_v11  ;;  %v1035_v49 = vpop.permute.xlu0 %1034  ;;  %v1037_v7 = vpop.permute.xlu2 %1036  ;;  %v4772_v11 = vld [vmem:[#allocation13_spill] sm:$0xff] }
 0x234   :  { %v1193_v35 = vsel %vm1184_vm9, %v1176_v6, %v1035_v49  ;;  %v1188_v26 = vsel %vm1184_vm9, %v1171_v39, %v1025_v43  ;;  %v1079_v39 = vsel %vm350_vm0, %v3385_v46, %v4772_v11  ;;  %v4773_v49 = vld [vmem:[#allocation14_spill] sm:$0xff]  ;;  %v4774_v6 = vld [vmem:[#allocation7_spill] sm:$0xff] }
 0x235   :  { %2536 = vmatmul.msk.f32.gmra.mxu2 %vm1206_vm10, %v1193_v35  ;;  %2531 = vmatmul.msk.f32.gmra.mxu0 %vm1206_vm10, %v1188_v26  ;;  %v1071_v35 = vsel %vm350_vm0, %v4774_v6, %v4773_v49  ;;  %v4793_v6 = vld [vmem:[#allocation35_spill] sm:$0xff] }
 0x23a   :  { %v851_v34 = vpop.permute.xlu1 %850 }
 0x23b   :  { %v845_v8 = vpop.permute.xlu0 %844  ;;  %v1027_v54 = vpop.permute.xlu2 %1026  ;;  %v1146_v55 = vsel %vm1133_vm5, %v1129_v45, %v851_v34  ;;  %v4782_v45 = vld [vmem:[#allocation11_spill] sm:$0xff] }
 0x23c   :  { %v1143_v37 = vsel %vm1133_vm5, %v1126_v18, %v845_v8  ;;  %v4776_v18 = vld [vmem:[#allocation29_spill] sm:$0xff] }
 0x23d   :  { %v1160_v36 = vsel %vm1150_vm7, %v1143_v37, %v909_v62  ;;  %v1096_v8 = vsel %vm1082_vm2, %v1079_v39, %v4776_v18  ;;  %v4777_v37 = vld [vmem:[#allocation25_spill] sm:$0xff]  ;;  %v4792_v39 = vld [vmem:[#allocation22_spill] sm:$0xff] }
 0x23e   :  { %v1177_v38 = vsel %vm1167_vm8, %v1160_v36, %v973_v9  ;;  %v1093_v9 = vsel %vm1082_vm2, %v1076_v63, %v4770_v31  ;;  %v4788_v63 = vld [vmem:[#allocation30_spill] sm:$0xff] }
 0x23f   :  { %v1194_v16 = vsel %vm1184_vm9, %v1177_v38, %v1037_v7  ;;  %v1110_v4 = vsel %vm1099_vm3, %v1093_v9, %v3549_v3  ;;  %v4775_v7 = vld [vmem:[#allocation21_spill] sm:$0xff] }
 0x240   :  { %2537 = vmatmul.msk.f32.gmra.mxu2 %vm1206_vm10, %v1194_v16  ;;  %v1127_v28 = vsel %vm1116_vm6, %v1110_v4, %v4771_v40  ;;  %v1088_v34 = vsel %vm1082_vm2, %v1071_v35, %v4775_v7  ;;  %v4778_v38 = vld [vmem:[#allocation33_spill] sm:$0xff]  ;;  %v4789_v4 = vld [vmem:[#allocation38_spill] sm:$0xff] }
 0x241   :  { %v1105_v36 = vsel %vm1099_vm3, %v1088_v34, %v4777_v37  ;;  %v1113_v16 = vsel %vm1099_vm3, %v1096_v8, %v4778_v38 }
 0x242   :  { %v835_v42 = vpop.permute.xlu1 %834 }
 0x243   :  { %v915_v43 = vpop.permute.xlu0 %914  ;;  %v911_v32 = vpop.permute.xlu2 %910  ;;  %v1138_v17 = vsel %vm1133_vm5, %v1121_v58, %v835_v42  ;;  %v4780_v42 = vld [vmem:[#allocation37_spill] sm:$0xff]  ;;  %v4781_v58 = vld [vmem:[#allocation19_spill] sm:$0xff] }
 0x244   :  { %v1163_v62 = vsel %vm1150_vm7, %v1146_v55, %v915_v43  ;;  %v1122_v43 = vsel %vm1116_vm6, %v1105_v36, %v4780_v42  ;;  %v1080_v55 = vsel %vm350_vm0, %v4782_v45, %v4781_v58 }
 0x24a   :  { %v899_v44 = vpop.permute.xlu1 %898 }
 0x24b   :  { %v979_v53 = vpop.permute.xlu0 %978  ;;  %v1155_v0 = vsel %vm1150_vm7, %v1138_v17, %v899_v44  ;;  %v975_v51 = vpop.permute.xlu2 %974 }
 0x24c   :  { %v1180_v41 = vsel %vm1167_vm8, %v1163_v62, %v979_v53  ;;  %v4783_v62 = vld [vmem:[#allocation17_spill] sm:$0xff] }
 0x252   :  { %v963_v15 = vpop.permute.xlu1 %962 }
 0x253   :  { %v1172_v47 = vsel %vm1167_vm8, %v1155_v0, %v963_v15  ;;  %v1043_v21 = vpop.permute.xlu0 %1042  ;;  %v1039_v30 = vpop.permute.xlu2 %1038  ;;  %v4784_v0 = vld [vmem:[#allocation9_spill] sm:$0xff] }
 0x254   :  { %v1197_v14 = vsel %vm1184_vm9, %v1180_v41, %v1043_v21  ;;  %v1189_v50 = vsel %vm1184_vm9, %v1172_v47, %v1027_v54  ;;  %v4779_v54 = vld [vmem:[#allocation36_spill] sm:$0xff]  ;;  %v1077_v15 = vsel %vm350_vm0, %v4784_v0, %v4783_v62  ;;  %v4785_v41 = vld [vmem:[#allocation27_spill] sm:$0xff] }
 0x255   :  { %2540 = vmatmul.msk.f32.vlgmr.msra.gmra.mxu3 %vm1206_vm10, %v1197_v14  ;;  %2532 = vmatmul.msk.f32.gmra.mxu0 %vm1206_vm10, %v1189_v50  ;;  %v1130_v46 = vsel %vm1116_vm6, %v1113_v16, %v4779_v54  ;;  %v1097_v47 = vsel %vm1082_vm2, %v1080_v55, %v4785_v41  ;;  %v4787_v50 = vld [vmem:[#allocation32_spill] sm:$0xff] }
 0x256   :  { %v1114_v33 = vsel %vm1099_vm3, %v1097_v47, %v4787_v50 }
 0x257   :  { %v1131_v9 = vsel %vm1116_vm6, %v1114_v33, %v3649_v25 }
 0x25a   :  { %v853_v24 = vpop.permute.xlu1 %852 }
 0x25b   :  { %v847_v22 = vpop.permute.xlu0 %846  ;;  %v1029_v26 = vpop.permute.xlu2 %1028 }
 0x25c   :  { %v1144_v59 = vsel %vm1133_vm5, %v1127_v28, %v847_v22 }
 0x25d   :  { %v1161_v60 = vsel %vm1150_vm7, %v1144_v59, %v911_v32  ;;  %v1147_v32 = vsel %vm1133_vm5, %v1130_v46, %v853_v24 }
 0x25e   :  { %v1178_v52 = vsel %vm1167_vm8, %v1161_v60, %v975_v51  ;;  %v4786_v51 = vld [vmem:[#allocation24_spill] sm:$0xff] }
 0x25f   :  { %v1195_v12 = vsel %vm1184_vm9, %v1178_v52, %v1039_v30  ;;  %v1094_v14 = vsel %vm1082_vm2, %v1077_v15, %v4786_v51 }
 0x260   :  { %2538 = vmatmul.msk.f32.gmra.mxu2 %vm1206_vm10, %v1195_v12  ;;  %v1111_v31 = vsel %vm1099_vm3, %v1094_v14, %v4788_v63 }
 0x261   :  { %v1128_v24 = vsel %vm1116_vm6, %v1111_v31, %v4789_v4 }
 0x262   :  { %v837_v10 = vpop.permute.xlu1 %836 }
 0x263   :  { %v917_v5 = vpop.permute.xlu0 %916  ;;  %v1139_v44 = vsel %vm1133_vm5, %v1122_v43, %v837_v10  ;;  %v913_v29 = vpop.permute.xlu2 %912 }
 0x264   :  { %v1164_v53 = vsel %vm1150_vm7, %v1147_v32, %v917_v5 }
 0x26a   :  { %v901_v13 = vpop.permute.xlu1 %900 }
 0x26b   :  { %v981_v3 = vpop.permute.xlu0 %980  ;;  %v1156_v57 = vsel %vm1150_vm7, %v1139_v44, %v901_v13  ;;  %v983_v48 = vpop.permute.xlu2 %982  ;;  %v4790_v13 = vld [vmem:[#allocation18_spill] sm:$0xff] }
 0x26c   :  { %v1181_v23 = vsel %vm1167_vm8, %v1164_v53, %v981_v3  ;;  %v4791_v3 = vld [vmem:[#allocation12_spill] sm:$0xff] }
 0x26d   :  { %v1081_v11 = vsel %vm350_vm0, %v4791_v3, %v4790_v13 }
 0x26e   :  { %v1098_v49 = vsel %vm1082_vm2, %v1081_v11, %v4792_v39 }
 0x26f   :  { %v1115_v35 = vsel %vm1099_vm3, %v1098_v49, %v4793_v6 }
 0x272   :  { %v965_v2 = vpop.permute.xlu1 %964 }
 0x273   :  { %v1173_v56 = vsel %vm1167_vm8, %v1156_v57, %v965_v2  ;;  %v1045_v19 = vpop.permute.xlu0 %1044  ;;  %v857_v52 = vpop.permute.xlu2 %856 }
 0x274   :  { %v1198_v61 = vsel %vm1184_vm9, %v1181_v23, %v1045_v19  ;;  %v1190_v27 = vsel %vm1184_vm9, %v1173_v56, %v1029_v26  ;;  %v4794_v26 = vld [vmem:[#allocation39_spill] sm:$0xff] }
 0x275   :  { %2541 = vmatmul.msk.f32.gmra.mxu3 %vm1206_vm10, %v1198_v61  ;;  %2533 = vmatmul.msk.f32.gmra.mxu0 %vm1206_vm10, %v1190_v27  ;;  %v1132_v7 = vsel %vm1116_vm6, %v1115_v35, %v4794_v26 }
 0x276   :  { %v1149_v18 = vsel %vm1133_vm5, %v1132_v7, %v857_v52 }
 0x27a   :  { %v855_v20 = vpop.permute.xlu1 %854 }
 0x27b   :  { %v849_v1 = vpop.permute.xlu0 %848  ;;  %v1148_v40 = vsel %vm1133_vm5, %v1131_v9, %v855_v20  ;;  %v1049_v37 = vpop.permute.xlu2 %1048 }
 0x27c   :  { %v1145_v28 = vsel %vm1133_vm5, %v1128_v24, %v849_v1  ;;  %v3911_v54 = vpop.f32.mrf.mxu0 }
 0x27d   :  { %v1162_v59 = vsel %vm1150_vm7, %v1145_v28, %v913_v29  ;;  %v1361_v2 = vmul.f32 %v3911_v54, %v3911_v54  ;;  %v1324_v19 = vsel %vm1082_vm2, %v3911_v54, 0.0 }
 0x282   :  { %v977_v17 = vpop.permute.xlu1 %976 }
 0x283   :  { %v919_v21 = vpop.permute.xlu0 %918  ;;  %v1179_v12 = vsel %vm1167_vm8, %v1162_v59, %v977_v17 }
 0x284   :  { %v1165_v22 = vsel %vm1150_vm7, %v1148_v40, %v919_v21 }
 0x285   :  { %v1182_v30 = vsel %vm1167_vm8, %v1165_v22, %v983_v48  ;;  %v1377_v48 = vsel %vm1082_vm2, %v1361_v2, 0.0 }
 0x28a   :  { %v1047_v60 = vpop.permute.xlu1 %1046 }
 0x28b   :  { %v1041_v10 = vpop.permute.xlu0 %1040  ;;  %v1199_v25 = vsel %vm1184_vm9, %v1182_v30, %v1047_v60 }
 0x28c   :  { %v1196_v5 = vsel %vm1184_vm9, %v1179_v12, %v1041_v10  ;;  %2542 = vmatmul.msk.f32.gmra.mxu3 %vm1206_vm10, %v1199_v25 }
 0x28d   :  { %2539 = vmatmul.msk.f32.gmra.mxu2 %vm1206_vm10, %v1196_v5 }
 0x28f   :  { %v3919_v32 = vpop.f32.mrf.mxu2 }
 0x290   :  { %v1367_v24 = vmul.f32 %v3919_v32, %v3919_v32  ;;  %v1335_v28 = vsel %vm1082_vm2, %v3919_v32, 0.0 }
 0x292   :  { %v985_v34 = vpop.permute.xlu1 %984  ;;  %v3913_v46 = vpop.f32.mrf.mxu0  ;;  %v1388_v60 = vsel %vm1082_vm2, %v1367_v24, 0.0 }
 0x293   :  { %v921_v8 = vpop.permute.xlu0 %920  ;;  %v1362_v53 = vmul.f32 %v3913_v46, %v3913_v46  ;;  %v1325_v23 = vsel %vm1082_vm2, %v3913_v46, 0.0 }
 0x294   :  { %v1166_v36 = vsel %vm1150_vm7, %v1149_v18, %v921_v8  ;;  %v1326_v20 = vadd.f32 %v1325_v23, %v1324_v19 }
 0x295   :  { %v1183_v38 = vsel %vm1167_vm8, %v1166_v36, %v985_v34  ;;  %v1378_v61 = vsel %vm1082_vm2, %v1362_v53, 0.0 }
 0x296   :  { %v1200_v16 = vsel %vm1184_vm9, %v1183_v38, %v1049_v37  ;;  %v1379_v17 = vadd.f32 %v1378_v61, %v1377_v48 }
 0x297   :  { %2543 = vmatmul.msk.f32.gmra.mxu3 %vm1206_vm10, %v1200_v16 }
 0x2a1   :  { %v3925_v57 = vpop.f32.mrf.mxu2 }
 0x2a2   :  { %v1368_v30 = vmul.f32 %v3925_v57, %v3925_v57  ;;  %v1337_v10 = vsel %vm1082_vm2, %v3925_v57, 0.0 }
 0x2a3   :  { %v3915_v42 = vpop.f32.mrf.mxu0 }
 0x2a4   :  { %v1363_v56 = vmul.f32 %v3915_v42, %v3915_v42  ;;  %v1327_v27 = vsel %vm1082_vm2, %v3915_v42, 0.0  ;;  %v1390_v5 = vsel %vm1082_vm2, %v1368_v30, 0.0 }
 0x2a5   :  { %v1328_v62 = vadd.f32 %v1327_v27, %v1326_v20 }
 0x2a6   :  { %v1380_v58 = vsel %vm1082_vm2, %v1363_v56, 0.0 }
 0x2a7   :  { %v1381_v47 = vadd.f32 %v1380_v58, %v1379_v17 }
 0x2b2   :  { %v3917_v43 = vpop.f32.mrf.mxu0 }
 0x2b3   :  { %v1364_v29 = vmul.f32 %v3917_v43, %v3917_v43  ;;  %v1329_v45 = vsel %vm1082_vm2, %v3917_v43, 0.0 }
 0x2b4   :  { %v1330_v21 = vadd.f32 %v1329_v45, %v1328_v62 }
 0x2b5   :  { %v1382_v0 = vsel %vm1082_vm2, %v1364_v29, 0.0 }
 0x2b6   :  { %v1383_v33 = vadd.f32 %v1382_v0, %v1381_v47 }
 0x2b8   :  { %v3953_v51 = vpop.f32.mrf.mxu2 }
 0x2b9   :  { %v1369_v13 = vmul.f32 %v3953_v51, %v3953_v51  ;;  %v1339_v11 = vsel %vm1082_vm2, %v3953_v51, 0.0 }
 0x2bb   :  { %v1392_v6 = vsel %vm1082_vm2, %v1369_v13, 0.0 }
 0x2c3   :  { %v3963_v22 = vpop.f32.mrf.mxu2 }
 0x2c4   :  { %v1370_v35 = vmul.f32 %v3963_v22, %v3963_v22  ;;  %v1341_v34 = vsel %vm1082_vm2, %v3963_v22, 0.0 }
 0x2c6   :  { %v1394_v8 = vsel %vm1082_vm2, %v1370_v35, 0.0 }
 0x2d2   :  { %v3921_v44 = vpop.f32.mrf.mxu0 }
 0x2d3   :  { %v1365_v55 = vmul.f32 %v3921_v44, %v3921_v44  ;;  %v1331_v15 = vsel %vm1082_vm2, %v3921_v44, 0.0 }
 0x2d4   :  { %v1332_v63 = vadd.f32 %v1331_v15, %v1330_v21 }
 0x2d5   :  { %v1384_v14 = vsel %vm1082_vm2, %v1365_v55, 0.0 }
 0x2d6   :  { %v1385_v9 = vadd.f32 %v1384_v14, %v1383_v33 }
 0x2d8   :  { %v3968_v52 = vpop.f32.mrf.mxu3 }
 0x2d9   :  { %v1373_v2 = vmul.f32 %v3968_v52, %v3968_v52  ;;  %v1347_v20 = vsel %vm1082_vm2, %v3968_v52, 0.0 }
 0x2db   :  { %v1400_v17 = vsel %vm1082_vm2, %v1373_v2, 0.0 }
 0x2e3   :  { %v3977_v39 = vpop.f32.mrf.mxu2 }
 0x2e4   :  { %v1371_v37 = vmul.f32 %v3977_v39, %v3977_v39  ;;  %v1343_v38 = vsel %vm1082_vm2, %v3977_v39, 0.0 }
 0x2e6   :  { %v1396_v23 = vsel %vm1082_vm2, %v1371_v37, 0.0 }
 0x2f2   :  { %v3940_v1 = vpop.f32.mrf.mxu0 }
 0x2f3   :  { %v1366_v41 = vmul.f32 %v3940_v1, %v3940_v1  ;;  %v1333_v50 = vsel %vm1082_vm2, %v3940_v1, 0.0 }
 0x2f4   :  { %v1334_v4 = vadd.f32 %v1333_v50, %v1332_v63 }
 0x2f5   :  { %v1386_v31 = vsel %vm1082_vm2, %v1366_v41, 0.0 }
 0x2f6   :  { %v1387_v40 = vadd.f32 %v1386_v31, %v1385_v9  ;;  %v1336_v59 = vadd.f32 %v1335_v28, %v1334_v4 }
 0x2f8   :  { %v1389_v12 = vadd.f32 %v1388_v60, %v1387_v40  ;;  %v1338_v25 = vadd.f32 %v1337_v10, %v1336_v59  ;;  %v3982_v26 = vpop.f32.mrf.mxu3 }
 0x2f9   :  { %v1374_v48 = vmul.f32 %v3982_v26, %v3982_v26  ;;  %v1349_v62 = vsel %vm1082_vm2, %v3982_v26, 0.0 }
 0x2fa   :  { %v1391_v3 = vadd.f32 %v1390_v5, %v1389_v12  ;;  %v1340_v49 = vadd.f32 %v1339_v11, %v1338_v25 }
 0x2fb   :  { %v1402_v41 = vsel %vm1082_vm2, %v1374_v48, 0.0 }
 0x2fc   :  { %v1393_v7 = vadd.f32 %v1392_v6, %v1391_v3  ;;  %v1342_v18 = vadd.f32 %v1341_v34, %v1340_v49  ;;  %v4795_v6 = vmov 0.0  }
 0x2fd   :  { %1588 = vst.msk [vmem:[#allocation3 + $0x128] sm:$0x3] %vm1551_vm11, %v4795_v6 }
 0x2fe   :  { %v1395_v36 = vadd.f32 %v1394_v8, %v1393_v7  ;;  %v1344_v53 = vadd.f32 %v1343_v38, %v1342_v18  ;;  %1552 = vst.msk [vmem:[#allocation3 + $0x8] sm:$0x3] %vm1551_vm11, %v4795_v6 }
 0x2ff   :  { %1554 = vst.msk [vmem:[#allocation3 + $0x18] sm:$0x3] %vm1551_vm11, %v4795_v6 }
 0x300   :  { %v1397_v27 = vadd.f32 %v1396_v23, %v1395_v36  ;;  %1556 = vst.msk [vmem:[#allocation3 + $0x28] sm:$0x3] %vm1551_vm11, %v4795_v6 }
 0x301   :  { %1558 = vst.msk [vmem:[#allocation3 + $0x38] sm:$0x3] %vm1551_vm11, %v4795_v6 }
 0x302   :  { %1560 = vst.msk [vmem:[#allocation3 + $0x48] sm:$0x3] %vm1551_vm11, %v4795_v6 }
 0x303   :  { %1562 = vst.msk [vmem:[#allocation3 + $0x58] sm:$0x3] %vm1551_vm11, %v4795_v6 }
 0x304   :  { %1564 = vst.msk [vmem:[#allocation3 + $0x68] sm:$0x3] %vm1551_vm11, %v4795_v6 }
 0x305   :  { %1566 = vst.msk [vmem:[#allocation3 + $0x78] sm:$0x3] %vm1551_vm11, %v4795_v6  ;;  %v1624_v36 = vld [vmem:[#allocation3 + $0x1] sm:$0xff] }
 0x306   :  { %1568 = vst.msk [vmem:[#allocation3 + $0x88] sm:$0x3] %vm1551_vm11, %v4795_v6  ;;  %1769 = vrot.lane.b32.xlu0 %v1624_v36, %s2626_s15 }
 0x307   :  { %1570 = vst.msk [vmem:[#allocation3 + $0x98] sm:$0x3] %vm1551_vm11, %v4795_v6 }
 0x308   :  { %1572 = vst.msk [vmem:[#allocation3 + $0xa8] sm:$0x3] %vm1551_vm11, %v4795_v6 }
 0x309   :  { %1574 = vst.msk [vmem:[#allocation3 + $0xb8] sm:$0x3] %vm1551_vm11, %v4795_v6 }
 0x30a   :  { %1576 = vst.msk [vmem:[#allocation3 + $0xc8] sm:$0x3] %vm1551_vm11, %v4795_v6 }
 0x30b   :  { %1578 = vst.msk [vmem:[#allocation3 + $0xd8] sm:$0x3] %vm1551_vm11, %v4795_v6 }
 0x30c   :  { %1580 = vst.msk [vmem:[#allocation3 + $0xe8] sm:$0x3] %vm1551_vm11, %v4795_v6 }
 0x30d   :  { %1582 = vst.msk [vmem:[#allocation3 + $0xf8] sm:$0x3] %vm1551_vm11, %v4795_v6 }
 0x30e   :  { %1584 = vst.msk [vmem:[#allocation3 + $0x108] sm:$0x3] %vm1551_vm11, %v4795_v6 }
 0x30f   :  { %v4000_v29 = vpop.f32.mrf.mxu3  ;;  %1586 = vst.msk [vmem:[#allocation3 + $0x118] sm:$0x3] %vm1551_vm11, %v4795_v6  ;;  %v1632_v2 = vld [vmem:[#allocation3 + $0xa1] sm:$0xff] }
 0x310   :  { %v3991_v16 = vpop.f32.mrf.mxu2  ;;  %v1375_v47 = vmul.f32 %v4000_v29, %v4000_v29  ;;  %v1351_v14 = vsel %vm1082_vm2, %v4000_v29, 0.0  ;;  %1590 = vst.msk [vmem:[#allocation3 + $0x138] sm:$0x3] %vm1551_vm11, %v4795_v6  ;;  %1785 = vrot.lane.b32.xlu2 %v1632_v2, %s2626_s15 }
 0x311   :  { %v1345_v56 = vsel %vm1082_vm2, %v3991_v16, 0.0  ;;  %v1372_v19 = vmul.f32 %v3991_v16, %v3991_v16 }
 0x312   :  { %v1346_v61 = vadd.f32 %v1345_v56, %v1344_v53  ;;  %v1404_v63 = vsel %vm1082_vm2, %v1375_v47, 0.0 }
 0x313   :  { %v1398_v58 = vsel %vm1082_vm2, %v1372_v19, 0.0 }
 0x314   :  { %v1348_v45 = vadd.f32 %v1347_v20, %v1346_v61  ;;  %v1399_v55 = vadd.f32 %v1398_v58, %v1397_v27 }
 0x316   :  { %v1401_v0 = vadd.f32 %v1400_v17, %v1399_v55  ;;  %v1350_v15 = vadd.f32 %v1349_v62, %v1348_v45 }
 0x318   :  { %v1403_v21 = vadd.f32 %v1402_v41, %v1401_v0  ;;  %v1352_v50 = vadd.f32 %v1351_v14, %v1350_v15 }
 0x31a   :  { %v4015_v33 = vpop.f32.mrf.mxu3  ;;  %v1405_v4 = vadd.f32 %v1404_v63, %v1403_v21 }
 0x31b   :  { %v1353_v31 = vsel %vm1082_vm2, %v4015_v33, 0.0  ;;  %v1376_v9 = vmul.f32 %v4015_v33, %v4015_v33 }
 0x31c   :  { %v1354_v24 = vadd.f32 %v1353_v31, %v1352_v50 }
 0x31d   :  { %v1406_v40 = vsel %vm1082_vm2, %v1376_v9, 0.0 }
 0x31e   :  { %v1355_v28 = vrot.slane %v1354_v24, 4  ;;  %v1407_v59 = vadd.f32 %v1406_v40, %v1405_v4 }
 0x320   :  { %v1356_v60 = vadd.f32 %v1355_v28, %v1354_v24  ;;  %v1408_v30 = vrot.slane %v1407_v59, 4 }
 0x322   :  { %v1357_v12 = vrot.slane %v1356_v60, 2  ;;  %v1409_v10 = vadd.f32 %v1408_v30, %v1407_v59 }
 0x324   :  { %v1358_v25 = vadd.f32 %v1357_v12, %v1356_v60  ;;  %v1410_v5 = vrot.slane %v1409_v10, 2 }
 0x326   :  { %v1359_v13 = vrot.slane %v1358_v25, 1  ;;  %v1411_v3 = vadd.f32 %v1410_v5, %v1409_v10 }
 0x328   :  { %v1360_v11 = vadd.f32 %v1359_v13, %v1358_v25  ;;  %v1412_v49 = vrot.slane %v1411_v3, 1 }
 0x32a   :  { %v1413_v35 = vadd.f32 %v1412_v49, %v1411_v3  ;;  %v4027_v7 = vmul.f32 0.0078125, %v1360_v11 }
 0x32c   :  { %v1415_v34 = vmul.f32 0.0078125, %v1413_v35  ;;  %v1416_v18 = vmul.f32 %v4027_v7, %v4027_v7  ;;  %v1434_v61 = vsub.f32 %v4015_v33, %v4027_v7  ;;  %v1421_v20 = vsub.f32 %v3915_v42, %v4027_v7 }
 0x32d   :  { %v1420_v48 = vsub.f32 %v3913_v46, %v4027_v7  ;;  %v1419_v58 = vsub.f32 %v3911_v54, %v4027_v7  ;;  %v1424_v45 = vsub.f32 %v3940_v1, %v4027_v7  ;;  %v1423_v55 = vsub.f32 %v3921_v44, %v4027_v7  ;;  %v4090_v54 = vld [vmem:[%s4715_s3] ss:$0 sm:$0xff] }
 0x32e   :  { %v1417_v8 = vsub.f32 %v1415_v34, %v1416_v18  ;;  %v1422_v17 = vsub.f32 %v3917_v43, %v4027_v7  ;;  %v1427_v42 = vsub.f32 %v3953_v51, %v4027_v7  ;;  %v1429_v46 = vsub.f32 %v3977_v39, %v4027_v7 }
 0x32f   :  { %v1425_v44 = vsub.f32 %v3919_v32, %v4027_v7  ;;  %v1430_v43 = vsub.f32 %v3991_v16, %v4027_v7  ;;  %v1432_v1 = vsub.f32 %v3982_v26, %v4027_v7  ;;  %v1428_v51 = vsub.f32 %v3963_v22, %v4027_v7  ;;  %v4112_v26 = vld [vmem:[%s4716_s4] ss:$0 sm:$0xff]  ;;  %s2633_s4 = smov 40  }
 0x330   :  { %v1418_v37 = vmax.f32 %v1417_v8, 0.0  ;;  %v1433_v39 = vsub.f32 %v4000_v29, %v4027_v7  ;;  %v1431_v15 = vsub.f32 %v3968_v52, %v4027_v7  ;;  %v1426_v32 = vsub.f32 %v3925_v57, %v4027_v7 }
 0x332   :  { %v1435_v38 = vadd.f32 1e-05, %v1418_v37 }
 0x334   :  { %2592 = vrsqrt.f32 %v1435_v38  ;;  %vm1442_vm13 = vweird.f32 %v1435_v38 }
 0x33a   :  { %v2593_v53 = vpop.eup %2592 }
 0x33b   :  { %v1437_v23 = vmul.f32 %v2593_v53, %v1435_v38  ;;  %vm1443_vm12 = vweird.f32 %v2593_v53 }
 0x33c   :  { %vm1444_vm14 = vmor %vm1442_vm13, %vm1443_vm12 }
 0x33d   :  { %v1438_v56 = vmul.f32 %v2593_v53, %v1437_v23 }
 0x33f   :  { %v1439_v19 = vmul.f32 0.5, %v1438_v56 }
 0x341   :  { %v1440_v27 = vsub.f32 1.5, %v1439_v19 }
 0x343   :  { %v1441_v62 = vmul.f32 %v2593_v53, %v1440_v27 }
 0x345   :  { %v4100_v0 = vsel %vm1444_vm14, %v2593_v53, %v1441_v62 }
 0x346   :  { %v1461_v41 = vmul.f32 %v4100_v0, %v1434_v61  ;;  %v1448_v22 = vmul.f32 %v4100_v0, %v1421_v20  ;;  %v1447_v16 = vmul.f32 %v4100_v0, %v1420_v48  ;;  %v1446_v47 = vmul.f32 %v4100_v0, %v1419_v58 }
 0x347   :  { %v1451_v21 = vmul.f32 %v4100_v0, %v1424_v45  ;;  %v1450_v14 = vmul.f32 %v4100_v0, %v1423_v55  ;;  %v1449_v50 = vmul.f32 %v4100_v0, %v1422_v17  ;;  %v1454_v33 = vmul.f32 %v4100_v0, %v1427_v42 }
 0x348   :  { %v1481_v63 = vmul.f32 %v4090_v54, %v1461_v41  ;;  %v1468_v31 = vmul.f32 %v4090_v54, %v1448_v22  ;;  %v1467_v9 = vmul.f32 %v4090_v54, %v1447_v16  ;;  %v1466_v4 = vmul.f32 %v4090_v54, %v1446_v47 }
 0x349   :  { %v1471_v24 = vmul.f32 %v4090_v54, %v1451_v21  ;;  %v1470_v40 = vmul.f32 %v4090_v54, %v1450_v14  ;;  %v1469_v28 = vmul.f32 %v4090_v54, %v1449_v50  ;;  %v1474_v59 = vmul.f32 %v4090_v54, %v1454_v33 }
 0x34a   :  { %v1501_v60 = vadd.f32 %v4112_v26, %v1481_v63  ;;  %v1488_v30 = vadd.f32 %v4112_v26, %v1468_v31  ;;  %v1487_v12 = vadd.f32 %v4112_v26, %v1467_v9  ;;  %v1486_v10 = vadd.f32 %v4112_v26, %v1466_v4 }
 0x34b   :  { %v1491_v25 = vadd.f32 %v4112_v26, %v1471_v24  ;;  %v1490_v5 = vadd.f32 %v4112_v26, %v1470_v40  ;;  %v1489_v13 = vadd.f32 %v4112_v26, %v1469_v28  ;;  %v1494_v3 = vadd.f32 %v4112_v26, %v1474_v59 }
 0x34c   :  { %vm1517_vm15 = vcmp.gt.f32.partialorder %v1501_v60, 0.0  ;;  %v1533_v11 = vmul.f32 0.2, %v1501_v60  ;;  %vm1504_vm0 = vcmp.gt.f32.partialorder %v1488_v30, 0.0  ;;  %v1520_v49 = vmul.f32 0.2, %v1488_v30 }
 0x34d   :  { %vm1503_vm1 = vcmp.gt.f32.partialorder %v1487_v12, 0.0  ;;  %v1519_v6 = vmul.f32 0.2, %v1487_v12  ;;  %vm1502_vm3 = vcmp.gt.f32.partialorder %v1486_v10, 0.0  ;;  %v1518_v35 = vmul.f32 0.2, %v1486_v10 }
 0x34e   :  { %v1549_v34 = vsel %vm1517_vm15, %v1501_v60, %v1533_v11  ;;  %v1536_v18 = vsel %vm1504_vm0, %v1488_v30, %v1520_v49  ;;  %vm1507_vm4 = vcmp.gt.f32.partialorder %v1491_v25, 0.0  ;;  %v1523_v8 = vmul.f32 0.2, %v1491_v25 }
 0x34f   :  { %1607 = vst.msk [vmem:[#allocation3 + $0x121] sm:$0xff] %vm1082_vm2, %v1549_v34  ;;  %v1535_v37 = vsel %vm1503_vm1, %v1487_v12, %v1519_v6  ;;  %v1534_v36 = vsel %vm1502_vm3, %v1486_v10, %v1518_v35  ;;  %vm1506_vm5 = vcmp.gt.f32.partialorder %v1490_v5, 0.0  ;;  %v1522_v38 = vmul.f32 0.2, %v1490_v5 }
 0x350   :  { %1594 = vst.msk [vmem:[#allocation3 + $0x31] sm:$0xff] %vm1082_vm2, %v1536_v18  ;;  %v1539_v53 = vsel %vm1507_vm4, %v1491_v25, %v1523_v8  ;;  %vm1505_vm8 = vcmp.gt.f32.partialorder %v1489_v13, 0.0  ;;  %v1521_v2 = vmul.f32 0.2, %v1489_v13  ;;  %vm1510_vm10 = vcmp.gt.f32.partialorder %v1494_v3, 0.0 }
 0x351   :  { %1593 = vst.msk [vmem:[#allocation3 + $0x21] sm:$0xff] %vm1082_vm2, %v1535_v37  ;;  %v1538_v23 = vsel %vm1506_vm5, %v1490_v5, %v1522_v38  ;;  %v1526_v56 = vmul.f32 0.2, %v1494_v3  ;;  %v1456_v19 = vmul.f32 %v4100_v0, %v1429_v46  ;;  %v1452_v61 = vmul.f32 %v4100_v0, %v1425_v44 }
 0x352   :  { %1592 = vst.msk [vmem:[#allocation3 + $0x11] sm:$0xff] %vm1082_vm2, %v1534_v36  ;;  %v1537_v27 = vsel %vm1505_vm8, %v1489_v13, %v1521_v2  ;;  %v1457_v20 = vmul.f32 %v4100_v0, %v1430_v43  ;;  %v1459_v48 = vmul.f32 %v4100_v0, %v1432_v1  ;;  %v1455_v58 = vmul.f32 %v4100_v0, %v1428_v51  ;;  %v1640_v36 = vld [vmem:[#allocation3 + $0x2] sm:$0xff] }
 0x353   :  { %1597 = vst.msk [vmem:[#allocation3 + $0x61] sm:$0xff] %vm1082_vm2, %v1539_v53  ;;  %v1542_v45 = vsel %vm1510_vm10, %v1494_v3, %v1526_v56  ;;  %v1476_v55 = vmul.f32 %v4090_v54, %v1456_v19  ;;  %v1472_v17 = vmul.f32 %v4090_v54, %v1452_v61  ;;  %v1460_v62 = vmul.f32 %v4100_v0, %v1433_v39  ;;  %v1648_v56 = vld [vmem:[#allocation3 + $0xa2] sm:$0xff] }
 0x354   :  { %1596 = vst.msk [vmem:[#allocation3 + $0x51] sm:$0xff] %vm1082_vm2, %v1538_v23  ;;  %v1477_v42 = vmul.f32 %v4090_v54, %v1457_v20  ;;  %v1479_v46 = vmul.f32 %v4090_v54, %v1459_v48  ;;  %v1475_v44 = vmul.f32 %v4090_v54, %v1455_v58  ;;  %v1458_v43 = vmul.f32 %v4100_v0, %v1431_v15 }
 0x355   :  { %1595 = vst.msk [vmem:[#allocation3 + $0x41] sm:$0xff] %vm1082_vm2, %v1537_v27  ;;  %v1496_v1 = vadd.f32 %v4112_v26, %v1476_v55  ;;  %v1492_v29 = vadd.f32 %v4112_v26, %v1472_v17  ;;  %v1480_v51 = vmul.f32 %v4090_v54, %v1460_v62  ;;  %v1453_v39 = vmul.f32 %v4100_v0, %v1426_v32 }
 0x356   :  { %1600 = vst.msk [vmem:[#allocation3 + $0xb1] sm:$0xff] %vm1082_vm2, %v1542_v45  ;;  %v1497_v41 = vadd.f32 %v4112_v26, %v1477_v42  ;;  %v1499_v52 = vadd.f32 %v4112_v26, %v1479_v46  ;;  %v1495_v15 = vadd.f32 %v4112_v26, %v1475_v44  ;;  %v1478_v22 = vmul.f32 %v4090_v54, %v1458_v43  ;;  %v1687_v43 = vld [vmem:[#allocation3 + $0x121] sm:$0xff] }
 0x357   :  { %v1627_v16 = vld [vmem:[#allocation3 + $0x31] sm:$0xff]  ;;  %vm1512_vm11 = vcmp.gt.f32.partialorder %v1496_v1, 0.0  ;;  %v1528_v47 = vmul.f32 0.2, %v1496_v1  ;;  %vm1508_vm12 = vcmp.gt.f32.partialorder %v1492_v29, 0.0  ;;  %v1500_v21 = vadd.f32 %v4112_v26, %v1480_v51  ;;  %v1703_v51 = vld [vmem:[#allocation3 + $0x122] sm:$0xff] }
 0x358   :  { %1775 = vrot.lane.b32.xlu0 %v1627_v16, %s2626_s15  ;;  %v1626_v57 = vld [vmem:[#allocation3 + $0x21] sm:$0xff]  ;;  %v1524_v7 = vmul.f32 0.2, %v1492_v29  ;;  %vm1513_vm13 = vcmp.gt.f32.partialorder %v1497_v41, 0.0  ;;  %v1529_v0 = vmul.f32 0.2, %v1497_v41  ;;  %v1498_v32 = vadd.f32 %v4112_v26, %v1478_v22 }
 0x359   :  { %1773 = vrot.lane.b32.xlu2 %v1626_v57, %s2626_s15  ;;  %v1625_v14 = vld [vmem:[#allocation3 + $0x11] sm:$0xff]  ;;  %v1544_v50 = vsel %vm1512_vm11, %v1496_v1, %v1528_v47  ;;  %vm1515_vm14 = vcmp.gt.f32.partialorder %v1499_v52, 0.0  ;;  %v1531_v33 = vmul.f32 0.2, %v1499_v52  ;;  %vm1511_vm15 = vcmp.gt.f32.partialorder %v1495_v15, 0.0  ;;  %v4238_v37 = vld [vmem:[#allocation3 + $0x22] sm:$0xff] }
 0x35a   :  { %1771 = vrot.lane.b32.xlu1 %v1625_v14, %s2626_s15  ;;  %1602 = vst.msk [vmem:[#allocation3 + $0xd1] sm:$0xff] %vm1082_vm2, %v1544_v50  ;;  %v1540_v63 = vsel %vm1508_vm12, %v1492_v29, %v1524_v7  ;;  %v1545_v31 = vsel %vm1513_vm13, %v1497_v41, %v1529_v0  ;;  %v1527_v9 = vmul.f32 0.2, %v1495_v15  ;;  %vm1516_vm0 = vcmp.gt.f32.partialorder %v1500_v21, 0.0  ;;  %v4187_v10 = vld [vmem:[#allocation3 + $0x61] sm:$0xff]  ;;  %v4230_v18 = vld [vmem:[#allocation3 + $0x12] sm:$0xff] }
 0x35b   :  { %1598 = vst.msk [vmem:[#allocation3 + $0x71] sm:$0xff] %vm1082_vm2, %v1540_v63  ;;  %v1547_v4 = vsel %vm1515_vm14, %v1499_v52, %v1531_v33  ;;  %v1532_v24 = vmul.f32 0.2, %v1500_v21  ;;  %vm1514_vm1 = vcmp.gt.f32.partialorder %v1498_v32, 0.0  ;;  %v1473_v40 = vmul.f32 %v4090_v54, %v1453_v39  ;;  %v4192_v54 = vld [vmem:[#allocation3 + $0x51] sm:$0xff]  ;;  %v4264_v61 = vld [vmem:[#allocation3 + $0x62] sm:$0xff] }
 0x35c   :  { %1603 = vst.msk [vmem:[#allocation3 + $0xe1] sm:$0xff] %vm1082_vm2, %v1545_v31  ;;  %v1543_v28 = vsel %vm1511_vm15, %v1495_v15, %v1527_v9  ;;  %v1530_v59 = vmul.f32 0.2, %v1498_v32  ;;  %v4242_v38 = vld [vmem:[#allocation3 + $0x42] sm:$0xff]  ;;  %v4247_v53 = vld [vmem:[#allocation3 + $0x52] sm:$0xff]  ;;  %vm2346_vm4 = vcmask 392192  }
 0x35d   :  { %1605 = vst.msk [vmem:[#allocation3 + $0x101] sm:$0xff] %vm1082_vm2, %v1547_v4  ;;  %v1548_v60 = vsel %vm1516_vm0, %v1500_v21, %v1532_v24  ;;  %v1493_v30 = vadd.f32 %v4112_v26, %v1473_v40  ;;  %v4197_v26 = vld [vmem:[#allocation3 + $0x41] sm:$0xff]  ;;  %v4202_v13 = vld [vmem:[#allocation3 + $0xb1] sm:$0xff]  ;;  %vm2363_vm5 = vcmask 457728   ;;  %vm2380_vm8 = vcmask 523264  }
 0x35e   :  { %1601 = vst.msk [vmem:[#allocation3 + $0xc1] sm:$0xff] %vm1082_vm2, %v1543_v28  ;;  %v1546_v12 = vsel %vm1514_vm1, %v1498_v32, %v1530_v59  ;;  %v4255_v23 = vld [vmem:[#allocation3 + $0x32] sm:$0xff]  ;;  %v4289_v17 = vld [vmem:[#allocation3 + $0x20] sm:$0xff]  ;;  %vm2398_vm10 = vcmask 588800  }
 0x35f   :  { %1606 = vst.msk [vmem:[#allocation3 + $0x111] sm:$0xff] %vm1082_vm2, %v1548_v60  ;;  %vm1509_vm3 = vcmp.gt.f32.partialorder %v1493_v30, 0.0  ;;  %v1525_v25 = vmul.f32 0.2, %v1493_v30  ;;  %v4276_v48 = vld [vmem:[#allocation3 + $0xb2] sm:$0xff]  ;;  %v4293_v62 = vld [vmem:[#allocation3 + $0x40] sm:$0xff] }
 0x360   :  { %1781 = vrot.lane.b32.xlu0 %v4187_v10, %s2626_s15  ;;  %1604 = vst.msk [vmem:[#allocation3 + $0xf1] sm:$0xff] %vm1082_vm2, %v1546_v12  ;;  %v1656_v45 = vld [vmem:[#allocation3 + $0x10] sm:$0xff]  ;;  %v1671_v41 = vld [vmem:[#allocation3 + $0x120] sm:$0xff] }
 0x361   :  { %1779 = vrot.lane.b32.xlu2 %v4192_v54, %s2626_s15  ;;  %v1541_v5 = vsel %vm1509_vm3, %v1493_v30, %v1525_v25  ;;  %v4206_v3 = vld [vmem:[#allocation3 + $0xd1] sm:$0xff] }
 0x362   :  { %1777 = vrot.lane.b32.xlu1 %v4197_v26, %s2626_s15  ;;  %1599 = vst.msk [vmem:[#allocation3 + $0x81] sm:$0xff] %vm1082_vm2, %v1541_v5  ;;  %v4210_v11 = vld [vmem:[#allocation3 + $0x71] sm:$0xff] }
 0x363   :  { %v4214_v49 = vld [vmem:[#allocation3 + $0xe1] sm:$0xff]  ;;  %v4251_v2 = vld [vmem:[#allocation3 + $0x72] sm:$0xff] }
 0x364   :  { %v4218_v6 = vld [vmem:[#allocation3 + $0x101] sm:$0xff]  ;;  %v4268_v27 = vld [vmem:[#allocation3 + $0xd2] sm:$0xff] }
 0x365   :  { %v4222_v35 = vld [vmem:[#allocation3 + $0xc1] sm:$0xff]  ;;  %v4300_v44 = vld [vmem:[#allocation3 + $0x50] sm:$0xff] }
 0x366   :  { %v4226_v34 = vld [vmem:[#allocation3 + $0x111] sm:$0xff]  ;;  %v4260_v19 = vld [vmem:[#allocation3 + $0xc2] sm:$0xff] }
 0x367   :  { %v4234_v8 = vld [vmem:[#allocation3 + $0xf1] sm:$0xff]  ;;  %v4280_v58 = vld [vmem:[#allocation3 + $0x102] sm:$0xff] }
 0x368   :  { %1787 = vrot.lane.b32.xlu0 %v4202_v13, %s2626_s15  ;;  %v4272_v20 = vld [vmem:[#allocation3 + $0xf2] sm:$0xff]  ;;  %v4285_v55 = vld [vmem:[#allocation3 + $0xe2] sm:$0xff] }
 0x369   :  { %1791 = vrot.lane.b32.xlu2 %v4206_v3, %s2626_s15  ;;  %v1655_v42 = vld [vmem:[#allocation3 + $0x112] sm:$0xff]  ;;  %v1669_v57 = vld [vmem:[#allocation3 + $0x100] sm:$0xff] }
 0x36a   :  { %1783 = vrot.lane.b32.xlu1 %v4210_v11, %s2626_s15  ;;  %v4297_v46 = vpop.permute.xlu2 %1785  ;;  %v4305_v1 = vld [vmem:[#allocation3 + $0x30] sm:$0xff]  ;;  %v4363_v5 = vld [vmem:[#allocation3 + $0xe0] sm:$0xff] }
 0x36b   :  { %v1670_v39 = vld [vmem:[#allocation3 + $0x110] sm:$0xff] }
 0x36c   :  { %v1736_v15 = vld [vmem:[#allocation3 + $0x131] sm:$0xff] }
 0x36d   :  { %v1752_v22 = vld [vmem:[#allocation3 + $0x132] sm:$0xff] }
 0x36e   :  { %v1720_v16 = vld [vmem:[#allocation3 + $0x130] sm:$0xff] }
 0x36f   :  { %v1668_v4 = vld [vmem:[#allocation3 + $0xf0] sm:$0xff] }
 0x370   :  { %1793 = vrot.lane.b32.xlu0 %v4214_v49, %s2626_s15  ;;  %v4346_v24 = vld [vmem:[#allocation3 + $0xb0] sm:$0xff] }
 0x371   :  { %1797 = vrot.lane.b32.xlu2 %v4218_v6, %s2626_s15  ;;  %v4360_v25 = vld [vmem:[#allocation3 + $0x70] sm:$0xff] }
 0x372   :  { %1789 = vrot.lane.b32.xlu1 %v4222_v35, %s2626_s15 }
 0x378   :  { %1799 = vrot.lane.b32.xlu0 %v4226_v34, %s2626_s15  ;;  %v4317_v47 = vpop.permute.xlu0 %1769 }
 0x379   :  { %1835 = vrot.lane.b32.xlu2 %v4230_v18, %s2628_s16 }
 0x37a   :  { %1795 = vrot.lane.b32.xlu1 %v4234_v8, %s2626_s15 }
 0x380   :  { %1837 = vrot.lane.b32.xlu0 %v4238_v37, %s2628_s16 }
 0x381   :  { %1841 = vrot.lane.b32.xlu2 %v4242_v38, %s2628_s16 }
 0x382   :  { %1833 = vrot.lane.b32.xlu1 %v1640_v36, %s2628_s16 }
 0x388   :  { %1843 = vrot.lane.b32.xlu0 %v4247_v53, %s2628_s16 }
 0x389   :  { %1847 = vrot.lane.b32.xlu2 %v4251_v2, %s2628_s16 }
 0x38a   :  { %1839 = vrot.lane.b32.xlu1 %v4255_v23, %s2628_s16 }
 0x390   :  { %1849 = vrot.lane.b32.xlu0 %v1648_v56, %s2628_s16 }
 0x391   :  { %1853 = vrot.lane.b32.xlu2 %v4260_v19, %s2628_s16 }
 0x392   :  { %1845 = vrot.lane.b32.xlu1 %v4264_v61, %s2628_s16 }
 0x398   :  { %1855 = vrot.lane.b32.xlu0 %v4268_v27, %s2628_s16 }
 0x399   :  { %1859 = vrot.lane.b32.xlu2 %v4272_v20, %s2628_s16 }
 0x39a   :  { %1851 = vrot.lane.b32.xlu1 %v4276_v48, %s2628_s16 }
 0x3a0   :  { %1861 = vrot.lane.b32.xlu0 %v4280_v58, %s2628_s16 }
 0x3a1   :  { %1897 = vrot.lane.b32.xlu2 %v1656_v45, %s2632_s20 }
 0x3a2   :  { %1857 = vrot.lane.b32.xlu1 %v4285_v55, %s2628_s16 }
 0x3a8   :  { %1899 = vrot.lane.b32.xlu0 %v4289_v17, %s2632_s20 }
 0x3a9   :  { %1903 = vrot.lane.b32.xlu2 %v4293_v62, %s2632_s20 }
 0x3aa   :  { %1863 = vrot.lane.b32.xlu1 %v1655_v42, %s2628_s16 }
 0x3b0   :  { %1905 = vrot.lane.b32.xlu0 %v4300_v44, %s2632_s20 }
 0x3b1   :  { %1991 = vrot.lane.b32.xlu2 %v1687_v43, %s2631_s19 }
 0x3b2   :  { %1901 = vrot.lane.b32.xlu1 %v4305_v1, %s2632_s20 }
 0x3b3   :  { %v4309_v29 = vpop.permute.xlu2 %1773 }
 0x3b8   :  { %2055 = vrot.lane.b32.xlu0 %v1703_v51, %s2633_s4 }
 0x3b9   :  { %1925 = vrot.lane.b32.xlu2 %v1670_v39, %s2632_s20 }
 0x3ba   :  { %1927 = vrot.lane.b32.xlu1 %v1671_v41, %s2632_s20 }
 0x3bb   :  { %v4314_v52 = vpop.permute.xlu2 %1779 }
 0x3c0   :  { %2183 = vrot.lane.b32.xlu0 %v1736_v15, %s2634_s12 }
 0x3c1   :  { %2247 = vrot.lane.b32.xlu2 %v1752_v22, %s2635_s13 }
 0x3c2   :  { %2119 = vrot.lane.b32.xlu1 %v1720_v16, %s2636_s14 }
 0x3c3   :  { %v4321_v21 = vpop.permute.xlu2 %1791 }
 0x3c8   :  { %2053 = vrot.lane.b32.xlu0 %v1655_v42, %s2633_s4 }
 0x3c9   :  { %1923 = vrot.lane.b32.xlu2 %v1669_v57, %s2632_s20 }
 0x3ca   :  { %1989 = vrot.lane.b32.xlu1 %v4226_v34, %s2631_s19  ;;  %v4327_v7 = vpop.permute.xlu0 %1775 }
 0x3cb   :  { %v1798_v0 = vpop.permute.xlu2 %1797 }
 0x3cc   :  { %v4330_v32 = vsel %vm1082_vm2, %v1669_v57, %v1798_v0  ;;  %v1772_v14 = vpop.permute.xlu1 %1771 }
 0x3cd   :  { %v2266_v50 = vsel %vm1082_vm2, %v1656_v45, %v1772_v14 }
 0x3d0   :  { %2181 = vrot.lane.b32.xlu0 %v1687_v43, %s2634_s12 }
 0x3d1   :  { %2245 = vrot.lane.b32.xlu2 %v1703_v51, %s2635_s13 }
 0x3d2   :  { %2117 = vrot.lane.b32.xlu1 %v1671_v41, %s2636_s14  ;;  %v4336_v33 = vpop.permute.xlu0 %1781 }
 0x3d3   :  { %v1836_v63 = vpop.permute.xlu2 %1835 }
 0x3d4   :  { %v4339_v31 = vsel %vm1116_vm6, %v2266_v50, %v1836_v63  ;;  %v1778_v9 = vpop.permute.xlu1 %1777  ;;  %v1608_v63 = vld [vmem:[#allocation3] sm:$0xff] }
 0x3d5   :  { %v2269_v28 = vsel %vm1082_vm2, %v4293_v62, %v1778_v9  ;;  %v2267_v9 = vsel %vm1082_vm2, %v4289_v17, %v4309_v29  ;;  %v2270_v29 = vsel %vm1082_vm2, %v4300_v44, %v4314_v52 }
 0x3d8   :  { %2051 = vrot.lane.b32.xlu0 %v4280_v58, %s2633_s4 }
 0x3d9   :  { %1921 = vrot.lane.b32.xlu2 %v1668_v4, %s2632_s20 }
 0x3da   :  { %1987 = vrot.lane.b32.xlu1 %v4218_v6, %s2631_s19  ;;  %v1788_v40 = vpop.permute.xlu0 %1787 }
 0x3db   :  { %v1842_v59 = vpop.permute.xlu2 %1841  ;;  %v4352_v60 = vsel %vm1082_vm2, %v4346_v24, %v1788_v40 }
 0x3dc   :  { %v4355_v30 = vsel %vm1116_vm6, %v2269_v28, %v1842_v59  ;;  %v1784_v12 = vpop.permute.xlu1 %1783  ;;  %v2265_v59 = vsel %vm1082_vm2, %v1608_v63, %v4317_v47 }
 0x3dd   :  { %v2272_v56 = vsel %vm1082_vm2, %v4360_v25, %v1784_v12 }
 0x3e0   :  { %2179 = vrot.lane.b32.xlu0 %v4226_v34, %s2634_s12 }
 0x3e1   :  { %2243 = vrot.lane.b32.xlu2 %v1655_v42, %s2635_s13  ;;  %v4378_v42 = vld [vmem:[#allocation3 + $0xc0] sm:$0xff] }
 0x3e2   :  { %2115 = vrot.lane.b32.xlu1 %v1670_v39, %s2636_s14  ;;  %v1794_v36 = vpop.permute.xlu0 %1793 }
 0x3e3   :  { %v1848_v45 = vpop.permute.xlu2 %1847  ;;  %v4369_v43 = vsel %vm1082_vm2, %v4363_v5, %v1794_v36 }
 0x3e4   :  { %v4372_v51 = vsel %vm1116_vm6, %v2272_v56, %v1848_v45  ;;  %v1790_v34 = vpop.permute.xlu1 %1789  ;;  %v2268_v45 = vsel %vm1082_vm2, %v4305_v1, %v4327_v7  ;;  %v4431_v7 = vld [vmem:[#allocation3 + $0x60] sm:$0xff] }
 0x3e5   :  { %v2275_v15 = vsel %vm1082_vm2, %v4378_v42, %v1790_v34 }
 0x3e8   :  { %2049 = vrot.lane.b32.xlu0 %v4272_v20, %s2633_s4 }
 0x3e9   :  { %1919 = vrot.lane.b32.xlu2 %v4363_v5, %s2632_s20 }
 0x3ea   :  { %1985 = vrot.lane.b32.xlu1 %v4234_v8, %s2631_s19  ;;  %v1800_v41 = vpop.permute.xlu0 %1799 }
 0x3eb   :  { %v1854_v22 = vpop.permute.xlu2 %1853  ;;  %v4385_v16 = vsel %vm1082_vm2, %v1670_v39, %v1800_v41 }
 0x3ec   :  { %v4388_v0 = vsel %vm1116_vm6, %v2275_v15, %v1854_v22  ;;  %v1796_v14 = vpop.permute.xlu1 %1795  ;;  %v1616_v22 = vld [vmem:[#allocation3 + $0xa0] sm:$0xff] }
 0x3ed   :  { %v2278_v50 = vsel %vm1082_vm2, %v1668_v4, %v1796_v14  ;;  %v2273_v52 = vsel %vm1082_vm2, %v1616_v22, %v4297_v46 }
 0x3f0   :  { %2177 = vrot.lane.b32.xlu0 %v4218_v6, %s2634_s12 }
 0x3f1   :  { %2241 = vrot.lane.b32.xlu2 %v4280_v58, %s2635_s13  ;;  %v1619_v58 = vld [vmem:[#allocation3 + $0xd0] sm:$0xff] }
 0x3f2   :  { %2113 = vrot.lane.b32.xlu1 %v1669_v57, %s2636_s14  ;;  %v1838_v39 = vpop.permute.xlu0 %1837  ;;  %v2276_v46 = vsel %vm1082_vm2, %v1619_v58, %v4321_v21 }
 0x3f3   :  { %v1860_v40 = vpop.permute.xlu2 %1859  ;;  %v2283_v28 = vsel %vm1116_vm6, %v2267_v9, %v1838_v39  ;;  %v2271_v9 = vsel %vm1082_vm2, %v4431_v7, %v4336_v33  ;;  %vm2329_vm2 = vcmask 326656  }
 0x3f4   :  { %v4403_v12 = vsel %vm1116_vm6, %v2278_v50, %v1860_v40  ;;  %v1834_v6 = vpop.permute.xlu1 %1833 }
 0x3f5   :  { %v2281_v36 = vsel %vm1116_vm6, %v2265_v59, %v1834_v6 }
 0x3f8   :  { %2047 = vrot.lane.b32.xlu0 %v4285_v55, %s2633_s4 }
 0x3f9   :  { %1917 = vrot.lane.b32.xlu2 %v1619_v58, %s2632_s20 }
 0x3fa   :  { %1983 = vrot.lane.b32.xlu1 %v4214_v49, %s2631_s19  ;;  %v1844_v47 = vpop.permute.xlu0 %1843 }
 0x3fb   :  { %v1898_v57 = vpop.permute.xlu2 %1897  ;;  %v4415_v56 = vsel %vm1116_vm6, %v2270_v29, %v1844_v47 }
 0x3fc   :  { %v4421_v34 = vsel %vm1150_vm7, %v2281_v36, %v1898_v57  ;;  %v1840_v41 = vpop.permute.xlu1 %1839 }
 0x3fd   :  { %v2284_v15 = vsel %vm1116_vm6, %v2268_v45, %v1840_v41 }
 0x400   :  { %2175 = vrot.lane.b32.xlu0 %v4234_v8, %s2634_s12 }
 0x401   :  { %2239 = vrot.lane.b32.xlu2 %v4272_v20, %s2635_s13 }
 0x402   :  { %2111 = vrot.lane.b32.xlu1 %v1668_v4, %s2636_s14  ;;  %v1850_v14 = vpop.permute.xlu0 %1849 }
 0x403   :  { %v1904_v50 = vpop.permute.xlu2 %1903  ;;  %v4434_v63 = vsel %vm1116_vm6, %v2273_v52, %v1850_v14 }
 0x404   :  { %v4440_v8 = vsel %vm1150_vm7, %v2284_v15, %v1904_v50  ;;  %v1846_v20 = vpop.permute.xlu1 %1845  ;;  %v1695_v50 = vld [vmem:[#allocation3 + $0x82] sm:$0xff] }
 0x405   :  { %v4443_v39 = vsel %vm1116_vm6, %v2271_v9, %v1846_v20 }
 0x408   :  { %2045 = vrot.lane.b32.xlu0 %v4268_v27, %s2633_s4 }
 0x409   :  { %1915 = vrot.lane.b32.xlu2 %v4378_v42, %s2632_s20 }
 0x40a   :  { %1981 = vrot.lane.b32.xlu1 %v4206_v3, %s2631_s19  ;;  %v1856_v33 = vpop.permute.xlu0 %1855 }
 0x40b   :  { %v1992_v4 = vpop.permute.xlu2 %1991  ;;  %v4454_v40 = vsel %vm1116_vm6, %v2276_v46, %v1856_v33  ;;  %v1728_v33 = vld [vmem:[#allocation3 + $0x91] sm:$0xff] }
 0x40c   :  { %v1852_v59 = vpop.permute.xlu1 %1851 }
 0x40d   :  { %v4458_v6 = vsel %vm1116_vm6, %v4352_v60, %v1852_v59  ;;  %v1712_v59 = vld [vmem:[#allocation3 + $0x90] sm:$0xff] }
 0x410   :  { %2173 = vrot.lane.b32.xlu0 %v4214_v49, %s2634_s12 }
 0x411   :  { %2237 = vrot.lane.b32.xlu2 %v4285_v55, %s2635_s13 }
 0x412   :  { %2109 = vrot.lane.b32.xlu1 %v4363_v5, %s2636_s14  ;;  %v1862_v21 = vpop.permute.xlu0 %1861 }
 0x413   :  { %v1926_v36 = vpop.permute.xlu2 %1925  ;;  %v2295_v46 = vsel %vm1116_vm6, %v4330_v32, %v1862_v21 }
 0x414   :  { %v1858_v29 = vpop.permute.xlu1 %1857 }
 0x415   :  { %v4468_v47 = vsel %vm1116_vm6, %v4369_v43, %v1858_v29  ;;  %v2311_v29 = vsel %vm1150_vm7, %v2295_v46, %v1926_v36 }
 0x418   :  { %2043 = vrot.lane.b32.xlu0 %v4260_v19, %s2633_s4 }
 0x419   :  { %1913 = vrot.lane.b32.xlu2 %v4346_v24, %s2632_s20 }
 0x41a   :  { %1979 = vrot.lane.b32.xlu1 %v4222_v35, %s2631_s19  ;;  %v1900_v49 = vpop.permute.xlu0 %1899 }
 0x41b   :  { %v2248_v55 = vpop.permute.xlu2 %2247  ;;  %v4478_v60 = vsel %vm1150_vm7, %v4339_v31, %v1900_v49  ;;  %v1663_v31 = vld [vmem:[#allocation3 + $0x80] sm:$0xff] }
 0x41c   :  { %v1864_v5 = vpop.permute.xlu1 %1863 }
 0x420   :  { %2171 = vrot.lane.b32.xlu0 %v4206_v3, %s2634_s12 }
 0x421   :  { %2235 = vrot.lane.b32.xlu2 %v4268_v27, %s2635_s13 }
 0x422   :  { %2107 = vrot.lane.b32.xlu1 %v1619_v58, %s2636_s14  ;;  %v1906_v43 = vpop.permute.xlu0 %1905 }
 0x423   :  { %v1924_v24 = vpop.permute.xlu2 %1923  ;;  %v4487_v57 = vsel %vm1150_vm7, %v4355_v30, %v1906_v43  ;;  %v2296_v30 = vsel %vm1116_vm6, %v4385_v16, %v1864_v5 }
 0x424   :  { %v1902_v45 = vpop.permute.xlu1 %1901 }
 0x425   :  { %v4490_v41 = vsel %vm1150_vm7, %v2283_v28, %v1902_v45 }
 0x428   :  { %2041 = vrot.lane.b32.xlu0 %v4276_v48, %s2633_s4 }
 0x429   :  { %1911 = vrot.lane.b32.xlu2 %v1663_v31, %s2632_s20 }
 0x42a   :  { %1977 = vrot.lane.b32.xlu1 %v4202_v13, %s2631_s19  ;;  %v2056_v3 = vpop.permute.xlu0 %2055 }
 0x42b   :  { %v2246_v27 = vpop.permute.xlu2 %2245 }
 0x42c   :  { %v1928_v58 = vpop.permute.xlu1 %1927 }
 0x42d   :  { %v2312_v15 = vsel %vm1150_vm7, %v2296_v30, %v1928_v58 }
 0x42e   :  { %v2328_v28 = vsel %vm1184_vm9, %v2312_v15, %v1992_v4  ;;  %v1744_v4 = vld [vmem:[#allocation3 + $0x92] sm:$0xff]  ;;  %v2310_v15 = vsel %vm1150_vm7, %v4403_v12, %v1924_v24 }
 0x42f   :  { %v2345_v16 = vsel %vm2329_vm2, %v2328_v28, %v2056_v3 }
 0x430   :  { %2169 = vrot.lane.b32.xlu0 %v4222_v35, %s2634_s12 }
 0x431   :  { %2233 = vrot.lane.b32.xlu2 %v4260_v19, %s2635_s13  ;;  %v1679_v19 = vld [vmem:[#allocation3 + $0x81] sm:$0xff] }
 0x432   :  { %2105 = vrot.lane.b32.xlu1 %v4378_v42, %s2636_s14  ;;  %v2184_v13 = vpop.permute.xlu0 %2183 }
 0x433   :  { %v1922_v48 = vpop.permute.xlu2 %1921 }
 0x434   :  { %v2120_v22 = vpop.permute.xlu1 %2119 }
 0x435   :  { %v2362_v52 = vsel %vm2346_vm4, %v2345_v16, %v2120_v22 }
 0x436   :  { %v2379_v35 = vsel %vm2363_vm5, %v2362_v52, %v2184_v13 }
 0x437   :  { %v2396_v14 = vsel %vm2380_vm8, %v2379_v35, %v2248_v55 }
 0x438   :  { %2544 = vmatpush.xpose.msk.msra.mxu1 %vm2398_vm10, %v2396_v14  ;;  %2039 = vrot.lane.b32.xlu0 %v1695_v50, %s2633_s4 }
 0x439   :  { %1909 = vrot.lane.b32.xlu2 %v4360_v25, %s2632_s20 }
 0x43a   :  { %1975 = vrot.lane.b32.xlu1 %v1679_v19, %s2631_s19  ;;  %v2054_v42 = vpop.permute.xlu0 %2053 }
 0x43b   :  { %v2244_v9 = vpop.permute.xlu2 %2243 }
 0x43c   :  { %v1990_v20 = vpop.permute.xlu1 %1989 }
 0x43d   :  { %v2327_v49 = vsel %vm1184_vm9, %v2311_v29, %v1990_v20 }
 0x43e   :  { %v2344_v43 = vsel %vm2329_vm2, %v2327_v49, %v2054_v42 }
 0x440   :  { %2167 = vrot.lane.b32.xlu0 %v1728_v33, %s2634_s12 }
 0x441   :  { %2231 = vrot.lane.b32.xlu2 %v1744_v4, %s2635_s13 }
 0x442   :  { %2103 = vrot.lane.b32.xlu1 %v1712_v59, %s2636_s14  ;;  %v2182_v55 = vpop.permute.xlu0 %2181 }
 0x443   :  { %v1920_v5 = vpop.permute.xlu2 %1919 }
 0x444   :  { %v2118_v45 = vpop.permute.xlu1 %2117  ;;  %v2308_v59 = vsel %vm1150_vm7, %v4454_v40, %v1920_v5 }
 0x445   :  { %v2361_v32 = vsel %vm2346_vm4, %v2344_v43, %v2118_v45 }
 0x446   :  { %v2378_v21 = vsel %vm2363_vm5, %v2361_v32, %v2182_v55 }
 0x447   :  { %v2395_v3 = vsel %vm2380_vm8, %v2378_v21, %v2246_v27 }
 0x448   :  { %2545 = vmatpush.xpose.msk.msra.mxu1 %vm2398_vm10, %v2395_v3  ;;  %2037 = vrot.lane.b32.xlu0 %v4251_v2, %s2633_s4 }
 0x449   :  { %1907 = vrot.lane.b32.xlu2 %v4431_v7, %s2632_s20 }
 0x44a   :  { %1973 = vrot.lane.b32.xlu1 %v4210_v11, %s2631_s19  ;;  %v2052_v36 = vpop.permute.xlu0 %2051 }
 0x44b   :  { %v2242_v58 = vpop.permute.xlu2 %2241 }
 0x44c   :  { %v1988_v30 = vpop.permute.xlu1 %1987 }
 0x44d   :  { %v2326_v27 = vsel %vm1184_vm9, %v2310_v15, %v1988_v30  ;;  %v1673_v30 = vld [vmem:[#allocation3 + $0x21] sm:$0xff] }
 0x44e   :  { %v2343_v16 = vsel %vm2329_vm2, %v2326_v27, %v2052_v36 }
 0x450   :  { %2165 = vrot.lane.b32.xlu0 %v1679_v19, %s2634_s12 }
 0x451   :  { %2229 = vrot.lane.b32.xlu2 %v1695_v50, %s2635_s13  ;;  %v2309_v50 = vsel %vm1150_vm7, %v4468_v47, %v1922_v48 }
 0x452   :  { %2101 = vrot.lane.b32.xlu1 %v1663_v31, %s2636_s14  ;;  %v2180_v28 = vpop.permute.xlu0 %2179 }
 0x453   :  { %v1918_v13 = vpop.permute.xlu2 %1917 }
 0x454   :  { %v2116_v22 = vpop.permute.xlu1 %2115 }
 0x455   :  { %v2360_v52 = vsel %vm2346_vm4, %v2343_v16, %v2116_v22 }
 0x456   :  { %v2377_v35 = vsel %vm2363_vm5, %v2360_v52, %v2180_v28 }
 0x457   :  { %v2394_v14 = vsel %vm2380_vm8, %v2377_v35, %v2244_v9 }
 0x458   :  { %2546 = vmatpush.xpose.msk.msra.mxu1 %vm2398_vm10, %v2394_v14  ;;  %2035 = vrot.lane.b32.xlu0 %v4264_v61, %s2633_s4 }
 0x459   :  { %2163 = vrot.lane.b32.xlu2 %v4210_v11, %s2634_s12 }
 0x45a   :  { %1971 = vrot.lane.b32.xlu1 %v4187_v10, %s2631_s19  ;;  %v2050_v12 = vpop.permute.xlu0 %2049 }
 0x45b   :  { %v2240_v24 = vpop.permute.xlu2 %2239 }
 0x45c   :  { %v1986_v31 = vpop.permute.xlu1 %1985 }
 0x45d   :  { %v2325_v19 = vsel %vm1184_vm9, %v2309_v50, %v1986_v31 }
 0x45e   :  { %v2342_v9 = vsel %vm2329_vm2, %v2325_v19, %v2050_v12 }
 0x460   :  { %1969 = vrot.lane.b32.xlu0 %v4192_v54, %s2631_s19 }
 0x461   :  { %2033 = vrot.lane.b32.xlu2 %v4247_v53, %s2633_s4 }
 0x462   :  { %2099 = vrot.lane.b32.xlu1 %v4360_v25, %s2636_s14  ;;  %v2178_v11 = vpop.permute.xlu0 %2177 }
 0x463   :  { %v1916_v42 = vpop.permute.xlu2 %1915 }
 0x464   :  { %v2114_v20 = vpop.permute.xlu1 %2113  ;;  %v2306_v28 = vsel %vm1150_vm7, %v4458_v6, %v1916_v42 }
 0x465   :  { %v2359_v46 = vsel %vm2346_vm4, %v2342_v9, %v2114_v20 }
 0x466   :  { %v2376_v47 = vsel %vm2363_vm5, %v2359_v46, %v2178_v11 }
 0x467   :  { %v2393_v48 = vsel %vm2380_vm8, %v2376_v47, %v2242_v58 }
 0x468   :  { %2547 = vmatpush.xpose.msk.msra.mxu1 %vm2398_vm10, %v2393_v48  ;;  %2097 = vrot.lane.b32.xlu0 %v4431_v7, %s2636_s14 }
 0x469   :  { %1967 = vrot.lane.b32.xlu2 %v4197_v26, %s2631_s19 }
 0x46a   :  { %2227 = vrot.lane.b32.xlu1 %v4251_v2, %s2635_s13  ;;  %v2048_v25 = vpop.permute.xlu0 %2047 }
 0x46b   :  { %v2238_v4 = vpop.permute.xlu2 %2237 }
 0x46c   :  { %v1984_v33 = vpop.permute.xlu1 %1983 }
 0x46d   :  { %v2324_v29 = vsel %vm1184_vm9, %v2308_v59, %v1984_v33 }
 0x46e   :  { %v2341_v2 = vsel %vm2329_vm2, %v2324_v29, %v2048_v25 }
 0x470   :  { %2225 = vrot.lane.b32.xlu0 %v4264_v61, %s2635_s13 }
 0x471   :  { %2095 = vrot.lane.b32.xlu2 %v4300_v44, %s2636_s14  ;;  %v2307_v44 = vsel %vm1150_vm7, %v4388_v0, %v1918_v13  ;;  %v1672_v13 = vld [vmem:[#allocation3 + $0x11] sm:$0xff] }
 0x472   :  { %2161 = vrot.lane.b32.xlu1 %v4187_v10, %s2634_s12  ;;  %v2176_v7 = vpop.permute.xlu0 %2175 }
 0x473   :  { %v1914_v40 = vpop.permute.xlu2 %1913 }
 0x474   :  { %v2112_v49 = vpop.permute.xlu1 %2111  ;;  %v2305_v31 = vsel %vm1150_vm7, %v4434_v63, %v1914_v40 }
 0x475   :  { %v2358_v55 = vsel %vm2346_vm4, %v2341_v2, %v2112_v49  ;;  %v2500_v2 = vld [vmem:[%s4719_s7] sm:$0xff] }
 0x476   :  { %v2375_v43 = vsel %vm2363_vm5, %v2358_v55, %v2176_v7 }
 0x477   :  { %v2392_v5 = vsel %vm2380_vm8, %v2375_v43, %v2240_v24 }
 0x478   :  { %2548 = vmatpush.xpose.msk.msra.mxu1 %vm2398_vm10, %v2392_v5  ;;  %2159 = vrot.lane.b32.xlu0 %v4192_v54, %s2634_s12  ;;  %v1674_v54 = vld [vmem:[#allocation3 + $0x31] sm:$0xff] }
 0x479   :  { %2223 = vrot.lane.b32.xlu2 %v4247_v53, %s2635_s13 }
 0x47a   :  { %2031 = vrot.lane.b32.xlu1 %v4242_v38, %s2633_s4  ;;  %v2046_v10 = vpop.permute.xlu0 %2045 }
 0x47b   :  { %v2236_v45 = vpop.permute.xlu2 %2235 }
 0x47c   :  { %v1982_v61 = vpop.permute.xlu1 %1981 }
 0x47d   :  { %v2323_v32 = vsel %vm1184_vm9, %v2307_v44, %v1982_v61 }
 0x47e   :  { %v2340_v21 = vsel %vm2329_vm2, %v2323_v32, %v2046_v10 }
 0x480   :  { %2029 = vrot.lane.b32.xlu0 %v4255_v23, %s2633_s4 }
 0x481   :  { %2157 = vrot.lane.b32.xlu2 %v4197_v26, %s2634_s12 }
 0x482   :  { %1965 = vrot.lane.b32.xlu1 %v1674_v54, %s2631_s19  ;;  %v2174_v53 = vpop.permute.xlu0 %2173 }
 0x483   :  { %v1912_v15 = vpop.permute.xlu2 %1911 }
 0x484   :  { %v2110_v3 = vpop.permute.xlu1 %2109  ;;  %v2304_v47 = vsel %vm1150_vm7, %v4372_v51, %v1912_v15 }
 0x485   :  { %v2357_v36 = vsel %vm2346_vm4, %v2340_v21, %v2110_v3 }
 0x486   :  { %v2374_v0 = vsel %vm2363_vm5, %v2357_v36, %v2174_v53 }
 0x487   :  { %v2391_v58 = vsel %vm2380_vm8, %v2374_v0, %v2238_v4 }
 0x488   :  { %2549 = vmatpush.xpose.msk.msra.mxu1 %vm2398_vm10, %v2391_v58  ;;  %1963 = vrot.lane.b32.xlu0 %v1673_v30, %s2631_s19 }
 0x489   :  { %2027 = vrot.lane.b32.xlu2 %v4238_v37, %s2633_s4 }
 0x48a   :  { %2093 = vrot.lane.b32.xlu1 %v4293_v62, %s2636_s14  ;;  %v2044_v26 = vpop.permute.xlu0 %2043 }
 0x48b   :  { %v2234_v35 = vpop.permute.xlu2 %2233 }
 0x48c   :  { %v1980_v27 = vpop.permute.xlu1 %1979 }
 0x48d   :  { %v2322_v16 = vsel %vm1184_vm9, %v2306_v28, %v1980_v27 }
 0x48e   :  { %v2339_v62 = vsel %vm2329_vm2, %v2322_v16, %v2044_v26 }
 0x490   :  { %2091 = vrot.lane.b32.xlu0 %v4305_v1, %s2636_s14 }
 0x491   :  { %1961 = vrot.lane.b32.xlu2 %v1672_v13, %s2631_s19  ;;  %s2518_s19 = sshll.u32 %s4720_s8, 4  ;;  %s2519_s19 = int_to_ptr.hbm [resolvable:$true] %s2518_s19 }
 0x492   :  { %2221 = vrot.lane.b32.xlu1 %v4242_v38, %s2635_s13  ;;  %v2172_v22 = vpop.permute.xlu0 %2171 }
 0x493   :  { %v1910_v24 = vpop.permute.xlu2 %1909 }
 0x494   :  { %v2108_v52 = vpop.permute.xlu1 %2107  ;;  %v2303_v43 = vsel %vm1150_vm7, %v4443_v39, %v1910_v24 }
 0x495   :  { %v2356_v14 = vsel %vm2346_vm4, %v2339_v62, %v2108_v52 }
 0x496   :  { %v2373_v6 = vsel %vm2363_vm5, %v2356_v14, %v2172_v22 }
 0x497   :  { %v2390_v12 = vsel %vm2380_vm8, %v2373_v6, %v2236_v45 }
 0x498   :  { %2550 = vmatpush.xpose.msk.msra.mxu1 %vm2398_vm10, %v2390_v12  ;;  %2219 = vrot.lane.b32.xlu0 %v4255_v23, %s2635_s13 }
 0x499   :  { %2089 = vrot.lane.b32.xlu2 %v4289_v17, %s2636_s14 }
 0x49a   :  { %2155 = vrot.lane.b32.xlu1 %v1674_v54, %s2634_s12  ;;  %v2042_v38 = vpop.permute.xlu0 %2041 }
 0x49b   :  { %v2232_v63 = vpop.permute.xlu2 %2231 }
 0x49c   :  { %v1978_v1 = vpop.permute.xlu1 %1977 }
 0x49d   :  { %v2321_v50 = vsel %vm1184_vm9, %v2305_v31, %v1978_v1 }
 0x49e   :  { %v2338_v23 = vsel %vm2329_vm2, %v2321_v50, %v2042_v38 }
 0x4a0   :  { %2153 = vrot.lane.b32.xlu0 %v1673_v30, %s2634_s12 }
 0x4a2   :  { %2025 = vrot.lane.b32.xlu1 %v4230_v18, %s2633_s4  ;;  %v2170_v19 = vpop.permute.xlu0 %2169  ;;  %v2493_v18 = vld [vmem:[%s4718_s6] sm:$0xff] }
 0x4a3   :  { %v1908_v33 = vpop.permute.xlu2 %1907 }
 0x4a4   :  { %v2106_v11 = vpop.permute.xlu1 %2105  ;;  %v2302_v39 = vsel %vm1150_vm7, %v4415_v56, %v1908_v33 }
 0x4a5   :  { %v2355_v17 = vsel %vm2346_vm4, %v2338_v23, %v2106_v11 }
 0x4a6   :  { %v2372_v42 = vsel %vm2363_vm5, %v2355_v17, %v2170_v19 }
 0x4a7   :  { %v2389_v9 = vsel %vm2380_vm8, %v2372_v42, %v2234_v35 }
 0x4a8   :  { %2551 = vmatpush.xpose.msk.msra.mxu1 %vm2398_vm10, %v2389_v9 }
 0x4aa   :  { %2217 = vrot.lane.b32.xlu1 %v4238_v37, %s2635_s13  ;;  %v2040_v20 = vpop.permute.xlu0 %2039 }
 0x4ab   :  { %v2230_v55 = vpop.permute.xlu2 %2229 }
 0x4ac   :  { %v1976_v46 = vpop.permute.xlu1 %1975 }
 0x4ad   :  { %v2320_v48 = vsel %vm1184_vm9, %v2304_v47, %v1976_v46 }
 0x4ae   :  { %v2337_v4 = vsel %vm2329_vm2, %v2320_v48, %v2040_v20 }
 0x4b2   :  { %2496 = vperm.xlu1 %2589, %v2493_v18   ;;  %v2168_v25 = vpop.permute.xlu0 %2167 }
 0x4b3   :  { %v2164_v32 = vpop.permute.xlu2 %2163 }
 0x4b4   :  { %v2104_v59 = vpop.permute.xlu1 %2103 }
 0x4b5   :  { %v2354_v29 = vsel %vm2346_vm4, %v2337_v4, %v2104_v59 }
 0x4b6   :  { %v2371_v37 = vsel %vm2363_vm5, %v2354_v29, %v2168_v25 }
 0x4b7   :  { %v2388_v7 = vsel %vm2380_vm8, %v2371_v37, %v2232_v63 }
 0x4b8   :  { %2552 = vmatpush.xpose.msk.msra.mxu1 %vm2398_vm10, %v2388_v7 }
 0x4ba   :  { %2503 = vperm.xlu1 %2589, %v2500_v2   ;;  %v2038_v51 = vpop.permute.xlu0 %2037 }
 0x4bb   :  { %v2034_v3 = vpop.permute.xlu2 %2033 }
 0x4bc   :  { %v1974_v49 = vpop.permute.xlu1 %1973 }
 0x4bd   :  { %v2319_v40 = vsel %vm1184_vm9, %v2303_v43, %v1974_v49 }
 0x4be   :  { %v2336_v10 = vsel %vm2329_vm2, %v2319_v40, %v2038_v51 }
 0x4c2   :  { %v2166_v5 = vpop.permute.xlu0 %2165 }
 0x4c3   :  { %v1968_v27 = vpop.permute.xlu2 %1967 }
 0x4c4   :  { %v2102_v61 = vpop.permute.xlu1 %2101  ;;  %v2316_v1 = vsel %vm1184_vm9, %v4440_v8, %v1968_v27 }
 0x4c5   :  { %v2353_v44 = vsel %vm2346_vm4, %v2336_v10, %v2102_v61 }
 0x4c6   :  { %v2370_v45 = vsel %vm2363_vm5, %v2353_v44, %v2166_v5 }
 0x4c7   :  { %v2387_v54 = vsel %vm2380_vm8, %v2370_v45, %v2230_v55  ;;  %v2397_v45 = vld [vmem:[%s4717_s5] sm:$0xff]  ;;  %s2637_s5 = smov [#allocation4]  }
 0x4c8   :  { %2553 = vmatpush.xpose.msk.msra.mxu1 %vm2398_vm10, %v2387_v54  ;;  %s2516_s16 = sshll.u32 %s2637_s5, 4  ;;  %s2517_s16 = int_to_ptr.vmem [resolvable:$true] %s2516_s16 }
 0x4ca   :  { %v2036_v53 = vpop.permute.xlu0 %2035 }
 0x4cb   :  { %v2096_v14 = vpop.permute.xlu2 %2095 }
 0x4cc   :  { %v1972_v21 = vpop.permute.xlu1 %1971 }
 0x4cd   :  { %v2318_v58 = vsel %vm1184_vm9, %v2302_v39, %v1972_v21 }
 0x4ce   :  { %v2335_v30 = vsel %vm2329_vm2, %v2318_v58, %v2036_v53 }
 0x4d2   :  { %v1970_v36 = vpop.permute.xlu0 %1969 }
 0x4d3   :  { %v2317_v22 = vsel %vm1184_vm9, %v4487_v57, %v1970_v36  ;;  %v2224_v50 = vpop.permute.xlu2 %2223 }
 0x4d4   :  { %v2100_v0 = vpop.permute.xlu1 %2099  ;;  %v2334_v62 = vsel %vm2329_vm2, %v2317_v22, %v2034_v3 }
 0x4d5   :  { %v2352_v26 = vsel %vm2346_vm4, %v2335_v30, %v2100_v0 }
 0x4d6   :  { %v2369_v13 = vsel %vm2363_vm5, %v2352_v26, %v2164_v32 }
 0x4da   :  { %v2098_v15 = vpop.permute.xlu0 %2097 }
 0x4db   :  { %v2351_v52 = vsel %vm2346_vm4, %v2334_v62, %v2098_v15  ;;  %v2158_v42 = vpop.permute.xlu2 %2157 }
 0x4dc   :  { %v2228_v28 = vpop.permute.xlu1 %2227 }
 0x4dd   :  { %v2386_v16 = vsel %vm2380_vm8, %v2369_v13, %v2228_v28 }
 0x4de   :  { %2554 = vmatpush.xpose.msk.msra.mxu1 %vm2398_vm10, %v2386_v16 }
 0x4e2   :  { %v2226_v56 = vpop.permute.xlu0 %2225 }
 0x4e3   :  { %v2028_v47 = vpop.permute.xlu2 %2027 }
 0x4e4   :  { %v2162_v35 = vpop.permute.xlu1 %2161 }
 0x4e5   :  { %v2368_v6 = vsel %vm2363_vm5, %v2351_v52, %v2162_v35 }
 0x4e6   :  { %v2385_v12 = vsel %vm2380_vm8, %v2368_v6, %v2226_v56 }
 0x4e7   :  { %2555 = vmatpush.xpose.msk.msra.mxu1 %vm2398_vm10, %v2385_v12 }
 0x4ea   :  { %v2160_v38 = vpop.permute.xlu0 %2159 }
 0x4eb   :  { %v1962_v2 = vpop.permute.xlu2 %1961 }
 0x4ec   :  { %v2032_v24 = vpop.permute.xlu1 %2031  ;;  %v2313_v55 = vsel %vm1184_vm9, %v4421_v34, %v1962_v2 }
 0x4ed   :  { %v2333_v57 = vsel %vm2329_vm2, %v2316_v1, %v2032_v24 }
 0x4ee   :  { %v2350_v31 = vsel %vm2346_vm4, %v2333_v57, %v2096_v14 }
 0x4ef   :  { %v2367_v19 = vsel %vm2363_vm5, %v2350_v31, %v2160_v38 }
 0x4f0   :  { %v2384_v23 = vsel %vm2380_vm8, %v2367_v19, %v2224_v50 }
 0x4f1   :  { %2556 = vmatpush.xpose.msk.msra.mxu1 %vm2398_vm10, %v2384_v23 }
 0x4f2   :  { %v2030_v11 = vpop.permute.xlu0 %2029 }
 0x4f4   :  { %v1966_v17 = vpop.permute.xlu1 %1965 }
 0x4f5   :  { %v2315_v8 = vsel %vm1184_vm9, %v4490_v41, %v1966_v17 }
 0x4f6   :  { %v2332_v20 = vsel %vm2329_vm2, %v2315_v8, %v2030_v11 }
 0x4fa   :  { %v1964_v9 = vpop.permute.xlu0 %1963 }
 0x4fb   :  { %v2314_v4 = vsel %vm1184_vm9, %v4478_v60, %v1964_v9  ;;  %v2090_v60 = vpop.permute.xlu2 %2089 }
 0x4fc   :  { %v2094_v63 = vpop.permute.xlu1 %2093  ;;  %v2331_v59 = vsel %vm2329_vm2, %v2314_v4, %v2028_v47 }
 0x4fd   :  { %v2349_v46 = vsel %vm2346_vm4, %v2332_v20, %v2094_v63 }
 0x4fe   :  { %v2366_v25 = vsel %vm2363_vm5, %v2349_v46, %v2158_v42 }
 0x502   :  { %v2092_v18 = vpop.permute.xlu0 %2091 }
 0x503   :  { %v2348_v41 = vsel %vm2346_vm4, %v2331_v59, %v2092_v18 }
 0x504   :  { %v2222_v48 = vpop.permute.xlu1 %2221 }
 0x505   :  { %v2383_v33 = vsel %vm2380_vm8, %v2366_v25, %v2222_v48 }
 0x506   :  { %2557 = vmatpush.xpose.msk.msra.mxu1 %vm2398_vm10, %v2383_v33 }
 0x50a   :  { %v2220_v29 = vpop.permute.xlu0 %2219 }
 0x50c   :  { %v2156_v37 = vpop.permute.xlu1 %2155 }
 0x50d   :  { %v2365_v7 = vsel %vm2363_vm5, %v2348_v41, %v2156_v37 }
 0x50e   :  { %v2382_v51 = vsel %vm2380_vm8, %v2365_v7, %v2220_v29 }
 0x50f   :  { %2558 = vmatpush.xpose.msk.msra.mxu1 %vm2398_vm10, %v2382_v51 }
 0x512   :  { %v2154_v5 = vpop.permute.xlu0 %2153 }
 0x514   :  { %v2026_v49 = vpop.permute.xlu1 %2025 }
 0x515   :  { %v2330_v43 = vsel %vm2329_vm2, %v2313_v55, %v2026_v49 }
 0x516   :  { %v2347_v40 = vsel %vm2346_vm4, %v2330_v43, %v2090_v60 }
 0x517   :  { %v2364_v10 = vsel %vm2363_vm5, %v2347_v40, %v2154_v5 }
 0x51c   :  { %v2218_v61 = vpop.permute.xlu1 %2217 }
 0x51d   :  { %v2381_v44 = vsel %vm2380_vm8, %v2364_v10, %v2218_v61 }
 0x51e   :  { %2559 = vmatpush.xpose.msk.msra.mxu1 %vm2398_vm10, %v2381_v44 }
 0x521   :  { %2560 = vmatmul.msk.f32.vlgmr.msra.gmra.mxu1 %vm2398_vm10, %v2397_v45 }
 0x524   :  { %v2497_v27 = vpop.permute.xlu1 %2496 }
 0x52c   :  { %v2504_v35 = vpop.permute.xlu1 %2503 }
 0x59e   :  { %v2467_v34 = vpop.f32.mrf.mxu1 }
 0x59f   :  { %v2472_v32 = vmul.f32 %v2467_v34, %v2467_v34  ;;  %2470 = vadd.xlane.f32.xlu2 %v2467_v34 }
 0x5a1   :  { %2473 = vadd.xlane.f32.xlu0 %v2472_v32 }
 0x612   :  { %v2471_v54 = vpop.xlane.xlu2 %2470 }
 0x613   :  { %v2475_v53 = vmul.f32 0.0078125, %v2471_v54 }
 0x614   :  { %v2474_v21 = vpop.xlane.xlu0 %2473 }
 0x615   :  { %v2477_v3 = vmul.f32 %v2475_v53, %v2475_v53  ;;  %v2476_v36 = vmul.f32 0.0078125, %v2474_v21  ;;  %v2480_v22 = vsub.f32 %v2467_v34, %v2475_v53 }
 0x617   :  { %v2478_v39 = vsub.f32 %v2476_v36, %v2477_v3 }
 0x619   :  { %v2479_v0 = vmax.f32 %v2478_v39, 0.0 }
 0x61b   :  { %v2481_v58 = vadd.f32 1e-05, %v2479_v0 }
 0x61d   :  { %2594 = vrsqrt.f32 %v2481_v58  ;;  %vm2488_vm7 = vweird.f32 %v2481_v58 }
 0x623   :  { %v2595_v30 = vpop.eup %2594 }
 0x624   :  { %v2483_v26 = vmul.f32 %v2595_v30, %v2481_v58  ;;  %vm2489_vm6 = vweird.f32 %v2595_v30 }
 0x625   :  { %vm2490_vm9 = vmor %vm2488_vm7, %vm2489_vm6 }
 0x626   :  { %v2484_v15 = vmul.f32 %v2595_v30, %v2483_v26 }
 0x628   :  { %v2485_v28 = vmul.f32 0.5, %v2484_v15 }
 0x62a   :  { %v2486_v13 = vsub.f32 1.5, %v2485_v28 }
 0x62c   :  { %v2487_v16 = vmul.f32 %v2595_v30, %v2486_v13 }
 0x62e   :  { %v2491_v56 = vsel %vm2490_vm9, %v2595_v30, %v2487_v16 }
 0x62f   :  { %v2492_v62 = vmul.f32 %v2491_v56, %v2480_v22 }
 0x631   :  { %v2499_v52 = vmul.f32 %v2497_v27, %v2492_v62 }
 0x633   :  { %v2506_v14 = vadd.f32 %v2504_v35, %v2499_v52 }
 0x635   :  { %vm2507_vm11 = vcmp.gt.f32.partialorder %v2506_v14, 0.0  ;;  %v2508_v6 = vmul.f32 0.2, %v2506_v14 }
 0x637   :  { %v2509_v12 = vsel %vm2507_vm11, %v2506_v14, %v2508_v6 }
 0x638   :  { %2510 = vst [vmem:[#allocation4] sm:$0xff] %v2509_v12 }
 0x639   :  { %2521 = dma.vmem_to_hbm [thread:$0]  %s2517_s16, 128, %s2519_s19, [#allocation5]  }
 0x63a   :  { %2620 = dma.done.wait [#allocation5], 128  }
 0x63b   :  { %2621 = vsyncadd [#allocation5], 4294967168 }
 0x63c   :  { %2526 = vsyncpa [#allocation5], 1 }

</bundles_post_ra>
